<compile_context>
chip_gen: v5e
topology: v5e:2x2
jax: 0.10.0
libtpu: 0.0.40
codegen_flags: <defaults>
</compile_context>

<pallas_src>
import numpy as np

import jax
import jax.numpy as jnp
from jax.experimental import pallas as pl
from jax.experimental.pallas import tpu as pltpu

LEAKY_SLOPE = 0.2


def _round_up(x, m):
    return ((x + m - 1) // m) * m


# ------------------------------ Pallas kernels ------------------------------ #
def _conv_matmul_kernel(lhs_ref, rhs_ref, scale_ref, shift_ref, o_ref):
    """o = leaky_relu((lhs @ rhs) * scale + shift); 128-lane-dense output tile.

    lhs/rhs are bf16 (f32 MXU accumulate); the BatchNorm scale/shift are applied
    in the f32 epilogue so folding them never touches the bf16 weights.  The
    activation is written back directly in bf16 (the next layer consumes bf16).
    """
    acc = jnp.dot(lhs_ref[...], rhs_ref[...],
                  preferred_element_type=jnp.float32)
    y = acc * scale_ref[...] + shift_ref[...]
    y = jnp.where(y > 0, y, LEAKY_SLOPE * y)
    o_ref[...] = y.astype(o_ref.dtype)


def _final_fused_kernel(lhs_ref, rhs_ref, scale_ref, shift_ref, w6_ref,
                        sel_ref, b6_ref, o_ref):
    """Fused: conv5(+BN affine)+LeakyReLU, then the 4x4/valid conv + sigmoid.

    b6 is a true scalar and lives in SMEM (a (1,1) VMEM block would occupy a
    full (8,128) tile and a masked store)."""
    acc = jnp.dot(lhs_ref[...], rhs_ref[...],
                  preferred_element_type=jnp.float32)
    y = acc * scale_ref[...] + shift_ref[...]
    y = jnp.where(y > 0, y, LEAKY_SLOPE * y)               # (M5, 128) layer-5 act
    contrib = y * w6_ref[...]                              # per-row final-conv weight
    per_batch = jnp.dot(sel_ref[...], contrib,
                        preferred_element_type=jnp.float32)          # (R, 128)
    v = jnp.sum(per_batch, axis=-1, keepdims=True) + b6_ref[0]        # (R, 1)
    o_ref[...] = 1.0 / (1.0 + jnp.exp(-v))


# ------------------------------ pallas_call wrappers ------------------------ #
def _choose_tile_m(mp):
    """M tile: multiple of 16 (bf16 sublane packing) with >=2 grid steps when
    possible so both v7x TensorCores get a block."""
    if mp >= 256:
        return 128
    if mp >= 32:
        return _round_up(mp // 2, 16)
    return mp


def conv_stage(lhs, rhs, scale_row, shift_row, out_dtype=jnp.bfloat16):
    """leaky_relu((lhs @ rhs) * scale + shift) as one tiled Pallas matmul.

    lhs: (M, K) bf16 patch strips, rhs: (K, CL) bf16 banded weight,
    scale_row/shift_row: (1, CL) f32.  Output dtype is bf16 by default so the
    next layer's read traffic is halved.
    """
    M, K = lhs.shape
    CL = rhs.shape[1]
    # K padded to a 128 multiple: unmasked vregs, full MXU K-passes.
    Kp = _round_up(K, 128)
    if Kp != K:
        lhs = jnp.pad(lhs, ((0, 0), (0, Kp - K)))
        rhs = jnp.pad(rhs, ((0, Kp - K), (0, 0)))
    Mp = _round_up(M, 16)
    TM = _choose_tile_m(Mp)
    Mp = _round_up(Mp, TM)
    if Mp != M:
        lhs = jnp.pad(lhs, ((0, Mp - M), (0, 0)))
    out = pl.pallas_call(
        _conv_matmul_kernel,
        out_shape=jax.ShapeDtypeStruct((Mp, CL), out_dtype),
        grid_spec=pltpu.PrefetchScalarGridSpec(
            num_scalar_prefetch=0,
            grid=(Mp // TM,),
            in_specs=[
                pl.BlockSpec((TM, Kp), lambda i: (i, 0)),   # patch-strip tile
                pl.BlockSpec((Kp, CL), lambda i: (0, 0)),   # banded weight
                pl.BlockSpec((1, CL), lambda i: (0, 0)),    # BN scale (f32)
                pl.BlockSpec((1, CL), lambda i: (0, 0)),    # BN shift / bias
            ],
            out_specs=pl.BlockSpec((TM, CL), lambda i: (i, 0)),
        ),
        compiler_params=pltpu.CompilerParams(
            dimension_semantics=("parallel",)),
    )(lhs, rhs, scale_row, shift_row)
    return out[:M]


def final_stage(lhs, rhs, scale_row, shift_row, w6_rows, sel, b6, n_batch):
    """Single-block fused layer-5 + layer-6 kernel; returns (n_batch, 1) f32."""
    M, K = lhs.shape
    CL = rhs.shape[1]
    R = sel.shape[0]
    Kp = _round_up(K, 128)
    if Kp != K:
        lhs = jnp.pad(lhs, ((0, 0), (0, Kp - K)))
        rhs = jnp.pad(rhs, ((0, Kp - K), (0, 0)))
    out = pl.pallas_call(
        _final_fused_kernel,
        out_shape=jax.ShapeDtypeStruct((R, 1), jnp.float32),
        grid_spec=pltpu.PrefetchScalarGridSpec(
            num_scalar_prefetch=0,
            grid=(1,),
            in_specs=[
                pl.BlockSpec((M, Kp), lambda i: (0, 0)),    # layer-5 patches (bf16)
                pl.BlockSpec((Kp, CL), lambda i: (0, 0)),   # layer-5 weight (bf16)
                pl.BlockSpec((1, CL), lambda i: (0, 0)),    # BN scale (f32)
                pl.BlockSpec((1, CL), lambda i: (0, 0)),    # BN shift (f32)
                pl.BlockSpec((M, CL), lambda i: (0, 0)),    # final-conv weights per row
                pl.BlockSpec((R, M), lambda i: (0, 0)),     # per-batch row selector
                pl.BlockSpec(memory_space=pltpu.MemorySpace.SMEM),   # b6 scalar
            ],
            out_specs=pl.BlockSpec((R, 1), lambda i: (0, 0)),
        ),
        compiler_params=pltpu.CompilerParams(
            dimension_semantics=("arbitrary",)),
    )(lhs, rhs, scale_row, shift_row, w6_rows, sel, b6)
    return out[:n_batch]


# ------------------------------ JAX glue (im2col) --------------------------- #
def strip_im2col(x, group, pad):
    """Grouped im2col for a 4x4 / stride-2 conv.

    x: (N, H, W, C).  Returns LHS of shape (N*Ho*(Wo//group), 4*(2*group+2)*C)
    with row r=(n, ho, wg) and column k=(kh, j, ci) where
      LHS[r, k] = xpad[n, 2*ho + kh, 2*group*wg + j, ci].
    Works directly on the (bf16) activations; dtype is preserved.
    """
    N, H, W, C = x.shape
    Ho = (H + 2 * pad - 4) // 2 + 1
    Wo = (W + 2 * pad - 4) // 2 + 1
    assert Wo % group == 0
    ng = Wo // group
    win = 2 * group + 2
    xp = jnp.pad(x, ((0, 0), (pad, pad), (pad, pad), (0, 0)))
    per_kh = []
    for kh in range(4):
        xk = xp[:, kh:kh + 2 * Ho - 1:2, :, :]                  # (N, Ho, W+2p, C)
        wins = [xk[:, :, 2 * group * wg:2 * group * wg + win, :]
                for wg in range(ng)]
        per_kh.append(jnp.stack(wins, axis=2))                  # (N, Ho, ng, win, C)
    strips = jnp.stack(per_kh, axis=3)                          # (N, Ho, ng, 4, win, C)
    return strips.reshape(N * Ho * ng, 4 * win * C), Ho, Wo


def banded_weight(w, group):
    """w: (4, 4, Cin, Cout) -> (4*(2*group+2)*Cin, group*Cout) banded matrix
    so that strip_im2col(x) @ banded_weight(w) equals the stride-2 conv."""
    _, _, cin, cout = w.shape
    win = 2 * group + 2
    shifted = [jnp.pad(w, ((0, 0), (2 * g, win - 4 - 2 * g), (0, 0), (0, 0)))
               for g in range(group)]
    rhs = jnp.stack(shifted, axis=3)            # (4, win, Cin, group, Cout)
    return rhs.reshape(4 * win * cin, group * cout)


def _lane_row(v, group):
    """Tile a per-channel vector to the (1, group*Cout) lane order (g, cout)."""
    cout = v.shape[-1]
    return jnp.tile(v.reshape(1, cout), (1, group)).astype(jnp.float32)


def conv_block(x, w, scale, shift, pad=1):
    """4x4 stride-2 conv (+ BN affine in-epilogue) + LeakyReLU.  x: NHWC bf16."""
    N, H, W, Cin = x.shape
    Cout = w.shape[-1]
    Wo = (W + 2 * pad - 4) // 2 + 1
    group = max(1, min(128 // max(Cout, 1), Wo))
    while Wo % group:           # keep group a divisor of Wo (always true here)
        group //= 2
    rhs = banded_weight(w, group).astype(jnp.bfloat16)
    lhs, Ho, Wo = strip_im2col(x, group, pad)            # bf16, no extra cast
    out = conv_stage(lhs, rhs, _lane_row(scale, group), _lane_row(shift, group),
                     out_dtype=jnp.bfloat16)             # (m, group*Cout) bf16
    return out.reshape(N, Ho, Wo, Cout)


def final_block(x, w5, scale5, shift5, w6, b6):
    """Fused conv5(+BN)+LeakyReLU and conv6 (4x4, valid, stride 2) + sigmoid."""
    N, H, W, Cin = x.shape                       # (N, 8, 8, fd*8), bf16
    Cout5 = w5.shape[-1]                         # fd*16
    Wo5 = (W + 2 - 4) // 2 + 1
    group = max(1, min(128 // max(Cout5, 1), Wo5))
    lhs, Ho, Wo = strip_im2col(x, group, 1)      # bf16, tiny
    assert (Ho, Wo) == (4, 4)                    # final 4x4/valid conv -> 1x1
    ng = Wo // group
    rhs = banded_weight(w5, group).astype(jnp.bfloat16)
    M = lhs.shape[0]                             # N*Ho*ng
    CL = group * Cout5

    # Final-conv weight arranged to match layer-5 output rows/lanes.
    w6_rows = w6[:, :, :, 0].reshape(Ho, ng, group, Cout5)
    w6_rows = jnp.tile(w6_rows.reshape(Ho * ng, CL), (N, 1)).astype(jnp.float32)

    # Per-batch row selector; rows_out generalizes to any batch size.
    rows_out = _round_up(max(N, 1), 8)
    per_img = Ho * ng
    sel_np = np.zeros((rows_out, M), np.float32)
    for n in range(N):
        sel_np[n, n * per_img:(n + 1) * per_img] = 1.0
    sel = jnp.asarray(sel_np)
    b6_arr = jnp.asarray(b6, jnp.float32).reshape(1,)

    out = final_stage(lhs, rhs, _lane_row(scale5, group), _lane_row(shift5, group),
                      w6_rows, sel, b6_arr, N)
    return out.reshape(N, 1, 1, 1)


# ------------------------------ Parameters ---------------------------------- #
def init_discriminator_params(key, img_channels, features_d):
    """Deterministic synthetic params matching Discriminator_dc's shapes."""
    fd = features_d
    cfg = [  # (Cin, Cout, has_bias, has_bn) for the five stride-2/pad-1 convs
        (img_channels, fd,      True,  False),
        (fd,           fd * 2,  False, True),
        (fd * 2,       fd * 4,  False, True),
        (fd * 4,       fd * 8,  False, True),
        (fd * 8,       fd * 16, False, True),
    ]
    eps = 1e-5
    blocks = []
    for (cin, cout, has_bias, has_bn) in cfg:
        key, kw_, kb_, kg_, kbe_, km_, kv_ = jax.random.split(key, 7)
        w = 0.02 * jax.random.normal(kw_, (4, 4, cin, cout), jnp.float32)
        if has_bn:
            gamma = 1.0 + 0.1 * jax.random.normal(kg_, (cout,), jnp.float32)
            beta = 0.1 * jax.random.normal(kbe_, (cout,), jnp.float32)
            rmean = 0.05 * jax.random.normal(km_, (cout,), jnp.float32)
            rvar = 1.0 + 0.1 * jnp.abs(jax.random.normal(kv_, (cout,), jnp.float32))
            scale = gamma / jnp.sqrt(rvar + eps)
            shift = beta - rmean * scale
        else:
            bias = (0.02 * jax.random.normal(kb_, (cout,), jnp.float32)
                    if has_bias else jnp.zeros((cout,), jnp.float32))
            scale = jnp.ones((cout,), jnp.float32)
            shift = bias
        blocks.append((w, scale, shift))
    key, kw6, kb6 = jax.random.split(key, 3)
    w6 = 0.02 * jax.random.normal(kw6, (4, 4, fd * 16, 1), jnp.float32)
    b6 = 0.02 * jax.random.normal(kb6, (), jnp.float32)
    return {"blocks": blocks, "final_w": w6, "final_b": b6}


# ------------------------------ Forward passes ------------------------------- #
def discriminator_dc_forward(x_nchw, params):
    x = jnp.transpose(x_nchw, (0, 2, 3, 1)).astype(jnp.bfloat16)  # NCHW -> NHWC
    for (w, scale, shift) in params["blocks"][:-1]:
        x = conv_block(x, w, scale, shift, pad=1)
    w5, scale5, shift5 = params["blocks"][-1]
    return final_block(x, w5, scale5, shift5,
                       params["final_w"], params["final_b"])   # (N, 1, 1, 1) f32


def reference_forward(x_nchw, params):
    """Pure-JAX reference (lax conv, f32) for the correctness check."""
    x = jnp.transpose(x_nchw, (0, 2, 3, 1))
    for (w, scale, shift) in params["blocks"]:
        y = jax.lax.conv_general_dilated(
            x, w, window_strides=(2, 2), padding=[(1, 1), (1, 1)],
            dimension_numbers=("NHWC", "HWIO", "NHWC"))
        y = y * scale.reshape(1, 1, 1, -1) + shift.reshape(1, 1, 1, -1)
        x = jnp.where(y > 0, y, LEAKY_SLOPE * y)
    y = jax.lax.conv_general_dilated(
        x, params["final_w"], window_strides=(2, 2), padding=[(0, 0), (0, 0)],
        dimension_numbers=("NHWC", "HWIO", "NHWC")) + params["final_b"]
    y = jax.nn.sigmoid(y)
    return jnp.transpose(y, (0, 3, 1, 2))


if __name__ == "__main__":
    # Smallest shapes consistent with the 6-conv DCGAN stack: 128x128 spatial
    # input is required to reach the final 4x4 -> 1x1 valid conv.
    batch, img_channels, features_d, img_size = 2, 3, 8, 128

    key = jax.random.PRNGKey(0)
    key, kx = jax.random.split(key)
    x = jax.random.normal(kx, (batch, img_channels, img_size, img_size),
                          jnp.float32)
    params = init_discriminator_params(key, img_channels, features_d)

    fwd = jax.jit(discriminator_dc_forward)
    out = jax.block_until_ready(fwd(x, params))
    assert out.shape == (batch, 1, 1, 1), out.shape

    ref = jax.block_until_ready(reference_forward(x, params))
    np.testing.assert_allclose(np.asarray(out), np.asarray(ref),
                               rtol=1e-2, atol=1e-2)

    print("KERNEL_OK")
</pallas_src>

<mosaic_0001>
module attributes {stable_mosaic.version = 11 : i64} {
  func.func @_conv_matmul_kernel(%arg0: i32, %arg1: memref<128x512xbf16, #tpu.memory_space<vmem>>, %arg2: memref<512x128xbf16, #tpu.memory_space<vmem>>, %arg3: memref<1x128xf32, #tpu.memory_space<vmem>>, %arg4: memref<1x128xf32, #tpu.memory_space<vmem>>, %arg5: memref<128x128xbf16, #tpu.memory_space<vmem>>) attributes {dimension_semantics = [#tpu.dimension_semantics<parallel>], iteration_bounds = array<i64: 4>, scalar_prefetch = 0 : i64, scratch_operands = 0 : i64, tpu.core_type = #tpu.core_type<tc>, window_params = [{transform_indices = @transform_0, window_bounds = array<i64: 128, 512>}, {pipeline_mode = #tpu.pipeline_mode<synchronous>, transform_indices = @transform_1, window_bounds = array<i64: 512, 128>}, {pipeline_mode = #tpu.pipeline_mode<synchronous>, transform_indices = @transform_2, window_bounds = array<i64: 1, 128>}, {pipeline_mode = #tpu.pipeline_mode<synchronous>, transform_indices = @transform_3, window_bounds = array<i64: 1, 128>}, {transform_indices = @transform_4, window_bounds = array<i64: 128, 128>}]} {
    %c0 = arith.constant 0 : index
    %c0_0 = arith.constant 0 : index
    %0 = vector.load %arg1[%c0, %c0_0] : memref<128x512xbf16, #tpu.memory_space<vmem>>, vector<128x512xbf16>
    %c0_1 = arith.constant 0 : index
    %c0_2 = arith.constant 0 : index
    %1 = vector.load %arg2[%c0_1, %c0_2] : memref<512x128xbf16, #tpu.memory_space<vmem>>, vector<512x128xbf16>
    %cst = arith.constant dense<0.000000e+00> : vector<128x128xf32>
    %2 = tpu.matmul %0, %1, %cst {dimension_numbers = #tpu.dot_dimension_numbers<[1], [0], [0], [1], [0, 0, 1, 1], [], []>} : vector<128x512xbf16>, vector<512x128xbf16>, vector<128x128xf32> -> vector<128x128xf32>
    %c0_3 = arith.constant 0 : index
    %c0_4 = arith.constant 0 : index
    %3 = vector.load %arg3[%c0_3, %c0_4] : memref<1x128xf32, #tpu.memory_space<vmem>>, vector<1x128xf32>
    %4 = vector.broadcast %3 : vector<1x128xf32> to vector<128x128xf32>
    %5 = arith.mulf %2, %4 : vector<128x128xf32>
    %c0_5 = arith.constant 0 : index
    %c0_6 = arith.constant 0 : index
    %6 = vector.load %arg4[%c0_5, %c0_6] : memref<1x128xf32, #tpu.memory_space<vmem>>, vector<1x128xf32>
    %7 = vector.broadcast %6 : vector<1x128xf32> to vector<128x128xf32>
    %8 = arith.addf %5, %7 : vector<128x128xf32>
    %cst_7 = arith.constant 0.000000e+00 : f32
    %9 = vector.broadcast %cst_7 : f32 to vector<128x128xf32>
    %10 = arith.cmpf ogt, %8, %9 : vector<128x128xf32>
    %cst_8 = arith.constant 2.000000e-01 : f32
    %11 = vector.broadcast %cst_8 : f32 to vector<128x128xf32>
    %12 = arith.mulf %11, %8 : vector<128x128xf32>
    %13 = arith.select %10, %8, %12 : vector<128x128xi1>, vector<128x128xf32>
    %14 = arith.truncf %13 : vector<128x128xf32> to vector<128x128xbf16>
    %c0_9 = arith.constant 0 : index
    %c0_10 = arith.constant 0 : index
    %15 = vector.load %arg5[%c0_9, %c0_10] : memref<128x128xbf16, #tpu.memory_space<vmem>>, vector<128x128xbf16>
    tpu.vector_store %arg5[%c0_9, %c0_10], %14 {strides = array<i32>} : memref<128x128xbf16, #tpu.memory_space<vmem>>, vector<128x128xbf16>,
    return
  }
  func.func @transform_0(%arg0: i32) -> (i32, i32) {
    %c0_i32 = arith.constant 0 : i32
    %c0_i32_0 = arith.constant 0 : i32
    return %arg0, %c0_i32 : i32, i32
  }
  func.func @transform_1(%arg0: i32) -> (i32, i32) {
    %c0_i32 = arith.constant 0 : i32
    %c0_i32_0 = arith.constant 0 : i32
    %c0_i32_1 = arith.constant 0 : i32
    return %c0_i32, %c0_i32_0 : i32, i32
  }
  func.func @transform_2(%arg0: i32) -> (i32, i32) {
    %c0_i32 = arith.constant 0 : i32
    %c0_i32_0 = arith.constant 0 : i32
    %c0_i32_1 = arith.constant 0 : i32
    return %c0_i32, %c0_i32_0 : i32, i32
  }
  func.func @transform_3(%arg0: i32) -> (i32, i32) {
    %c0_i32 = arith.constant 0 : i32
    %c0_i32_0 = arith.constant 0 : i32
    %c0_i32_1 = arith.constant 0 : i32
    return %c0_i32, %c0_i32_0 : i32, i32
  }
  func.func @transform_4(%arg0: i32) -> (i32, i32) {
    %c0_i32 = arith.constant 0 : i32
    %c0_i32_0 = arith.constant 0 : i32
    return %arg0, %c0_i32 : i32, i32
  }
}

module attributes {stable_mosaic.version = 11 : i64} {
  func.func @_conv_matmul_kernel(%arg0: i32, %arg1: memref<128x640xbf16, #tpu.memory_space<vmem>>, %arg2: memref<640x128xbf16, #tpu.memory_space<vmem>>, %arg3: memref<1x128xf32, #tpu.memory_space<vmem>>, %arg4: memref<1x128xf32, #tpu.memory_space<vmem>>, %arg5: memref<128x128xbf16, #tpu.memory_space<vmem>>) attributes {dimension_semantics = [#tpu.dimension_semantics<parallel>], iteration_bounds = array<i64: 2>, scalar_prefetch = 0 : i64, scratch_operands = 0 : i64, tpu.core_type = #tpu.core_type<tc>, window_params = [{transform_indices = @transform_0, window_bounds = array<i64: 128, 640>}, {pipeline_mode = #tpu.pipeline_mode<synchronous>, transform_indices = @transform_1, window_bounds = array<i64: 640, 128>}, {pipeline_mode = #tpu.pipeline_mode<synchronous>, transform_indices = @transform_2, window_bounds = array<i64: 1, 128>}, {pipeline_mode = #tpu.pipeline_mode<synchronous>, transform_indices = @transform_3, window_bounds = array<i64: 1, 128>}, {transform_indices = @transform_4, window_bounds = array<i64: 128, 128>}]} {
    %c0 = arith.constant 0 : index
    %c0_0 = arith.constant 0 : index
    %0 = vector.load %arg1[%c0, %c0_0] : memref<128x640xbf16, #tpu.memory_space<vmem>>, vector<128x640xbf16>
    %c0_1 = arith.constant 0 : index
    %c0_2 = arith.constant 0 : index
    %1 = vector.load %arg2[%c0_1, %c0_2] : memref<640x128xbf16, #tpu.memory_space<vmem>>, vector<640x128xbf16>
    %cst = arith.constant dense<0.000000e+00> : vector<128x128xf32>
    %2 = tpu.matmul %0, %1, %cst {dimension_numbers = #tpu.dot_dimension_numbers<[1], [0], [0], [1], [0, 0, 1, 1], [], []>} : vector<128x640xbf16>, vector<640x128xbf16>, vector<128x128xf32> -> vector<128x128xf32>
    %c0_3 = arith.constant 0 : index
    %c0_4 = arith.constant 0 : index
    %3 = vector.load %arg3[%c0_3, %c0_4] : memref<1x128xf32, #tpu.memory_space<vmem>>, vector<1x128xf32>
    %4 = vector.broadcast %3 : vector<1x128xf32> to vector<128x128xf32>
    %5 = arith.mulf %2, %4 : vector<128x128xf32>
    %c0_5 = arith.constant 0 : index
    %c0_6 = arith.constant 0 : index
    %6 = vector.load %arg4[%c0_5, %c0_6] : memref<1x128xf32, #tpu.memory_space<vmem>>, vector<1x128xf32>
    %7 = vector.broadcast %6 : vector<1x128xf32> to vector<128x128xf32>
    %8 = arith.addf %5, %7 : vector<128x128xf32>
    %cst_7 = arith.constant 0.000000e+00 : f32
    %9 = vector.broadcast %cst_7 : f32 to vector<128x128xf32>
    %10 = arith.cmpf ogt, %8, %9 : vector<128x128xf32>
    %cst_8 = arith.constant 2.000000e-01 : f32
    %11 = vector.broadcast %cst_8 : f32 to vector<128x128xf32>
    %12 = arith.mulf %11, %8 : vector<128x128xf32>
    %13 = arith.select %10, %8, %12 : vector<128x128xi1>, vector<128x128xf32>
    %14 = arith.truncf %13 : vector<128x128xf32> to vector<128x128xbf16>
    %c0_9 = arith.constant 0 : index
    %c0_10 = arith.constant 0 : index
    %15 = vector.load %arg5[%c0_9, %c0_10] : memref<128x128xbf16, #tpu.memory_space<vmem>>, vector<128x128xbf16>
    tpu.vector_store %arg5[%c0_9, %c0_10], %14 {strides = array<i32>} : memref<128x128xbf16, #tpu.memory_space<vmem>>, vector<128x128xbf16>,
    return
  }
  func.func @transform_0(%arg0: i32) -> (i32, i32) {
    %c0_i32 = arith.constant 0 : i32
    %c0_i32_0 = arith.constant 0 : i32
    return %arg0, %c0_i32 : i32, i32
  }
  func.func @transform_1(%arg0: i32) -> (i32, i32) {
    %c0_i32 = arith.constant 0 : i32
    %c0_i32_0 = arith.constant 0 : i32
    %c0_i32_1 = arith.constant 0 : i32
    return %c0_i32, %c0_i32_0 : i32, i32
  }
  func.func @transform_2(%arg0: i32) -> (i32, i32) {
    %c0_i32 = arith.constant 0 : i32
    %c0_i32_0 = arith.constant 0 : i32
    %c0_i32_1 = arith.constant 0 : i32
    return %c0_i32, %c0_i32_0 : i32, i32
  }
  func.func @transform_3(%arg0: i32) -> (i32, i32) {
    %c0_i32 = arith.constant 0 : i32
    %c0_i32_0 = arith.constant 0 : i32
    %c0_i32_1 = arith.constant 0 : i32
    return %c0_i32, %c0_i32_0 : i32, i32
  }
  func.func @transform_4(%arg0: i32) -> (i32, i32) {
    %c0_i32 = arith.constant 0 : i32
    %c0_i32_0 = arith.constant 0 : i32
    return %arg0, %c0_i32 : i32, i32
  }
}

module attributes {stable_mosaic.version = 11 : i64} {
  func.func @_conv_matmul_kernel(%arg0: i32, %arg1: memref<64x640xbf16, #tpu.memory_space<vmem>>, %arg2: memref<640x128xbf16, #tpu.memory_space<vmem>>, %arg3: memref<1x128xf32, #tpu.memory_space<vmem>>, %arg4: memref<1x128xf32, #tpu.memory_space<vmem>>, %arg5: memref<64x128xbf16, #tpu.memory_space<vmem>>) attributes {dimension_semantics = [#tpu.dimension_semantics<parallel>], iteration_bounds = array<i64: 2>, scalar_prefetch = 0 : i64, scratch_operands = 0 : i64, tpu.core_type = #tpu.core_type<tc>, window_params = [{transform_indices = @transform_0, window_bounds = array<i64: 64, 640>}, {pipeline_mode = #tpu.pipeline_mode<synchronous>, transform_indices = @transform_1, window_bounds = array<i64: 640, 128>}, {pipeline_mode = #tpu.pipeline_mode<synchronous>, transform_indices = @transform_2, window_bounds = array<i64: 1, 128>}, {pipeline_mode = #tpu.pipeline_mode<synchronous>, transform_indices = @transform_3, window_bounds = array<i64: 1, 128>}, {transform_indices = @transform_4, window_bounds = array<i64: 64, 128>}]} {
    %c0 = arith.constant 0 : index
    %c0_0 = arith.constant 0 : index
    %0 = vector.load %arg1[%c0, %c0_0] : memref<64x640xbf16, #tpu.memory_space<vmem>>, vector<64x640xbf16>
    %c0_1 = arith.constant 0 : index
    %c0_2 = arith.constant 0 : index
    %1 = vector.load %arg2[%c0_1, %c0_2] : memref<640x128xbf16, #tpu.memory_space<vmem>>, vector<640x128xbf16>
    %cst = arith.constant dense<0.000000e+00> : vector<64x128xf32>
    %2 = tpu.matmul %0, %1, %cst {dimension_numbers = #tpu.dot_dimension_numbers<[1], [0], [0], [1], [0, 0, 1, 1], [], []>} : vector<64x640xbf16>, vector<640x128xbf16>, vector<64x128xf32> -> vector<64x128xf32>
    %c0_3 = arith.constant 0 : index
    %c0_4 = arith.constant 0 : index
    %3 = vector.load %arg3[%c0_3, %c0_4] : memref<1x128xf32, #tpu.memory_space<vmem>>, vector<1x128xf32>
    %4 = vector.broadcast %3 : vector<1x128xf32> to vector<64x128xf32>
    %5 = arith.mulf %2, %4 : vector<64x128xf32>
    %c0_5 = arith.constant 0 : index
    %c0_6 = arith.constant 0 : index
    %6 = vector.load %arg4[%c0_5, %c0_6] : memref<1x128xf32, #tpu.memory_space<vmem>>, vector<1x128xf32>
    %7 = vector.broadcast %6 : vector<1x128xf32> to vector<64x128xf32>
    %8 = arith.addf %5, %7 : vector<64x128xf32>
    %cst_7 = arith.constant 0.000000e+00 : f32
    %9 = vector.broadcast %cst_7 : f32 to vector<64x128xf32>
    %10 = arith.cmpf ogt, %8, %9 : vector<64x128xf32>
    %cst_8 = arith.constant 2.000000e-01 : f32
    %11 = vector.broadcast %cst_8 : f32 to vector<64x128xf32>
    %12 = arith.mulf %11, %8 : vector<64x128xf32>
    %13 = arith.select %10, %8, %12 : vector<64x128xi1>, vector<64x128xf32>
    %14 = arith.truncf %13 : vector<64x128xf32> to vector<64x128xbf16>
    %c0_9 = arith.constant 0 : index
    %c0_10 = arith.constant 0 : index
    %15 = vector.load %arg5[%c0_9, %c0_10] : memref<64x128xbf16, #tpu.memory_space<vmem>>, vector<64x128xbf16>
    tpu.vector_store %arg5[%c0_9, %c0_10], %14 {strides = array<i32>} : memref<64x128xbf16, #tpu.memory_space<vmem>>, vector<64x128xbf16>,
    return
  }
  func.func @transform_0(%arg0: i32) -> (i32, i32) {
    %c0_i32 = arith.constant 0 : i32
    %c0_i32_0 = arith.constant 0 : i32
    return %arg0, %c0_i32 : i32, i32
  }
  func.func @transform_1(%arg0: i32) -> (i32, i32) {
    %c0_i32 = arith.constant 0 : i32
    %c0_i32_0 = arith.constant 0 : i32
    %c0_i32_1 = arith.constant 0 : i32
    return %c0_i32, %c0_i32_0 : i32, i32
  }
  func.func @transform_2(%arg0: i32) -> (i32, i32) {
    %c0_i32 = arith.constant 0 : i32
    %c0_i32_0 = arith.constant 0 : i32
    %c0_i32_1 = arith.constant 0 : i32
    return %c0_i32, %c0_i32_0 : i32, i32
  }
  func.func @transform_3(%arg0: i32) -> (i32, i32) {
    %c0_i32 = arith.constant 0 : i32
    %c0_i32_0 = arith.constant 0 : i32
    %c0_i32_1 = arith.constant 0 : i32
    return %c0_i32, %c0_i32_0 : i32, i32
  }
  func.func @transform_4(%arg0: i32) -> (i32, i32) {
    %c0_i32 = arith.constant 0 : i32
    %c0_i32_0 = arith.constant 0 : i32
    return %arg0, %c0_i32 : i32, i32
  }
}

module attributes {stable_mosaic.version = 11 : i64} {
  func.func @_conv_matmul_kernel(%arg0: i32, %arg1: memref<32x768xbf16, #tpu.memory_space<vmem>>, %arg2: memref<768x128xbf16, #tpu.memory_space<vmem>>, %arg3: memref<1x128xf32, #tpu.memory_space<vmem>>, %arg4: memref<1x128xf32, #tpu.memory_space<vmem>>, %arg5: memref<32x128xbf16, #tpu.memory_space<vmem>>) attributes {dimension_semantics = [#tpu.dimension_semantics<parallel>], iteration_bounds = array<i64: 2>, scalar_prefetch = 0 : i64, scratch_operands = 0 : i64, tpu.core_type = #tpu.core_type<tc>, window_params = [{transform_indices = @transform_0, window_bounds = array<i64: 32, 768>}, {pipeline_mode = #tpu.pipeline_mode<synchronous>, transform_indices = @transform_1, window_bounds = array<i64: 768, 128>}, {pipeline_mode = #tpu.pipeline_mode<synchronous>, transform_indices = @transform_2, window_bounds = array<i64: 1, 128>}, {pipeline_mode = #tpu.pipeline_mode<synchronous>, transform_indices = @transform_3, window_bounds = array<i64: 1, 128>}, {transform_indices = @transform_4, window_bounds = array<i64: 32, 128>}]} {
    %c0 = arith.constant 0 : index
    %c0_0 = arith.constant 0 : index
    %0 = vector.load %arg1[%c0, %c0_0] : memref<32x768xbf16, #tpu.memory_space<vmem>>, vector<32x768xbf16>
    %c0_1 = arith.constant 0 : index
    %c0_2 = arith.constant 0 : index
    %1 = vector.load %arg2[%c0_1, %c0_2] : memref<768x128xbf16, #tpu.memory_space<vmem>>, vector<768x128xbf16>
    %cst = arith.constant dense<0.000000e+00> : vector<32x128xf32>
    %2 = tpu.matmul %0, %1, %cst {dimension_numbers = #tpu.dot_dimension_numbers<[1], [0], [0], [1], [0, 0, 1, 1], [], []>} : vector<32x768xbf16>, vector<768x128xbf16>, vector<32x128xf32> -> vector<32x128xf32>
    %c0_3 = arith.constant 0 : index
    %c0_4 = arith.constant 0 : index
    %3 = vector.load %arg3[%c0_3, %c0_4] : memref<1x128xf32, #tpu.memory_space<vmem>>, vector<1x128xf32>
    %4 = vector.broadcast %3 : vector<1x128xf32> to vector<32x128xf32>
    %5 = arith.mulf %2, %4 : vector<32x128xf32>
    %c0_5 = arith.constant 0 : index
    %c0_6 = arith.constant 0 : index
    %6 = vector.load %arg4[%c0_5, %c0_6] : memref<1x128xf32, #tpu.memory_space<vmem>>, vector<1x128xf32>
    %7 = vector.broadcast %6 : vector<1x128xf32> to vector<32x128xf32>
    %8 = arith.addf %5, %7 : vector<32x128xf32>
    %cst_7 = arith.constant 0.000000e+00 : f32
    %9 = vector.broadcast %cst_7 : f32 to vector<32x128xf32>
    %10 = arith.cmpf ogt, %8, %9 : vector<32x128xf32>
    %cst_8 = arith.constant 2.000000e-01 : f32
    %11 = vector.broadcast %cst_8 : f32 to vector<32x128xf32>
    %12 = arith.mulf %11, %8 : vector<32x128xf32>
    %13 = arith.select %10, %8, %12 : vector<32x128xi1>, vector<32x128xf32>
    %14 = arith.truncf %13 : vector<32x128xf32> to vector<32x128xbf16>
    %c0_9 = arith.constant 0 : index
    %c0_10 = arith.constant 0 : index
    %15 = vector.load %arg5[%c0_9, %c0_10] : memref<32x128xbf16, #tpu.memory_space<vmem>>, vector<32x128xbf16>
    tpu.vector_store %arg5[%c0_9, %c0_10], %14 {strides = array<i32>} : memref<32x128xbf16, #tpu.memory_space<vmem>>, vector<32x128xbf16>,
    return
  }
  func.func @transform_0(%arg0: i32) -> (i32, i32) {
    %c0_i32 = arith.constant 0 : i32
    %c0_i32_0 = arith.constant 0 : i32
    return %arg0, %c0_i32 : i32, i32
  }
  func.func @transform_1(%arg0: i32) -> (i32, i32) {
    %c0_i32 = arith.constant 0 : i32
    %c0_i32_0 = arith.constant 0 : i32
    %c0_i32_1 = arith.constant 0 : i32
    return %c0_i32, %c0_i32_0 : i32, i32
  }
  func.func @transform_2(%arg0: i32) -> (i32, i32) {
    %c0_i32 = arith.constant 0 : i32
    %c0_i32_0 = arith.constant 0 : i32
    %c0_i32_1 = arith.constant 0 : i32
    return %c0_i32, %c0_i32_0 : i32, i32
  }
  func.func @transform_3(%arg0: i32) -> (i32, i32) {
    %c0_i32 = arith.constant 0 : i32
    %c0_i32_0 = arith.constant 0 : i32
    %c0_i32_1 = arith.constant 0 : i32
    return %c0_i32, %c0_i32_0 : i32, i32
  }
  func.func @transform_4(%arg0: i32) -> (i32, i32) {
    %c0_i32 = arith.constant 0 : i32
    %c0_i32_0 = arith.constant 0 : i32
    return %arg0, %c0_i32 : i32, i32
  }
}

module attributes {stable_mosaic.version = 11 : i64} {
  func.func @_final_fused_kernel(%arg0: i32, %arg1: memref<32x1024xbf16, #tpu.memory_space<vmem>>, %arg2: memref<1024x128xbf16, #tpu.memory_space<vmem>>, %arg3: memref<1x128xf32, #tpu.memory_space<vmem>>, %arg4: memref<1x128xf32, #tpu.memory_space<vmem>>, %arg5: memref<32x128xf32, #tpu.memory_space<vmem>>, %arg6: memref<8x32xf32, #tpu.memory_space<vmem>>, %arg7: memref<1xf32, #tpu.memory_space<smem>>, %arg8: memref<8x1xf32, #tpu.memory_space<vmem>>) attributes {dimension_semantics = [#tpu.dimension_semantics<arbitrary>], iteration_bounds = array<i64: 1>, scalar_prefetch = 0 : i64, scratch_operands = 0 : i64, tpu.core_type = #tpu.core_type<tc>, window_params = [{pipeline_mode = #tpu.pipeline_mode<synchronous>, transform_indices = @transform_0, window_bounds = array<i64: 32, 1024>}, {pipeline_mode = #tpu.pipeline_mode<synchronous>, transform_indices = @transform_1, window_bounds = array<i64: 1024, 128>}, {pipeline_mode = #tpu.pipeline_mode<synchronous>, transform_indices = @transform_2, window_bounds = array<i64: 1, 128>}, {pipeline_mode = #tpu.pipeline_mode<synchronous>, transform_indices = @transform_3, window_bounds = array<i64: 1, 128>}, {pipeline_mode = #tpu.pipeline_mode<synchronous>, transform_indices = @transform_4, window_bounds = array<i64: 32, 128>}, {pipeline_mode = #tpu.pipeline_mode<synchronous>, transform_indices = @transform_5, window_bounds = array<i64: 8, 32>}, {transform_indices = @transform_6, window_bounds = array<i64: 1>}, {pipeline_mode = #tpu.pipeline_mode<synchronous>, transform_indices = @transform_7, window_bounds = array<i64: 8, 1>}]} {
    %c0 = arith.constant 0 : index
    %c0_0 = arith.constant 0 : index
    %0 = vector.load %arg1[%c0, %c0_0] : memref<32x1024xbf16, #tpu.memory_space<vmem>>, vector<32x1024xbf16>
    %c0_1 = arith.constant 0 : index
    %c0_2 = arith.constant 0 : index
    %1 = vector.load %arg2[%c0_1, %c0_2] : memref<1024x128xbf16, #tpu.memory_space<vmem>>, vector<1024x128xbf16>
    %cst = arith.constant dense<0.000000e+00> : vector<32x128xf32>
    %2 = tpu.matmul %0, %1, %cst {dimension_numbers = #tpu.dot_dimension_numbers<[1], [0], [0], [1], [0, 0, 1, 1], [], []>} : vector<32x1024xbf16>, vector<1024x128xbf16>, vector<32x128xf32> -> vector<32x128xf32>
    %c0_3 = arith.constant 0 : index
    %c0_4 = arith.constant 0 : index
    %3 = vector.load %arg3[%c0_3, %c0_4] : memref<1x128xf32, #tpu.memory_space<vmem>>, vector<1x128xf32>
    %4 = vector.broadcast %3 : vector<1x128xf32> to vector<32x128xf32>
    %5 = arith.mulf %2, %4 : vector<32x128xf32>
    %c0_5 = arith.constant 0 : index
    %c0_6 = arith.constant 0 : index
    %6 = vector.load %arg4[%c0_5, %c0_6] : memref<1x128xf32, #tpu.memory_space<vmem>>, vector<1x128xf32>
    %7 = vector.broadcast %6 : vector<1x128xf32> to vector<32x128xf32>
    %8 = arith.addf %5, %7 : vector<32x128xf32>
    %cst_7 = arith.constant 0.000000e+00 : f32
    %9 = vector.broadcast %cst_7 : f32 to vector<32x128xf32>
    %10 = arith.cmpf ogt, %8, %9 : vector<32x128xf32>
    %cst_8 = arith.constant 2.000000e-01 : f32
    %11 = vector.broadcast %cst_8 : f32 to vector<32x128xf32>
    %12 = arith.mulf %11, %8 : vector<32x128xf32>
    %13 = arith.select %10, %8, %12 : vector<32x128xi1>, vector<32x128xf32>
    %c0_9 = arith.constant 0 : index
    %c0_10 = arith.constant 0 : index
    %14 = vector.load %arg5[%c0_9, %c0_10] : memref<32x128xf32, #tpu.memory_space<vmem>>, vector<32x128xf32>
    %15 = arith.mulf %13, %14 : vector<32x128xf32>
    %c0_11 = arith.constant 0 : index
    %c0_12 = arith.constant 0 : index
    %16 = vector.load %arg6[%c0_11, %c0_12] : memref<8x32xf32, #tpu.memory_space<vmem>>, vector<8x32xf32>
    %cst_13 = arith.constant dense<0.000000e+00> : vector<8x128xf32>
    %17 = tpu.matmul %16, %15, %cst_13 {dimension_numbers = #tpu.dot_dimension_numbers<[1], [0], [0], [1], [0, 0, 1, 1], [], []>} : vector<8x32xf32>, vector<32x128xf32>, vector<8x128xf32> -> vector<8x128xf32>
    %cst_14 = arith.constant dense<0.000000e+00> : vector<8xf32>
    %18 = vector.multi_reduction <add>, %17, %cst_14 [1] : vector<8x128xf32> to vector<8xf32>
    %19 = vector.shape_cast %18 : vector<8xf32> to vector<8x1xf32>
    %c0_15 = arith.constant 0 : index
    %20 = memref.load %arg7[%c0_15] : memref<1xf32, #tpu.memory_space<smem>>
    %21 = vector.broadcast %20 : f32 to vector<8x1xf32>
    %22 = arith.addf %19, %21 : vector<8x1xf32>
    %cst_16 = arith.constant 0.000000e+00 : f32
    %23 = vector.broadcast %cst_16 : f32 to vector<8x1xf32>
    %24 = arith.subf %23, %22 : vector<8x1xf32>
    %25 = math.exp %24 : vector<8x1xf32>
    %cst_17 = arith.constant 1.000000e+00 : f32
    %26 = vector.broadcast %cst_17 : f32 to vector<8x1xf32>
    %27 = arith.addf %26, %25 : vector<8x1xf32>
    %cst_18 = arith.constant 1.000000e+00 : f32
    %28 = vector.broadcast %cst_18 : f32 to vector<8x1xf32>
    %29 = arith.divf %28, %27 : vector<8x1xf32>
    %c0_19 = arith.constant 0 : index
    %c0_20 = arith.constant 0 : index
    %30 = vector.load %arg8[%c0_19, %c0_20] : memref<8x1xf32, #tpu.memory_space<vmem>>, vector<8x1xf32>
    tpu.vector_store %arg8[%c0_19, %c0_20], %29 {strides = array<i32>} : memref<8x1xf32, #tpu.memory_space<vmem>>, vector<8x1xf32>,
    return
  }
  func.func @transform_0(%arg0: i32) -> (i32, i32) {
    %c0_i32 = arith.constant 0 : i32
    %c0_i32_0 = arith.constant 0 : i32
    %c0_i32_1 = arith.constant 0 : i32
    return %c0_i32, %c0_i32_0 : i32, i32
  }
  func.func @transform_1(%arg0: i32) -> (i32, i32) {
    %c0_i32 = arith.constant 0 : i32
    %c0_i32_0 = arith.constant 0 : i32
    %c0_i32_1 = arith.constant 0 : i32
    return %c0_i32, %c0_i32_0 : i32, i32
  }
  func.func @transform_2(%arg0: i32) -> (i32, i32) {
    %c0_i32 = arith.constant 0 : i32
    %c0_i32_0 = arith.constant 0 : i32
    %c0_i32_1 = arith.constant 0 : i32
    return %c0_i32, %c0_i32_0 : i32, i32
  }
  func.func @transform_3(%arg0: i32) -> (i32, i32) {
    %c0_i32 = arith.constant 0 : i32
    %c0_i32_0 = arith.constant 0 : i32
    %c0_i32_1 = arith.constant 0 : i32
    return %c0_i32, %c0_i32_0 : i32, i32
  }
  func.func @transform_4(%arg0: i32) -> (i32, i32) {
    %c0_i32 = arith.constant 0 : i32
    %c0_i32_0 = arith.constant 0 : i32
    %c0_i32_1 = arith.constant 0 : i32
    return %c0_i32, %c0_i32_0 : i32, i32
  }
  func.func @transform_5(%arg0: i32) -> (i32, i32) {
    %c0_i32 = arith.constant 0 : i32
    %c0_i32_0 = arith.constant 0 : i32
    %c0_i32_1 = arith.constant 0 : i32
    return %c0_i32, %c0_i32_0 : i32, i32
  }
  func.func @transform_6(%arg0: i32) -> i32 {
    %c0_i32 = arith.constant 0 : i32
    %c0_i32_0 = arith.constant 0 : i32
    return %c0_i32 : i32
  }
  func.func @transform_7(%arg0: i32) -> (i32, i32) {
    %c0_i32 = arith.constant 0 : i32
    %c0_i32_0 = arith.constant 0 : i32
    %c0_i32_1 = arith.constant 0 : i32
    return %c0_i32, %c0_i32_0 : i32, i32
  }
}

</mosaic_0001>

<bundles_post_ra>
// kernel: discriminator_dc_forward.5
= control target key start
LH: loop header
LB: loop body
LE: loop exit
PB: predicated region body
PF: predicated region fallthrough
CT: control target
= control target key end

     0   :  { %s1447_s15 = smov 0   ;;  %s1682_s0 = inlined_call_operand.vmem [shape: bf16[512,512], index: 0, kind: input, shape index: {}]   ;;  %s1683_s1 = inlined_call_operand.vmem [shape: bf16[512,128], index: 1, kind: input, shape index: {}]   ;;  %s1684_s2 = inlined_call_operand.vmem [shape: f32[1,128], index: 2, kind: input, shape index: {}]   ;;  %s1685_s3 = inlined_call_operand.vmem [shape: f32[1,128], index: 3, kind: input, shape index: {}]   ;;  %s1686_s4 = inlined_call_operand.vmem [shape: bf16[512,128], index: 4, kind: output, shape index: {}]  }
   0x1 LB: > { %s1024_s16 = sadd.s32 4294967295, %s1420_s15   ;;  %p1028_p0 = scmp.ge.s32.totalorder %s1420_s15, 1  ;;  %s1420_s15 = sphi %s1447_s15, %s14_s15  }
   0x2   : > { %p164_p1 = scmp.lt.s32.totalorder %s1420_s15, 5 }
   0x4   : > { %p165_p2 = pnand %p1028_p0, %p164_p1 }
   0x5   : > { %s1029_s17 = sshll.u32 (!%p165_p2), %s1024_s16, 4 }
   0x6   : > { %168 = sbr.rel (%p165_p2) target bundleno = 311 (0x137), region = 36  ;;  %p192_p3 = scmp.lt.s32.totalorder (!%p165_p2), %s1029_s17, 63 }
   0xb   : > { %v1332_v0 = vld [vmem:[%s1683_s1 + $0x38] sm:$0xff]  ;;  %v1331_v4 = vld [vmem:[%s1683_s1 + $0x30] sm:$0xff]  ;;  %v1330_v8 = vld [vmem:[%s1683_s1 + $0x28] sm:$0xff]  ;;  %s1688_s17 = smov (!%p192_p3, %s1029_s17), 63 }
   0xc   : > { %v1340_v1 = vld [vmem:[%s1683_s1 + $0x78] sm:$0xff]  ;;  %652 = vmatpush.bf16.msra.mxu0 %v1332_v0  ;;  %v1339_v5 = vld [vmem:[%s1683_s1 + $0x70] sm:$0xff]  ;;  %v1338_v9 = vld [vmem:[%s1683_s1 + $0x68] sm:$0xff]  ;;  %s1292_s18 = sshll.u32 %s1688_s17, 4 }
   0xd   : > { %v1348_v2 = vld [vmem:[%s1683_s1 + $0xb8] sm:$0xff]  ;;  %701 = vmatpush.bf16.msra.mxu1 %v1340_v1  ;;  %v1347_v6 = vld [vmem:[%s1683_s1 + $0xb0] sm:$0xff]  ;;  %v1346_v10 = vld [vmem:[%s1683_s1 + $0xa8] sm:$0xff]  ;;  %s1539_s25 = scalar_lea.vmem %s1682_s0, %s1292_s18  ;;  %s1033_s18 = sshll.u32 %s1688_s17, 2 }
   0xe   : > { %v1356_v3 = vld [vmem:[%s1683_s1 + $0xf8] sm:$0xff]  ;;  %750 = vmatpush.bf16.msra.mxu2 %v1348_v2  ;;  %v1355_v7 = vld [vmem:[%s1683_s1 + $0xf0] sm:$0xff]  ;;  %v1354_v11 = vld [vmem:[%s1683_s1 + $0xe8] sm:$0xff]  ;;  %s1641_s21 = scalar_lea.vmem %s1686_s4, %s1033_s18 }
   0xf   : > { %799 = vmatpush.bf16.msra.mxu3 %v1356_v3  ;;  %v1329_v12 = vld [vmem:[%s1683_s1 + $0x20] sm:$0xff]  ;;  %v1328_v16 = vld [vmem:[%s1683_s1 + $0x18] sm:$0xff]  ;;  %v1327_v20 = vld [vmem:[%s1683_s1 + $0x10] sm:$0xff] }
  0x10   : > { %653 = vmatpush.bf16.msra.mxu0 %v1331_v4  ;;  %v1337_v13 = vld [vmem:[%s1683_s1 + $0x60] sm:$0xff]  ;;  %v1336_v17 = vld [vmem:[%s1683_s1 + $0x58] sm:$0xff]  ;;  %v1335_v21 = vld [vmem:[%s1683_s1 + $0x50] sm:$0xff] }
  0x11   : > { %702 = vmatpush.bf16.msra.mxu1 %v1339_v5  ;;  %v1345_v14 = vld [vmem:[%s1683_s1 + $0xa0] sm:$0xff]  ;;  %v1344_v18 = vld [vmem:[%s1683_s1 + $0x98] sm:$0xff]  ;;  %v1343_v22 = vld [vmem:[%s1683_s1 + $0x90] sm:$0xff] }
  0x12   : > { %751 = vmatpush.bf16.msra.mxu2 %v1347_v6  ;;  %v1353_v15 = vld [vmem:[%s1683_s1 + $0xe0] sm:$0xff]  ;;  %v1352_v19 = vld [vmem:[%s1683_s1 + $0xd8] sm:$0xff]  ;;  %v1351_v23 = vld [vmem:[%s1683_s1 + $0xd0] sm:$0xff] }
  0x13   : > { %800 = vmatpush.bf16.msra.mxu3 %v1355_v7  ;;  %v1326_v24 = vld [vmem:[%s1683_s1 + $0x8] sm:$0xff]  ;;  %v1325_v28 = vld [vmem:[%s1683_s1] sm:$0xff]  ;;  %v1295_v33 = vld [vmem:[%s1539_s25 + $0xc] sm:$0xf0] }
  0x14   : > { %654 = vmatpush.bf16.msra.mxu0 %v1330_v8  ;;  %v1334_v25 = vld [vmem:[%s1683_s1 + $0x48] sm:$0xff]  ;;  %v1333_v29 = vld [vmem:[%s1683_s1 + $0x40] sm:$0xff]  ;;  %v1038_v35 = vld [vmem:[%s1539_s25 + $0x10] sm:$0xf0] }
  0x15   : > { %703 = vmatpush.bf16.msra.mxu1 %v1338_v9  ;;  %v1342_v26 = vld [vmem:[%s1683_s1 + $0x88] sm:$0xff]  ;;  %v1341_v30 = vld [vmem:[%s1683_s1 + $0x80] sm:$0xff]  ;;  %v1296_v37 = vld [vmem:[%s1539_s25 + $0x14] sm:$0xf0] }
  0x16   : > { %752 = vmatpush.bf16.msra.mxu2 %v1346_v10  ;;  %v1350_v27 = vld [vmem:[%s1683_s1 + $0xc8] sm:$0xff]  ;;  %v1349_v31 = vld [vmem:[%s1683_s1 + $0xc0] sm:$0xff]  ;;  %v1046_v39 = vld [vmem:[%s1539_s25 + $0x18] sm:$0xf0] }
  0x17   : > { %801 = vmatpush.bf16.msra.mxu3 %v1354_v11  ;;  %v1036_v32 = vld [vmem:[%s1539_s25] sm:$0xf]  ;;  %v1293_v34 = vld [vmem:[%s1539_s25 + $0x4] sm:$0xf]  ;;  %v1044_v36 = vld [vmem:[%s1539_s25 + $0x8] sm:$0xf] }
  0x18   : > { %655 = vmatpush.bf16.msra.mxu0 %v1329_v12  ;;  %v1294_v38 = vld [vmem:[%s1539_s25 + $0xc] sm:$0xf]  ;;  %v1037_v40 = vor.u32 %v1295_v33, %v1036_v32  ;;  %v1041_v41 = vor.u32 %v1293_v34, %v1038_v35  ;;  %v1045_v42 = vor.u32 %v1296_v37, %v1044_v36  ;;  %v1052_v44 = vld [vmem:[%s1539_s25 + $0x20] sm:$0xf]  ;;  %v1299_v45 = vld [vmem:[%s1539_s25 + $0x2c] sm:$0xf0] }
  0x19   : > { %704 = vmatpush.bf16.msra.mxu1 %v1337_v13  ;;  %v1049_v43 = vor.u32 %v1294_v38, %v1046_v39  ;;  %v1297_v46 = vld [vmem:[%s1539_s25 + $0x24] sm:$0xf]  ;;  %v1054_v47 = vld [vmem:[%s1539_s25 + $0x30] sm:$0xf0]  ;;  %v1060_v48 = vld [vmem:[%s1539_s25 + $0x28] sm:$0xf]  ;;  %v1053_v52 = vor.u32 %v1299_v45, %v1052_v44 }
  0x1a   : > { %753 = vmatpush.bf16.msra.mxu2 %v1345_v14  ;;  %v1300_v49 = vld [vmem:[%s1539_s25 + $0x34] sm:$0xf0]  ;;  %v1298_v50 = vld [vmem:[%s1539_s25 + $0x2c] sm:$0xf]  ;;  %v1062_v51 = vld [vmem:[%s1539_s25 + $0x38] sm:$0xf0]  ;;  %v1057_v53 = vor.u32 %v1297_v46, %v1054_v47 }
  0x1b   : > { %802 = vmatpush.bf16.msra.mxu3 %v1353_v15  ;;  %v1061_v54 = vor.u32 %v1300_v49, %v1060_v48  ;;  %v1065_v55 = vor.u32 %v1298_v50, %v1062_v51  ;;  %v1068_v56 = vld [vmem:[%s1539_s25 + $0x40] sm:$0xf]  ;;  %v1303_v57 = vld [vmem:[%s1539_s25 + $0x4c] sm:$0xf0]  ;;  %v1301_v58 = vld [vmem:[%s1539_s25 + $0x44] sm:$0xf] }
  0x1c   : > { %656 = vmatpush.bf16.msra.mxu0 %v1328_v16  ;;  %v1070_v59 = vld [vmem:[%s1539_s25 + $0x50] sm:$0xf0]  ;;  %v1076_v60 = vld [vmem:[%s1539_s25 + $0x48] sm:$0xf]  ;;  %v1304_v61 = vld [vmem:[%s1539_s25 + $0x54] sm:$0xf0]  ;;  %v1069_v0 = vor.u32 %v1303_v57, %v1068_v56 }
  0x1d   : > { %705 = vmatpush.bf16.msra.mxu1 %v1336_v17  ;;  %v1302_v62 = vld [vmem:[%s1539_s25 + $0x4c] sm:$0xf]  ;;  %v1078_v63 = vld [vmem:[%s1539_s25 + $0x58] sm:$0xf0]  ;;  %v1073_v1 = vor.u32 %v1301_v58, %v1070_v59  ;;  %v1077_v2 = vor.u32 %v1304_v61, %v1076_v60  ;;  %v1084_v4 = vld [vmem:[%s1539_s25 + $0x60] sm:$0xf] }
  0x1e   : > { %754 = vmatpush.bf16.msra.mxu2 %v1344_v18  ;;  %v1081_v3 = vor.u32 %v1302_v62, %v1078_v63  ;;  %v1307_v5 = vld [vmem:[%s1539_s25 + $0x6c] sm:$0xf0]  ;;  %v1305_v6 = vld [vmem:[%s1539_s25 + $0x64] sm:$0xf]  ;;  %v1086_v7 = vld [vmem:[%s1539_s25 + $0x70] sm:$0xf0] }
  0x1f   : > { %803 = vmatpush.bf16.msra.mxu3 %v1352_v19  ;;  %v1092_v8 = vld [vmem:[%s1539_s25 + $0x68] sm:$0xf]  ;;  %v1308_v9 = vld [vmem:[%s1539_s25 + $0x74] sm:$0xf0]  ;;  %v1306_v10 = vld [vmem:[%s1539_s25 + $0x6c] sm:$0xf]  ;;  %v1085_v12 = vor.u32 %v1307_v5, %v1084_v4  ;;  %v1089_v13 = vor.u32 %v1305_v6, %v1086_v7 }
  0x20   : > { %657 = vmatpush.bf16.msra.mxu0 %v1327_v20  ;;  %v1094_v11 = vld [vmem:[%s1539_s25 + $0x78] sm:$0xf0]  ;;  %v1093_v14 = vor.u32 %v1308_v9, %v1092_v8  ;;  %v1100_v16 = vld [vmem:[%s1539_s25 + $0x80] sm:$0xf]  ;;  %v1311_v17 = vld [vmem:[%s1539_s25 + $0x8c] sm:$0xf0] }
  0x21   : > { %706 = vmatpush.bf16.msra.mxu1 %v1335_v21  ;;  %v1097_v15 = vor.u32 %v1306_v10, %v1094_v11  ;;  %v1309_v18 = vld [vmem:[%s1539_s25 + $0x84] sm:$0xf]  ;;  %v1102_v19 = vld [vmem:[%s1539_s25 + $0x90] sm:$0xf0]  ;;  %v1108_v20 = vld [vmem:[%s1539_s25 + $0x88] sm:$0xf] }
  0x22   : > { %755 = vmatpush.bf16.msra.mxu2 %v1343_v22  ;;  %v1312_v21 = vld [vmem:[%s1539_s25 + $0x94] sm:$0xf0]  ;;  %v1310_v22 = vld [vmem:[%s1539_s25 + $0x8c] sm:$0xf]  ;;  %v1124_v32 = vld [vmem:[%s1539_s25 + $0xa8] sm:$0xf] }
  0x23   : > { %804 = vmatpush.bf16.msra.mxu3 %v1351_v23  ;;  %v1110_v23 = vld [vmem:[%s1539_s25 + $0x98] sm:$0xf0]  ;;  %v1316_v33 = vld [vmem:[%s1539_s25 + $0xb4] sm:$0xf0]  ;;  %v1314_v34 = vld [vmem:[%s1539_s25 + $0xac] sm:$0xf] }
  0x24   : > { %658 = vmatpush.bf16.msra.mxu0 %v1326_v24  ;;  %v1101_v24 = vor.u32 %v1311_v17, %v1100_v16  ;;  %v1126_v35 = vld [vmem:[%s1539_s25 + $0xb8] sm:$0xf0]  ;;  %v1125_v38 = vor.u32 %v1316_v33, %v1124_v32  ;;  %v1140_v44 = vld [vmem:[%s1539_s25 + $0xc8] sm:$0xf]  ;;  %v1320_v45 = vld [vmem:[%s1539_s25 + $0xd4] sm:$0xf0] }
  0x25   : > { %707 = vmatpush.bf16.msra.mxu1 %v1334_v25  ;;  %v1105_v25 = vor.u32 %v1309_v18, %v1102_v19  ;;  %v1129_v39 = vor.u32 %v1314_v34, %v1126_v35  ;;  %v1318_v46 = vld [vmem:[%s1539_s25 + $0xcc] sm:$0xf]  ;;  %v1142_v47 = vld [vmem:[%s1539_s25 + $0xd8] sm:$0xf0]  ;;  %v1141_v50 = vor.u32 %v1320_v45, %v1140_v44  ;;  %v1156_v56 = vld [vmem:[%s1539_s25 + $0xe8] sm:$0xf] }
  0x26   : > { %756 = vmatpush.bf16.msra.mxu2 %v1342_v26  ;;  %v1109_v26 = vor.u32 %v1312_v21, %v1108_v20  ;;  %v1145_v51 = vor.u32 %v1318_v46, %v1142_v47  ;;  %v1324_v57 = vld [vmem:[%s1539_s25 + $0xf4] sm:$0xf0]  ;;  %v1322_v58 = vld [vmem:[%s1539_s25 + $0xec] sm:$0xf]  ;;  %v1158_v59 = vld [vmem:[%s1539_s25 + $0xf8] sm:$0xf0] }
  0x27   : > { %805 = vmatpush.bf16.msra.mxu3 %v1350_v27  ;;  %v1113_v27 = vor.u32 %v1310_v22, %v1110_v23  ;;  %v1157_v62 = vor.u32 %v1324_v57, %v1156_v56  ;;  %v1161_v63 = vor.u32 %v1322_v58, %v1158_v59  ;;  %v1626_v9 = vld [vmem:[%s1684_s2] ss:$0 sm:$0xff] }
  0x28   : > { %659 = vmatpush.bf16.msra.mxu0 %v1325_v28  ;;  %v1116_v28 = vld [vmem:[%s1539_s25 + $0xa0] sm:$0xf] }
  0x29   : > { %708 = vmatpush.bf16.msra.mxu1 %v1333_v29  ;;  %v1315_v29 = vld [vmem:[%s1539_s25 + $0xac] sm:$0xf0]  ;;  %v1632_v11 = vld [vmem:[%s1685_s3] ss:$0 sm:$0xff] }
  0x2a   : > { %757 = vmatpush.bf16.msra.mxu2 %v1341_v30  ;;  %v1313_v30 = vld [vmem:[%s1539_s25 + $0xa4] sm:$0xf]  ;;  %v1117_v36 = vor.u32 %v1315_v29, %v1116_v28 }
  0x2b   : > { %806 = vmatpush.bf16.msra.mxu3 %v1349_v31  ;;  %660 = vmatmul.bf16.vlgmr.msra.gmra.mxu0 %v1037_v40  ;;  %v1118_v31 = vld [vmem:[%s1539_s25 + $0xb0] sm:$0xf0]  ;;  %v1132_v40 = vld [vmem:[%s1539_s25 + $0xc0] sm:$0xf] }
  0x2c   : > { %709 = vmatmul.bf16.vlgmr.msra.gmra.mxu1 %v1041_v41  ;;  %v1121_v37 = vor.u32 %v1313_v30, %v1118_v31  ;;  %v1319_v41 = vld [vmem:[%s1539_s25 + $0xcc] sm:$0xf0] }
  0x2d   : > { %758 = vmatmul.bf16.vlgmr.msra.gmra.mxu2 %v1045_v42  ;;  %v1317_v42 = vld [vmem:[%s1539_s25 + $0xc4] sm:$0xf]  ;;  %v1133_v48 = vor.u32 %v1319_v41, %v1132_v40 }
  0x2e   : > { %807 = vmatmul.bf16.vlgmr.msra.gmra.mxu3 %v1049_v43  ;;  %v1134_v43 = vld [vmem:[%s1539_s25 + $0xd0] sm:$0xf0] }
  0x2f   : > { %v1137_v49 = vor.u32 %v1317_v42, %v1134_v43 }
  0x3b   : > { %665 = vmatmul.bf16.gmra.mxu0 %v1053_v52  ;;  %v1148_v52 = vld [vmem:[%s1539_s25 + $0xe0] sm:$0xf] }
  0x3c   : > { %714 = vmatmul.bf16.gmra.mxu1 %v1057_v53  ;;  %v1323_v53 = vld [vmem:[%s1539_s25 + $0xec] sm:$0xf0] }
  0x3d   : > { %763 = vmatmul.bf16.gmra.mxu2 %v1061_v54  ;;  %v1321_v54 = vld [vmem:[%s1539_s25 + $0xe4] sm:$0xf]  ;;  %v1149_v60 = vor.u32 %v1323_v53, %v1148_v52 }
  0x3e   : > { %812 = vmatmul.bf16.gmra.mxu3 %v1065_v55  ;;  %v1150_v55 = vld [vmem:[%s1539_s25 + $0xf0] sm:$0xf0] }
  0x3f   : > { %v1153_v61 = vor.u32 %v1321_v54, %v1150_v55 }
  0x4b   : > { %670 = vmatmul.bf16.gmra.mxu0 %v1069_v0 }
  0x4c   : > { %719 = vmatmul.bf16.gmra.mxu1 %v1073_v1 }
  0x4d   : > { %768 = vmatmul.bf16.gmra.mxu2 %v1077_v2 }
  0x4e   : > { %817 = vmatmul.bf16.gmra.mxu3 %v1081_v3 }
  0x5b   : > { %675 = vmatmul.bf16.gmra.mxu0 %v1085_v12 }
  0x5c   : > { %724 = vmatmul.bf16.gmra.mxu1 %v1089_v13 }
  0x5d   : > { %773 = vmatmul.bf16.gmra.mxu2 %v1093_v14 }
  0x5e   : > { %822 = vmatmul.bf16.gmra.mxu3 %v1097_v15 }
  0x6b   : > { %680 = vmatmul.bf16.gmra.mxu0 %v1101_v24 }
  0x6c   : > { %729 = vmatmul.bf16.gmra.mxu1 %v1105_v25 }
  0x6d   : > { %778 = vmatmul.bf16.gmra.mxu2 %v1109_v26 }
  0x6e   : > { %827 = vmatmul.bf16.gmra.mxu3 %v1113_v27 }
  0x7b   : > { %685 = vmatmul.bf16.gmra.mxu0 %v1117_v36 }
  0x7c   : > { %734 = vmatmul.bf16.gmra.mxu1 %v1121_v37 }
  0x7d   : > { %783 = vmatmul.bf16.gmra.mxu2 %v1125_v38 }
  0x7e   : > { %832 = vmatmul.bf16.gmra.mxu3 %v1129_v39 }
  0x8b   : > { %690 = vmatmul.bf16.gmra.mxu0 %v1133_v48 }
  0x8c   : > { %739 = vmatmul.bf16.gmra.mxu1 %v1137_v49 }
  0x8d   : > { %788 = vmatmul.bf16.gmra.mxu2 %v1141_v50 }
  0x8e   : > { %837 = vmatmul.bf16.gmra.mxu3 %v1145_v51 }
  0x9b   : > { %695 = vmatmul.bf16.gmra.mxu0 %v1149_v60 }
  0x9c   : > { %744 = vmatmul.bf16.gmra.mxu1 %v1153_v61 }
  0x9d   : > { %793 = vmatmul.bf16.gmra.mxu2 %v1157_v62 }
  0x9e   : > { %842 = vmatmul.bf16.gmra.mxu3 %v1161_v63 }
  0xa8   : > { %v661_v0 = vpop.f32.mrf.mxu0 }
  0xa9   : > { %v710_v1 = vpop.f32.mrf.mxu1 }
  0xaa   : > { %v711_v2 = vadd.f32 %v710_v1, %v661_v0 }
  0xb0   : > { %v759_v3 = vpop.f32.mrf.mxu2  ;;  %v663_v6 = vpop.f32.mrf.mxu0 }
  0xb1   : > { %v808_v4 = vpop.f32.mrf.mxu3  ;;  %v760_v5 = vadd.f32 %v759_v3, %v711_v2  ;;  %v712_v7 = vpop.f32.mrf.mxu1 }
  0xb2   : > { %v713_v12 = vadd.f32 %v712_v7, %v663_v6 }
  0xb3   : > { %v809_v8 = vadd.f32 %v808_v4, %v760_v5 }
  0xb5   : > { %v852_v10 = vmul.f32 %v1626_v9, %v809_v8 }
  0xb7   : > { %v872_v18 = vadd.f32 %v1632_v11, %v852_v10 }
  0xb8   : > { %v761_v13 = vpop.f32.mrf.mxu2  ;;  %v666_v16 = vpop.f32.mrf.mxu0 }
  0xb9   : > { %v810_v14 = vpop.f32.mrf.mxu3  ;;  %v762_v15 = vadd.f32 %v761_v13, %v713_v12  ;;  %v715_v17 = vpop.f32.mrf.mxu1  ;;  %v904_v22 = vmul.f32 0.2, %v872_v18  ;;  %vm888_vm0 = vcmp.gt.f32.partialorder %v872_v18, 0.0 }
  0xba   : > { %v716_v21 = vadd.f32 %v715_v17, %v666_v16 }
  0xbb   : > { %v811_v19 = vadd.f32 %v810_v14, %v762_v15  ;;  %v920_v30 = vsel %vm888_vm0, %v872_v18, %v904_v22 }
  0xbd   : > { %v853_v20 = vmul.f32 %v1626_v9, %v811_v19 }
  0xbf   : > { %v873_v23 = vadd.f32 %v1632_v11, %v853_v20 }
  0xc0   : > { %v764_v24 = vpop.f32.mrf.mxu2  ;;  %v668_v28 = vpop.f32.mrf.mxu0 }
  0xc1   : > { %v813_v25 = vpop.f32.mrf.mxu3  ;;  %vm889_vm1 = vcmp.gt.f32.partialorder %v873_v23, 0.0  ;;  %v905_v26 = vmul.f32 0.2, %v873_v23  ;;  %v765_v27 = vadd.f32 %v764_v24, %v716_v21  ;;  %v717_v29 = vpop.f32.mrf.mxu1 }
  0xc2   : > { %v718_v35 = vadd.f32 %v717_v29, %v668_v28 }
  0xc3   : > { %v921_v31 = vsel %vm889_vm1, %v873_v23, %v905_v26  ;;  %v814_v32 = vadd.f32 %v813_v25, %v765_v27 }
  0xc4   : > { %v1360_v33 = vpack.c.bf16 %v921_v31, %v920_v30 }
  0xc5   : > { %v854_v34 = vmul.f32 %v1626_v9, %v814_v32 }
  0xc6   : > { %1361 = vst [vmem:[%s1641_s21] sm:$0xff] %v1360_v33  }
  0xc7   : > { %v874_v41 = vadd.f32 %v1632_v11, %v854_v34 }
  0xc8   : > { %v766_v36 = vpop.f32.mrf.mxu2  ;;  %v671_v39 = vpop.f32.mrf.mxu0 }
  0xc9   : > { %v815_v37 = vpop.f32.mrf.mxu3  ;;  %v767_v38 = vadd.f32 %v766_v36, %v718_v35  ;;  %v720_v40 = vpop.f32.mrf.mxu1  ;;  %v906_v45 = vmul.f32 0.2, %v874_v41  ;;  %vm890_vm2 = vcmp.gt.f32.partialorder %v874_v41, 0.0 }
  0xca   : > { %v721_v44 = vadd.f32 %v720_v40, %v671_v39 }
  0xcb   : > { %v816_v42 = vadd.f32 %v815_v37, %v767_v38  ;;  %v922_v53 = vsel %vm890_vm2, %v874_v41, %v906_v45 }
  0xcd   : > { %v855_v43 = vmul.f32 %v1626_v9, %v816_v42 }
  0xcf   : > { %v875_v46 = vadd.f32 %v1632_v11, %v855_v43 }
  0xd0   : > { %v769_v47 = vpop.f32.mrf.mxu2  ;;  %v673_v51 = vpop.f32.mrf.mxu0 }
  0xd1   : > { %v818_v48 = vpop.f32.mrf.mxu3  ;;  %vm891_vm3 = vcmp.gt.f32.partialorder %v875_v46, 0.0  ;;  %v907_v49 = vmul.f32 0.2, %v875_v46  ;;  %v770_v50 = vadd.f32 %v769_v47, %v721_v44  ;;  %v722_v52 = vpop.f32.mrf.mxu1 }
  0xd2   : > { %v723_v58 = vadd.f32 %v722_v52, %v673_v51 }
  0xd3   : > { %v923_v54 = vsel %vm891_vm3, %v875_v46, %v907_v49  ;;  %v819_v55 = vadd.f32 %v818_v48, %v770_v50 }
  0xd4   : > { %v1365_v56 = vpack.c.bf16 %v923_v54, %v922_v53 }
  0xd5   : > { %v856_v57 = vmul.f32 %v1626_v9, %v819_v55 }
  0xd6   : > { %1397 = vst [vmem:[%s1641_s21 + $0x8] sm:$0xff] %v1365_v56  }
  0xd7   : > { %v876_v0 = vadd.f32 %v1632_v11, %v856_v57 }
  0xd8   : > { %v771_v59 = vpop.f32.mrf.mxu2  ;;  %v676_v62 = vpop.f32.mrf.mxu0 }
  0xd9   : > { %v820_v60 = vpop.f32.mrf.mxu3  ;;  %v772_v61 = vadd.f32 %v771_v59, %v723_v58  ;;  %v725_v63 = vpop.f32.mrf.mxu1  ;;  %v908_v4 = vmul.f32 0.2, %v876_v0  ;;  %vm892_vm4 = vcmp.gt.f32.partialorder %v876_v0, 0.0 }
  0xda   : > { %v726_v3 = vadd.f32 %v725_v63, %v676_v62 }
  0xdb   : > { %v821_v1 = vadd.f32 %v820_v60, %v772_v61  ;;  %v924_v14 = vsel %vm892_vm4, %v876_v0, %v908_v4 }
  0xdd   : > { %v857_v2 = vmul.f32 %v1626_v9, %v821_v1 }
  0xdf   : > { %v877_v5 = vadd.f32 %v1632_v11, %v857_v2 }
  0xe0   : > { %v774_v6 = vpop.f32.mrf.mxu2  ;;  %v678_v12 = vpop.f32.mrf.mxu0 }
  0xe1   : > { %v823_v7 = vpop.f32.mrf.mxu3  ;;  %vm893_vm5 = vcmp.gt.f32.partialorder %v877_v5, 0.0  ;;  %v909_v8 = vmul.f32 0.2, %v877_v5  ;;  %v775_v10 = vadd.f32 %v774_v6, %v726_v3  ;;  %v727_v13 = vpop.f32.mrf.mxu1 }
  0xe2   : > { %v728_v19 = vadd.f32 %v727_v13, %v678_v12 }
  0xe3   : > { %v925_v15 = vsel %vm893_vm5, %v877_v5, %v909_v8  ;;  %v824_v16 = vadd.f32 %v823_v7, %v775_v10 }
  0xe4   : > { %v1370_v17 = vpack.c.bf16 %v925_v15, %v924_v14 }
  0xe5   : > { %v858_v18 = vmul.f32 %v1626_v9, %v824_v16 }
  0xe6   : > { %1398 = vst [vmem:[%s1641_s21 + $0x10] sm:$0xff] %v1370_v17  }
  0xe7   : > { %v878_v25 = vadd.f32 %v1632_v11, %v858_v18 }
  0xe8   : > { %v776_v20 = vpop.f32.mrf.mxu2  ;;  %v681_v23 = vpop.f32.mrf.mxu0 }
  0xe9   : > { %v825_v21 = vpop.f32.mrf.mxu3  ;;  %v777_v22 = vadd.f32 %v776_v20, %v728_v19  ;;  %v730_v24 = vpop.f32.mrf.mxu1  ;;  %v910_v29 = vmul.f32 0.2, %v878_v25  ;;  %vm894_vm6 = vcmp.gt.f32.partialorder %v878_v25, 0.0 }
  0xea   : > { %v731_v28 = vadd.f32 %v730_v24, %v681_v23 }
  0xeb   : > { %v826_v26 = vadd.f32 %v825_v21, %v777_v22  ;;  %v926_v37 = vsel %vm894_vm6, %v878_v25, %v910_v29 }
  0xed   : > { %v859_v27 = vmul.f32 %v1626_v9, %v826_v26 }
  0xef   : > { %v879_v30 = vadd.f32 %v1632_v11, %v859_v27 }
  0xf0   : > { %v779_v31 = vpop.f32.mrf.mxu2  ;;  %v683_v35 = vpop.f32.mrf.mxu0 }
  0xf1   : > { %v828_v32 = vpop.f32.mrf.mxu3  ;;  %vm895_vm7 = vcmp.gt.f32.partialorder %v879_v30, 0.0  ;;  %v911_v33 = vmul.f32 0.2, %v879_v30  ;;  %v780_v34 = vadd.f32 %v779_v31, %v731_v28  ;;  %v732_v36 = vpop.f32.mrf.mxu1 }
  0xf2   : > { %v733_v42 = vadd.f32 %v732_v36, %v683_v35 }
  0xf3   : > { %v927_v38 = vsel %vm895_vm7, %v879_v30, %v911_v33  ;;  %v829_v39 = vadd.f32 %v828_v32, %v780_v34 }
  0xf4   : > { %v1375_v40 = vpack.c.bf16 %v927_v38, %v926_v37 }
  0xf5   : > { %v860_v41 = vmul.f32 %v1626_v9, %v829_v39 }
  0xf6   : > { %1399 = vst [vmem:[%s1641_s21 + $0x18] sm:$0xff] %v1375_v40  }
  0xf7   : > { %v880_v48 = vadd.f32 %v1632_v11, %v860_v41 }
  0xf8   : > { %v781_v43 = vpop.f32.mrf.mxu2  ;;  %v686_v46 = vpop.f32.mrf.mxu0 }
  0xf9   : > { %v830_v44 = vpop.f32.mrf.mxu3  ;;  %v782_v45 = vadd.f32 %v781_v43, %v733_v42  ;;  %v735_v47 = vpop.f32.mrf.mxu1  ;;  %v912_v52 = vmul.f32 0.2, %v880_v48  ;;  %vm896_vm8 = vcmp.gt.f32.partialorder %v880_v48, 0.0 }
  0xfa   : > { %v736_v51 = vadd.f32 %v735_v47, %v686_v46 }
  0xfb   : > { %v831_v49 = vadd.f32 %v830_v44, %v782_v45  ;;  %v928_v60 = vsel %vm896_vm8, %v880_v48, %v912_v52 }
  0xfd   : > { %v861_v50 = vmul.f32 %v1626_v9, %v831_v49 }
  0xff   : > { %v881_v53 = vadd.f32 %v1632_v11, %v861_v50 }
 0x100   : > { %v784_v54 = vpop.f32.mrf.mxu2  ;;  %v688_v58 = vpop.f32.mrf.mxu0 }
 0x101   : > { %v833_v55 = vpop.f32.mrf.mxu3  ;;  %vm897_vm9 = vcmp.gt.f32.partialorder %v881_v53, 0.0  ;;  %v913_v56 = vmul.f32 0.2, %v881_v53  ;;  %v785_v57 = vadd.f32 %v784_v54, %v736_v51  ;;  %v737_v59 = vpop.f32.mrf.mxu1 }
 0x102   : > { %v738_v1 = vadd.f32 %v737_v59, %v688_v58 }
 0x103   : > { %v929_v61 = vsel %vm897_vm9, %v881_v53, %v913_v56  ;;  %v834_v62 = vadd.f32 %v833_v55, %v785_v57 }
 0x104   : > { %v1380_v63 = vpack.c.bf16 %v929_v61, %v928_v60 }
 0x105   : > { %v862_v0 = vmul.f32 %v1626_v9, %v834_v62 }
 0x106   : > { %1400 = vst [vmem:[%s1641_s21 + $0x20] sm:$0xff] %v1380_v63  }
 0x107   : > { %v882_v7 = vadd.f32 %v1632_v11, %v862_v0 }
 0x108   : > { %v786_v2 = vpop.f32.mrf.mxu2  ;;  %v691_v5 = vpop.f32.mrf.mxu0 }
 0x109   : > { %v835_v3 = vpop.f32.mrf.mxu3  ;;  %v787_v4 = vadd.f32 %v786_v2, %v738_v1  ;;  %v740_v6 = vpop.f32.mrf.mxu1  ;;  %v914_v13 = vmul.f32 0.2, %v882_v7  ;;  %vm898_vm10 = vcmp.gt.f32.partialorder %v882_v7, 0.0 }
 0x10a   : > { %v741_v12 = vadd.f32 %v740_v6, %v691_v5 }
 0x10b   : > { %v836_v8 = vadd.f32 %v835_v3, %v787_v4  ;;  %v930_v21 = vsel %vm898_vm10, %v882_v7, %v914_v13 }
 0x10d   : > { %v863_v10 = vmul.f32 %v1626_v9, %v836_v8 }
 0x10f   : > { %v883_v14 = vadd.f32 %v1632_v11, %v863_v10 }
 0x110   : > { %v789_v15 = vpop.f32.mrf.mxu2  ;;  %v693_v19 = vpop.f32.mrf.mxu0 }
 0x111   : > { %v838_v16 = vpop.f32.mrf.mxu3  ;;  %vm899_vm11 = vcmp.gt.f32.partialorder %v883_v14, 0.0  ;;  %v915_v17 = vmul.f32 0.2, %v883_v14  ;;  %v790_v18 = vadd.f32 %v789_v15, %v741_v12  ;;  %v742_v20 = vpop.f32.mrf.mxu1 }
 0x112   : > { %v743_v26 = vadd.f32 %v742_v20, %v693_v19 }
 0x113   : > { %v931_v22 = vsel %vm899_vm11, %v883_v14, %v915_v17  ;;  %v839_v23 = vadd.f32 %v838_v16, %v790_v18 }
 0x114   : > { %v1385_v24 = vpack.c.bf16 %v931_v22, %v930_v21 }
 0x115   : > { %v864_v25 = vmul.f32 %v1626_v9, %v839_v23 }
 0x116   : > { %1401 = vst [vmem:[%s1641_s21 + $0x28] sm:$0xff] %v1385_v24  }
 0x117   : > { %v884_v32 = vadd.f32 %v1632_v11, %v864_v25 }
 0x118   : > { %v791_v27 = vpop.f32.mrf.mxu2  ;;  %v696_v30 = vpop.f32.mrf.mxu0 }
 0x119   : > { %v840_v28 = vpop.f32.mrf.mxu3  ;;  %v792_v29 = vadd.f32 %v791_v27, %v743_v26  ;;  %v745_v31 = vpop.f32.mrf.mxu1  ;;  %v916_v36 = vmul.f32 0.2, %v884_v32  ;;  %vm900_vm12 = vcmp.gt.f32.partialorder %v884_v32, 0.0 }
 0x11a   : > { %v746_v35 = vadd.f32 %v745_v31, %v696_v30 }
 0x11b   : > { %v841_v33 = vadd.f32 %v840_v28, %v792_v29  ;;  %v932_v42 = vsel %vm900_vm12, %v884_v32, %v916_v36 }
 0x11d   : > { %v865_v34 = vmul.f32 %v1626_v9, %v841_v33 }
 0x11f   : > { %v885_v37 = vadd.f32 %v1632_v11, %v865_v34 }
 0x120   : > { %v794_v38 = vpop.f32.mrf.mxu2  ;;  %v698_v46 = vpop.f32.mrf.mxu0 }
 0x121   : > { %v843_v39 = vpop.f32.mrf.mxu3  ;;  %vm901_vm13 = vcmp.gt.f32.partialorder %v885_v37, 0.0  ;;  %v917_v40 = vmul.f32 0.2, %v885_v37  ;;  %v795_v41 = vadd.f32 %v794_v38, %v746_v35  ;;  %v747_v47 = vpop.f32.mrf.mxu1 }
 0x122   : > { %v748_v49 = vadd.f32 %v747_v47, %v698_v46 }
 0x123   : > { %v933_v43 = vsel %vm901_vm13, %v885_v37, %v917_v40  ;;  %v844_v44 = vadd.f32 %v843_v39, %v795_v41 }
 0x124   : > { %v1390_v45 = vpack.c.bf16 %v933_v43, %v932_v42 }
 0x125   : > { %v866_v48 = vmul.f32 %v1626_v9, %v844_v44 }
 0x126   : > { %1402 = vst [vmem:[%s1641_s21 + $0x30] sm:$0xff] %v1390_v45  }
 0x127   : > { %v886_v53 = vadd.f32 %v1632_v11, %v866_v48 }
 0x128   : > { %v796_v50 = vpop.f32.mrf.mxu2 }
 0x129   : > { %v797_v51 = vadd.f32 %v796_v50, %v748_v49  ;;  %v845_v52 = vpop.f32.mrf.mxu3  ;;  %v918_v56 = vmul.f32 0.2, %v886_v53  ;;  %vm902_vm14 = vcmp.gt.f32.partialorder %v886_v53, 0.0 }
 0x12b   : > { %v846_v54 = vadd.f32 %v845_v52, %v797_v51  ;;  %v934_v59 = vsel %vm902_vm14, %v886_v53, %v918_v56 }
 0x12d   : > { %v867_v55 = vmul.f32 %v1626_v9, %v846_v54 }
 0x12f   : > { %v887_v57 = vadd.f32 %v1632_v11, %v867_v55 }
 0x131   : > { %vm903_vm15 = vcmp.gt.f32.partialorder %v887_v57, 0.0  ;;  %v919_v58 = vmul.f32 0.2, %v887_v57 }
 0x133   : > { %v935_v60 = vsel %vm903_vm15, %v887_v57, %v919_v58 }
 0x134   : > { %v1395_v61 = vpack.c.bf16 %v935_v60, %v934_v59 }
 0x136   : > { %1403 = vst [vmem:[%s1641_s21 + $0x38] sm:$0xff] %v1395_v61  }
 0x137 PF: > { %s14_s15 = sadd.s32 1, %s1420_s15  }
 0x138   : > { %p11_p4 = scmp.ge.s32.totalorder %s14_s15, 6  }
 0x13a   :  { %13 = sbr.rel (!%p11_p4) target bundleno = 1 (0x1), region = 66 }

// kernel: discriminator_dc_forward.6
= control target key start
LH: loop header
LB: loop body
LE: loop exit
PB: predicated region body
PF: predicated region fallthrough
CT: control target
= control target key end

     0   :  { %s1727_s15 = smov 0   ;;  %s2038_s0 = inlined_call_operand.vmem [shape: bf16[256,640], index: 0, kind: input, shape index: {}]   ;;  %s2039_s1 = inlined_call_operand.vmem [shape: bf16[640,128], index: 1, kind: input, shape index: {}]   ;;  %s2040_s2 = inlined_call_operand.vmem [shape: f32[1,128], index: 2, kind: input, shape index: {}]   ;;  %s2041_s3 = inlined_call_operand.vmem [shape: f32[1,128], index: 3, kind: input, shape index: {}]   ;;  %s2042_s4 = inlined_call_operand.vmem [shape: bf16[256,128], index: 4, kind: output, shape index: {}]  }
   0x1 LB: > { %s1201_s16 = sadd.s32 4294967295, %s1700_s15   ;;  %p1205_p0 = scmp.ge.s32.totalorder %s1700_s15, 1  ;;  %s1700_s15 = sphi %s1727_s15, %s14_s15  }
   0x2   : > { %p164_p1 = scmp.lt.s32.totalorder %s1700_s15, 3 }
   0x4   : > { %p165_p2 = pnand %p1205_p0, %p164_p1 }
   0x5   : > { %s1206_s23 = sshll.u32 (!%p165_p2), %s1201_s16, 4 }
   0x6   : > { %168 = sbr.rel (%p165_p2) target bundleno = 343 (0x157), region = 36  ;;  %p192_p3 = scmp.lt.s32.totalorder (!%p165_p2), %s1206_s23, 31 }
   0xb   : > { %v1579_v0 = vld [vmem:[%s2039_s1 + $0x38] sm:$0xff]  ;;  %v1578_v1 = vld [vmem:[%s2039_s1 + $0x30] sm:$0xff]  ;;  %v1577_v2 = vld [vmem:[%s2039_s1 + $0x28] sm:$0xff]  ;;  %s2044_s23 = smov (!%p192_p3, %s1206_s23), 31 }
   0xc   : > { %1659 = vmatpush.bf16.msra.mxu1 %v1579_v0  ;;  %1660 = vmatpush.bf16.msra.mxu2 %v1579_v0  ;;  %v1576_v3 = vld [vmem:[%s2039_s1 + $0x20] sm:$0xff]  ;;  %v1575_v4 = vld [vmem:[%s2039_s1 + $0x18] sm:$0xff]  ;;  %v1574_v5 = vld [vmem:[%s2039_s1 + $0x10] sm:$0xff]  ;;  %s1683_s30 = smul.u32 20, %s2044_s23  ;;  %s1209_s10 = sshll.u32 %s2044_s23, 2 }
   0xd   : > { %1661 = vmatpush.bf16.msra.mxu3 %v1579_v0  ;;  %780 = vmatpush.bf16.msra.mxu0 %v1579_v0  ;;  %v1573_v6 = vld [vmem:[%s2039_s1 + $0x8] sm:$0xff]  ;;  %v1572_v7 = vld [vmem:[%s2039_s1] sm:$0xff]  ;;  %v1595_v16 = vld [vmem:[%s2039_s1 + $0xb8] sm:$0xff]  ;;  %s1985_s13 = scalar_lea.vmem %s2042_s4, %s1209_s10 }
   0xe   : > { %s1762_s9 = scalar_lea.vmem %s2038_s0, %s1683_s30  ;;  %v1587_v17 = vld [vmem:[%s2039_s1 + $0x78] sm:$0xff]  ;;  %v1594_v24 = vld [vmem:[%s2039_s1 + $0xb0] sm:$0xff]  ;;  %v1593_v28 = vld [vmem:[%s2039_s1 + $0xa8] sm:$0xff] }
   0xf   : > { %v1252_v8 = vld [vmem:[%s1762_s9 + $0x50] sm:$0xf]  ;;  %v1544_v9 = vld [vmem:[%s1762_s9 + $0x60] sm:$0xf0]  ;;  %v1292_v10 = vld [vmem:[%s1762_s9 + $0xa0] sm:$0xf] }
  0x10   : > { %1662 = vmatpush.bf16.msra.mxu1 %v1578_v1  ;;  %1663 = vmatpush.bf16.msra.mxu2 %v1578_v1  ;;  %v1554_v11 = vld [vmem:[%s1762_s9 + $0xb0] sm:$0xf0]  ;;  %v1332_v12 = vld [vmem:[%s1762_s9 + $0xf0] sm:$0xf]  ;;  %v1564_v13 = vld [vmem:[%s1762_s9 + $0x100] sm:$0xf0]  ;;  %v1253_v18 = vor.u32 %v1544_v9, %v1252_v8 }
  0x11   : > { %1664 = vmatpush.bf16.msra.mxu3 %v1578_v1  ;;  %781 = vmatpush.bf16.msra.mxu0 %v1578_v1  ;;  %v1212_v14 = vld [vmem:[%s1762_s9] sm:$0xf]  ;;  %v1534_v15 = vld [vmem:[%s1762_s9 + $0x10] sm:$0xf0]  ;;  %v1293_v19 = vor.u32 %v1554_v11, %v1292_v10  ;;  %v1333_v20 = vor.u32 %v1564_v13, %v1332_v12  ;;  %v1603_v22 = vld [vmem:[%s2039_s1 + $0xf8] sm:$0xff] }
  0x12   : > { %v1213_v21 = vor.u32 %v1534_v15, %v1212_v14  ;;  %v1611_v23 = vld [vmem:[%s2039_s1 + $0x138] sm:$0xff]  ;;  %v1586_v25 = vld [vmem:[%s2039_s1 + $0x70] sm:$0xff]  ;;  %v1585_v29 = vld [vmem:[%s2039_s1 + $0x68] sm:$0xff] }
  0x13   : > { %v1602_v26 = vld [vmem:[%s2039_s1 + $0xf0] sm:$0xff]  ;;  %v1601_v30 = vld [vmem:[%s2039_s1 + $0xe8] sm:$0xff]  ;;  %v1592_v32 = vld [vmem:[%s2039_s1 + $0xa0] sm:$0xff] }
  0x14   : > { %1665 = vmatpush.bf16.msra.mxu1 %v1577_v2  ;;  %1666 = vmatpush.bf16.msra.mxu2 %v1577_v2  ;;  %v1610_v27 = vld [vmem:[%s2039_s1 + $0x130] sm:$0xff]  ;;  %v1609_v31 = vld [vmem:[%s2039_s1 + $0x128] sm:$0xff]  ;;  %v1584_v33 = vld [vmem:[%s2039_s1 + $0x60] sm:$0xff] }
  0x15   : > { %1667 = vmatpush.bf16.msra.mxu3 %v1577_v2  ;;  %782 = vmatpush.bf16.msra.mxu0 %v1577_v2  ;;  %v1600_v34 = vld [vmem:[%s2039_s1 + $0xe0] sm:$0xff]  ;;  %v1272_v36 = vld [vmem:[%s1762_s9 + $0x78] sm:$0xf]  ;;  %v1549_v37 = vld [vmem:[%s1762_s9 + $0x88] sm:$0xf0] }
  0x16   : > { %v1608_v35 = vld [vmem:[%s2039_s1 + $0x120] sm:$0xff]  ;;  %v1312_v38 = vld [vmem:[%s1762_s9 + $0xc8] sm:$0xf]  ;;  %v1559_v39 = vld [vmem:[%s1762_s9 + $0xd8] sm:$0xf0]  ;;  %v1273_v46 = vor.u32 %v1549_v37, %v1272_v36 }
  0x17   : > { %v1352_v40 = vld [vmem:[%s1762_s9 + $0x118] sm:$0xf]  ;;  %v1569_v41 = vld [vmem:[%s1762_s9 + $0x128] sm:$0xf0]  ;;  %v1232_v42 = vld [vmem:[%s1762_s9 + $0x28] sm:$0xf]  ;;  %v1313_v47 = vor.u32 %v1559_v39, %v1312_v38 }
  0x18   : > { %1668 = vmatpush.bf16.msra.mxu1 %v1576_v3  ;;  %1669 = vmatpush.bf16.msra.mxu2 %v1576_v3  ;;  %v1539_v43 = vld [vmem:[%s1762_s9 + $0x38] sm:$0xf0]  ;;  %v1353_v48 = vor.u32 %v1569_v41, %v1352_v40  ;;  %v1590_v52 = vld [vmem:[%s2039_s1 + $0x90] sm:$0xff]  ;;  %v1589_v56 = vld [vmem:[%s2039_s1 + $0x88] sm:$0xff] }
  0x19   : > { %1670 = vmatpush.bf16.msra.mxu3 %v1576_v3  ;;  %783 = vmatpush.bf16.msra.mxu0 %v1576_v3  ;;  %v1591_v44 = vld [vmem:[%s2039_s1 + $0x98] sm:$0xff]  ;;  %v1233_v49 = vor.u32 %v1539_v43, %v1232_v42  ;;  %v1582_v53 = vld [vmem:[%s2039_s1 + $0x50] sm:$0xff]  ;;  %v1581_v57 = vld [vmem:[%s2039_s1 + $0x48] sm:$0xff] }
  0x1a   : > { %v1583_v45 = vld [vmem:[%s2039_s1 + $0x58] sm:$0xff]  ;;  %v1598_v54 = vld [vmem:[%s2039_s1 + $0xd0] sm:$0xff]  ;;  %v1597_v58 = vld [vmem:[%s2039_s1 + $0xc8] sm:$0xff] }
  0x1b   : > { %v1599_v50 = vld [vmem:[%s2039_s1 + $0xd8] sm:$0xff]  ;;  %v1606_v55 = vld [vmem:[%s2039_s1 + $0x110] sm:$0xff]  ;;  %v1605_v59 = vld [vmem:[%s2039_s1 + $0x108] sm:$0xff] }
  0x1c   : > { %1671 = vmatpush.bf16.msra.mxu1 %v1575_v4  ;;  %1672 = vmatpush.bf16.msra.mxu2 %v1575_v4  ;;  %v1607_v51 = vld [vmem:[%s2039_s1 + $0x118] sm:$0xff]  ;;  %v1588_v60 = vld [vmem:[%s2039_s1 + $0x80] sm:$0xff]  ;;  %v1220_v2 = vld [vmem:[%s1762_s9 + $0x8] sm:$0xf] }
  0x1d   : > { %1673 = vmatpush.bf16.msra.mxu3 %v1575_v4  ;;  %784 = vmatpush.bf16.msra.mxu0 %v1575_v4  ;;  %v1580_v61 = vld [vmem:[%s2039_s1 + $0x40] sm:$0xff]  ;;  %v1214_v1 = vld [vmem:[%s1762_s9 + $0x14] sm:$0xf0]  ;;  %v1535_v3 = vld [vmem:[%s1762_s9 + $0x18] sm:$0xf0] }
  0x1e   : > { %v1596_v62 = vld [vmem:[%s2039_s1 + $0xc0] sm:$0xff]  ;;  %v1533_v4 = vld [vmem:[%s1762_s9 + $0xc] sm:$0xf]  ;;  %v1221_v9 = vor.u32 %v1535_v3, %v1220_v2  ;;  %v1240_v14 = vld [vmem:[%s1762_s9 + $0x30] sm:$0xf] }
  0x1f   : > { %v1604_v63 = vld [vmem:[%s2039_s1 + $0x100] sm:$0xff]  ;;  %v1537_v12 = vld [vmem:[%s1762_s9 + $0x2c] sm:$0xf]  ;;  %v1547_v36 = vld [vmem:[%s1762_s9 + $0x7c] sm:$0xf] }
  0x20   : > { %1674 = vmatpush.bf16.msra.mxu1 %v1574_v5  ;;  %1675 = vmatpush.bf16.msra.mxu2 %v1574_v5  ;;  %v1532_v0 = vld [vmem:[%s1762_s9 + $0x4] sm:$0xf]  ;;  %v1234_v13 = vld [vmem:[%s1762_s9 + $0x3c] sm:$0xf0]  ;;  %v1274_v37 = vld [vmem:[%s1762_s9 + $0x8c] sm:$0xf0] }
  0x21   : > { %1676 = vmatpush.bf16.msra.mxu3 %v1574_v5  ;;  %785 = vmatpush.bf16.msra.mxu0 %v1574_v5  ;;  %v1222_v5 = vld [vmem:[%s1762_s9 + $0x1c] sm:$0xf0]  ;;  %v1217_v8 = vor.u32 %v1532_v0, %v1214_v1  ;;  %v1540_v15 = vld [vmem:[%s1762_s9 + $0x40] sm:$0xf0]  ;;  %v1550_v39 = vld [vmem:[%s1762_s9 + $0x90] sm:$0xf0] }
  0x22   : > { %v1225_v10 = vor.u32 %v1533_v4, %v1222_v5  ;;  %v1280_v38 = vld [vmem:[%s1762_s9 + $0x80] sm:$0xf]  ;;  %v1548_v40 = vld [vmem:[%s1762_s9 + $0x84] sm:$0xf]  ;;  %v1282_v41 = vld [vmem:[%s1762_s9 + $0x94] sm:$0xf0] }
  0x23   : > { %v1288_v42 = vld [vmem:[%s1762_s9 + $0x88] sm:$0xf]  ;;  %v1551_v43 = vld [vmem:[%s1762_s9 + $0x98] sm:$0xf0]  ;;  %v1558_v0 = vld [vmem:[%s1762_s9 + $0xd4] sm:$0xf] }
  0x24   : > { %1677 = vmatpush.bf16.msra.mxu1 %v1573_v6  ;;  %1678 = vmatpush.bf16.msra.mxu2 %v1573_v6  ;;  %v1322_v1 = vld [vmem:[%s1762_s9 + $0xe4] sm:$0xf0]  ;;  %v1328_v2 = vld [vmem:[%s1762_s9 + $0xd8] sm:$0xf]  ;;  %v1561_v3 = vld [vmem:[%s1762_s9 + $0xe8] sm:$0xf0] }
  0x25   : > { %1679 = vmatpush.bf16.msra.mxu3 %v1573_v6  ;;  %786 = vmatpush.bf16.msra.mxu0 %v1573_v6  ;;  %v1228_v6 = vld [vmem:[%s1762_s9 + $0x10] sm:$0xf] }
  0x28   : > { %1680 = vmatpush.bf16.msra.mxu1 %v1572_v7  ;;  %1681 = vmatpush.bf16.msra.mxu2 %v1572_v7 }
  0x29   : > { %1682 = vmatpush.bf16.msra.mxu3 %v1572_v7  ;;  %787 = vmatpush.bf16.msra.mxu0 %v1572_v7  ;;  %v1536_v7 = vld [vmem:[%s1762_s9 + $0x20] sm:$0xf0] }
  0x2a   : > { %v1229_v11 = vor.u32 %v1536_v7, %v1228_v6  ;;  %v1325_v6 = vor.u32 %v1558_v0, %v1322_v1  ;;  %v1329_v7 = vor.u32 %v1561_v3, %v1328_v2 }
  0x2b   : > { %798 = vmatmul.bf16.vlgmr.msra.gmra.mxu1 %v1253_v18  ;;  %808 = vmatmul.bf16.vlgmr.msra.gmra.mxu2 %v1293_v19  ;;  %v1248_v18 = vld [vmem:[%s1762_s9 + $0x38] sm:$0xf]  ;;  %v1541_v19 = vld [vmem:[%s1762_s9 + $0x48] sm:$0xf0] }
  0x2c   : > { %878 = vmatpush.bf16.msrb.mxu2 %v1595_v16  ;;  %829 = vmatpush.bf16.msrb.mxu1 %v1587_v17  ;;  %v1538_v16 = vld [vmem:[%s1762_s9 + $0x34] sm:$0xf]  ;;  %v1242_v17 = vld [vmem:[%s1762_s9 + $0x44] sm:$0xf0] }
  0x2d   : > { %818 = vmatmul.bf16.vlgmr.msra.gmra.mxu3 %v1333_v20  ;;  %788 = vmatmul.bf16.vlgmr.msra.gmra.mxu0 %v1213_v21  ;;  %v1237_v20 = vor.u32 %v1537_v12, %v1234_v13  ;;  %v1241_v21 = vor.u32 %v1540_v15, %v1240_v14  ;;  %v1563_v12 = vld [vmem:[%s1762_s9 + $0xfc] sm:$0xf]  ;;  %v1342_v13 = vld [vmem:[%s1762_s9 + $0x10c] sm:$0xf0]  ;;  %v1348_v14 = vld [vmem:[%s1762_s9 + $0x100] sm:$0xf] }
  0x2e   : > { %927 = vmatpush.bf16.msrb.mxu3 %v1603_v22  ;;  %976 = vmatpush.bf16.msrb.mxu0 %v1611_v23  ;;  %v1245_v22 = vor.u32 %v1538_v16, %v1242_v17  ;;  %v1249_v23 = vor.u32 %v1541_v19, %v1248_v18  ;;  %v1566_v15 = vld [vmem:[%s1762_s9 + $0x110] sm:$0xf0]  ;;  %v1345_v19 = vor.u32 %v1563_v12, %v1342_v13 }
  0x30   : > { %879 = vmatpush.bf16.msrb.mxu2 %v1594_v24  ;;  %830 = vmatpush.bf16.msrb.mxu1 %v1586_v25  ;;  %v1542_v24 = vld [vmem:[%s1762_s9 + $0x54] sm:$0xf]  ;;  %v1254_v25 = vld [vmem:[%s1762_s9 + $0x64] sm:$0xf0] }
  0x32   : > { %928 = vmatpush.bf16.msrb.mxu3 %v1602_v26  ;;  %977 = vmatpush.bf16.msrb.mxu0 %v1610_v27  ;;  %v1260_v26 = vld [vmem:[%s1762_s9 + $0x58] sm:$0xf]  ;;  %v1545_v27 = vld [vmem:[%s1762_s9 + $0x68] sm:$0xf0] }
  0x34   : > { %880 = vmatpush.bf16.msrb.mxu2 %v1593_v28  ;;  %831 = vmatpush.bf16.msrb.mxu1 %v1585_v29  ;;  %v1543_v28 = vld [vmem:[%s1762_s9 + $0x5c] sm:$0xf]  ;;  %v1262_v29 = vld [vmem:[%s1762_s9 + $0x6c] sm:$0xf0] }
  0x36   : > { %929 = vmatpush.bf16.msrb.mxu3 %v1601_v30  ;;  %978 = vmatpush.bf16.msrb.mxu0 %v1609_v31  ;;  %v1268_v30 = vld [vmem:[%s1762_s9 + $0x60] sm:$0xf]  ;;  %v1546_v31 = vld [vmem:[%s1762_s9 + $0x70] sm:$0xf0] }
  0x38   : > { %881 = vmatpush.bf16.msrb.mxu2 %v1592_v32  ;;  %832 = vmatpush.bf16.msrb.mxu1 %v1584_v33  ;;  %v1257_v32 = vor.u32 %v1542_v24, %v1254_v25  ;;  %v1261_v33 = vor.u32 %v1545_v27, %v1260_v26  ;;  %v1567_v26 = vld [vmem:[%s1762_s9 + $0x11c] sm:$0xf]  ;;  %v1354_v27 = vld [vmem:[%s1762_s9 + $0x12c] sm:$0xf0] }
  0x3a   : > { %930 = vmatpush.bf16.msrb.mxu3 %v1600_v34  ;;  %979 = vmatpush.bf16.msrb.mxu0 %v1608_v35  ;;  %v1265_v34 = vor.u32 %v1543_v28, %v1262_v29  ;;  %v1269_v35 = vor.u32 %v1546_v31, %v1268_v30  ;;  %v1360_v28 = vld [vmem:[%s1762_s9 + $0x120] sm:$0xf]  ;;  %v1570_v29 = vld [vmem:[%s1762_s9 + $0x130] sm:$0xf0]  ;;  %v1568_v30 = vld [vmem:[%s1762_s9 + $0x124] sm:$0xf] }
  0x3b   : > { %803 = vmatmul.bf16.gmra.mxu1 %v1273_v46  ;;  %813 = vmatmul.bf16.gmra.mxu2 %v1313_v47  ;;  %v1285_v46 = vor.u32 %v1548_v40, %v1282_v41  ;;  %v1289_v47 = vor.u32 %v1551_v43, %v1288_v42  ;;  %v1362_v31 = vld [vmem:[%s1762_s9 + $0x134] sm:$0xf0] }
  0x3c   : > { %882 = vmatpush.bf16.msrb.mxu2 %v1591_v44  ;;  %833 = vmatpush.bf16.msrb.mxu1 %v1583_v45  ;;  %v1277_v44 = vor.u32 %v1547_v36, %v1274_v37  ;;  %v1281_v45 = vor.u32 %v1550_v39, %v1280_v38  ;;  %v1357_v36 = vor.u32 %v1567_v26, %v1354_v27 }
  0x3d   : > { %823 = vmatmul.bf16.gmra.mxu3 %v1353_v48  ;;  %793 = vmatmul.bf16.gmra.mxu0 %v1233_v49  ;;  %v1552_v48 = vld [vmem:[%s1762_s9 + $0xa4] sm:$0xf]  ;;  %v1294_v49 = vld [vmem:[%s1762_s9 + $0xb4] sm:$0xf0]  ;;  %v1361_v37 = vor.u32 %v1570_v29, %v1360_v28  ;;  %v1365_v39 = vor.u32 %v1568_v30, %v1362_v31 }
  0x3e   : > { %931 = vmatpush.bf16.msrb.mxu3 %v1599_v50  ;;  %980 = vmatpush.bf16.msrb.mxu0 %v1607_v51  ;;  %v1300_v50 = vld [vmem:[%s1762_s9 + $0xa8] sm:$0xf]  ;;  %v1555_v51 = vld [vmem:[%s1762_s9 + $0xb8] sm:$0xf0] }
  0x40   : > { %883 = vmatpush.bf16.msrb.mxu2 %v1590_v52  ;;  %834 = vmatpush.bf16.msrb.mxu1 %v1582_v53  ;;  %v1553_v52 = vld [vmem:[%s1762_s9 + $0xac] sm:$0xf]  ;;  %v1302_v53 = vld [vmem:[%s1762_s9 + $0xbc] sm:$0xf0] }
  0x42   : > { %932 = vmatpush.bf16.msrb.mxu3 %v1598_v54  ;;  %981 = vmatpush.bf16.msrb.mxu0 %v1606_v55  ;;  %v1308_v54 = vld [vmem:[%s1762_s9 + $0xb0] sm:$0xf]  ;;  %v1556_v55 = vld [vmem:[%s1762_s9 + $0xc0] sm:$0xf0] }
  0x44   : > { %884 = vmatpush.bf16.msrb.mxu2 %v1589_v56  ;;  %835 = vmatpush.bf16.msrb.mxu1 %v1581_v57  ;;  %v1297_v56 = vor.u32 %v1552_v48, %v1294_v49  ;;  %v1301_v57 = vor.u32 %v1555_v51, %v1300_v50 }
  0x46   : > { %933 = vmatpush.bf16.msrb.mxu3 %v1597_v58  ;;  %982 = vmatpush.bf16.msrb.mxu0 %v1605_v59  ;;  %v1305_v58 = vor.u32 %v1553_v52, %v1302_v53  ;;  %v1309_v59 = vor.u32 %v1556_v55, %v1308_v54 }
  0x48   : > { %885 = vmatpush.bf16.msrb.mxu2 %v1588_v60  ;;  %836 = vmatpush.bf16.msrb.mxu1 %v1580_v61  ;;  %v1557_v60 = vld [vmem:[%s1762_s9 + $0xcc] sm:$0xf]  ;;  %v1314_v61 = vld [vmem:[%s1762_s9 + $0xdc] sm:$0xf0] }
  0x49   : > { %v1317_v4 = vor.u32 %v1557_v60, %v1314_v61 }
  0x4a   : > { %934 = vmatpush.bf16.msrb.mxu3 %v1596_v62  ;;  %983 = vmatpush.bf16.msrb.mxu0 %v1604_v63  ;;  %v1320_v62 = vld [vmem:[%s1762_s9 + $0xd0] sm:$0xf]  ;;  %v1560_v63 = vld [vmem:[%s1762_s9 + $0xe0] sm:$0xf0] }
  0x4b   : > { %837 = vmatmul.bf16.vlgmr.msrb.gmra.mxu1 %v1217_v8  ;;  %886 = vmatmul.bf16.vlgmr.msrb.gmra.mxu2 %v1221_v9  ;;  %v1321_v5 = vor.u32 %v1560_v63, %v1320_v62  ;;  %v1562_v8 = vld [vmem:[%s1762_s9 + $0xf4] sm:$0xf]  ;;  %v1334_v9 = vld [vmem:[%s1762_s9 + $0x104] sm:$0xf0]  ;;  %v1976_v62 = vld [vmem:[%s2041_s3] ss:$0 sm:$0xff] }
  0x4c   : > { %v1337_v16 = vor.u32 %v1562_v8, %v1334_v9 }
  0x4d   : > { %935 = vmatmul.bf16.vlgmr.msrb.gmra.mxu3 %v1225_v10  ;;  %984 = vmatmul.bf16.vlgmr.msrb.gmra.mxu0 %v1229_v11  ;;  %v1340_v10 = vld [vmem:[%s1762_s9 + $0xf8] sm:$0xf]  ;;  %v1565_v11 = vld [vmem:[%s1762_s9 + $0x108] sm:$0xf0] }
  0x4e   : > { %v1341_v17 = vor.u32 %v1565_v11, %v1340_v10 }
  0x5b   : > { %842 = vmatmul.bf16.gmra.mxu1 %v1237_v20  ;;  %891 = vmatmul.bf16.gmra.mxu2 %v1241_v21  ;;  %v1349_v20 = vor.u32 %v1566_v15, %v1348_v14 }
  0x5d   : > { %940 = vmatmul.bf16.gmra.mxu3 %v1245_v22  ;;  %989 = vmatmul.bf16.gmra.mxu0 %v1249_v23 }
  0x6b   : > { %847 = vmatmul.bf16.gmra.mxu1 %v1257_v32  ;;  %896 = vmatmul.bf16.gmra.mxu2 %v1261_v33  ;;  %v1368_v32 = vld [vmem:[%s1762_s9 + $0x128] sm:$0xf]  ;;  %v1571_v33 = vld [vmem:[%s1762_s9 + $0x138] sm:$0xf0] }
  0x6c   : > { %v1369_v40 = vor.u32 %v1571_v33, %v1368_v32 }
  0x6d   : > { %945 = vmatmul.bf16.gmra.mxu3 %v1265_v34  ;;  %994 = vmatmul.bf16.gmra.mxu0 %v1269_v35 }
  0x7b   : > { %852 = vmatmul.bf16.gmra.mxu1 %v1277_v44  ;;  %901 = vmatmul.bf16.gmra.mxu2 %v1281_v45 }
  0x7d   : > { %950 = vmatmul.bf16.gmra.mxu3 %v1285_v46  ;;  %999 = vmatmul.bf16.gmra.mxu0 %v1289_v47 }
  0x8b   : > { %857 = vmatmul.bf16.gmra.mxu1 %v1297_v56  ;;  %906 = vmatmul.bf16.gmra.mxu2 %v1301_v57 }
  0x8d   : > { %955 = vmatmul.bf16.gmra.mxu3 %v1305_v58  ;;  %1004 = vmatmul.bf16.gmra.mxu0 %v1309_v59  ;;  %v1970_v58 = vld [vmem:[%s2040_s2] ss:$0 sm:$0xff] }
  0x9b   : > { %862 = vmatmul.bf16.gmra.mxu1 %v1317_v4  ;;  %911 = vmatmul.bf16.gmra.mxu2 %v1321_v5 }
  0x9d   : > { %960 = vmatmul.bf16.gmra.mxu3 %v1325_v6  ;;  %1009 = vmatmul.bf16.gmra.mxu0 %v1329_v7 }
  0xa8   : > { %v1935_v18 = vpop.f32.mrf.mxu1 }
  0xaa   : > { %v789_v21 = vpop.f32.mrf.mxu0 }
  0xab   : > { %867 = vmatmul.bf16.gmra.mxu1 %v1337_v16  ;;  %916 = vmatmul.bf16.gmra.mxu2 %v1341_v17 }
  0xad   : > { %965 = vmatmul.bf16.gmra.mxu3 %v1345_v19  ;;  %1014 = vmatmul.bf16.gmra.mxu0 %v1349_v20 }
  0xae   : > { %v1937_v22 = vpop.f32.mrf.mxu2 }
  0xb0   : > { %v1939_v23 = vpop.f32.mrf.mxu3  ;;  %v1941_v24 = vpop.f32.mrf.mxu1 }
  0xb2   : > { %v791_v25 = vpop.f32.mrf.mxu0 }
  0xb6   : > { %v1951_v34 = vpop.f32.mrf.mxu2 }
  0xb8   : > { %v1953_v35 = vpop.f32.mrf.mxu3  ;;  %v1955_v38 = vpop.f32.mrf.mxu1 }
  0xba   : > { %v794_v41 = vpop.f32.mrf.mxu0 }
  0xbb   : > { %872 = vmatmul.bf16.gmra.mxu1 %v1357_v36  ;;  %921 = vmatmul.bf16.gmra.mxu2 %v1361_v37 }
  0xbd   : > { %970 = vmatmul.bf16.gmra.mxu3 %v1365_v39  ;;  %1019 = vmatmul.bf16.gmra.mxu0 %v1369_v40 }
  0xbe   : > { %v1957_v42 = vpop.f32.mrf.mxu2 }
  0xc0   : > { %v1959_v43 = vpop.f32.mrf.mxu3  ;;  %v1961_v44 = vpop.f32.mrf.mxu1 }
  0xc2   : > { %v796_v45 = vpop.f32.mrf.mxu0 }
  0xc6   : > { %v1963_v46 = vpop.f32.mrf.mxu2 }
  0xc8   : > { %v1965_v47 = vpop.f32.mrf.mxu3  ;;  %v838_v48 = vpop.f32.mrf.mxu1 }
  0xc9   : > { %v839_v50 = vadd.f32 %v838_v48, %v789_v21 }
  0xca   : > { %v985_v49 = vpop.f32.mrf.mxu0 }
  0xce   : > { %v887_v51 = vpop.f32.mrf.mxu2 }
  0xcf   : > { %v888_v52 = vadd.f32 %v887_v51, %v839_v50 }
  0xd0   : > { %v936_v53 = vpop.f32.mrf.mxu3  ;;  %v840_v54 = vpop.f32.mrf.mxu1 }
  0xd1   : > { %v937_v55 = vadd.f32 %v936_v53, %v888_v52  ;;  %v841_v59 = vadd.f32 %v840_v54, %v791_v25 }
  0xd2   : > { %v987_v56 = vpop.f32.mrf.mxu0 }
  0xd3   : > { %v986_v57 = vadd.f32 %v985_v49, %v937_v55 }
  0xd5   : > { %v1029_v61 = vmul.f32 %v1970_v58, %v986_v57 }
  0xd6   : > { %v889_v60 = vpop.f32.mrf.mxu2 }
  0xd7   : > { %v890_v63 = vadd.f32 %v889_v60, %v841_v59  ;;  %v1049_v4 = vadd.f32 %v1976_v62, %v1029_v61 }
  0xd8   : > { %v938_v0 = vpop.f32.mrf.mxu3  ;;  %v843_v1 = vpop.f32.mrf.mxu1 }
  0xd9   : > { %v939_v2 = vadd.f32 %v938_v0, %v890_v63  ;;  %v844_v7 = vadd.f32 %v843_v1, %v794_v41  ;;  %v1081_v9 = vmul.f32 0.2, %v1049_v4  ;;  %vm1065_vm0 = vcmp.gt.f32.partialorder %v1049_v4, 0.0 }
  0xda   : > { %v990_v3 = vpop.f32.mrf.mxu0 }
  0xdb   : > { %v988_v5 = vadd.f32 %v987_v56, %v939_v2  ;;  %v1097_v17 = vsel %vm1065_vm0, %v1049_v4, %v1081_v9 }
  0xdd   : > { %v1030_v6 = vmul.f32 %v1970_v58, %v988_v5 }
  0xde   : > { %v892_v8 = vpop.f32.mrf.mxu2 }
  0xdf   : > { %v1050_v10 = vadd.f32 %v1976_v62, %v1030_v6  ;;  %v893_v11 = vadd.f32 %v892_v8, %v844_v7 }
  0xe0   : > { %v941_v12 = vpop.f32.mrf.mxu3  ;;  %v845_v13 = vpop.f32.mrf.mxu1 }
  0xe1   : > { %vm1066_vm1 = vcmp.gt.f32.partialorder %v1050_v10, 0.0  ;;  %v1082_v14 = vmul.f32 0.2, %v1050_v10  ;;  %v942_v15 = vadd.f32 %v941_v12, %v893_v11  ;;  %v846_v25 = vadd.f32 %v845_v13, %v796_v45 }
  0xe2   : > { %v992_v16 = vpop.f32.mrf.mxu0 }
  0xe3   : > { %v1098_v19 = vsel %vm1066_vm1, %v1050_v10, %v1082_v14  ;;  %v991_v20 = vadd.f32 %v990_v3, %v942_v15 }
  0xe4   : > { %v1615_v21 = vpack.c.bf16 %v1098_v19, %v1097_v17 }
  0xe5   : > { %v1031_v27 = vmul.f32 %v1970_v58, %v991_v20 }
  0xe6   : > { %1616 = vst [vmem:[%s1985_s13] sm:$0xff] %v1615_v21   ;;  %v894_v26 = vpop.f32.mrf.mxu2 }
  0xe7   : > { %v895_v28 = vadd.f32 %v894_v26, %v846_v25  ;;  %v1051_v33 = vadd.f32 %v1976_v62, %v1031_v27 }
  0xe8   : > { %v943_v29 = vpop.f32.mrf.mxu3  ;;  %v848_v30 = vpop.f32.mrf.mxu1 }
  0xe9   : > { %v944_v31 = vadd.f32 %v943_v29, %v895_v28  ;;  %v849_v39 = vadd.f32 %v848_v30, %v1935_v18  ;;  %v1083_v41 = vmul.f32 0.2, %v1051_v33  ;;  %vm1067_vm2 = vcmp.gt.f32.partialorder %v1051_v33, 0.0 }
  0xea   : > { %v995_v32 = vpop.f32.mrf.mxu0 }
  0xeb   : > { %v993_v36 = vadd.f32 %v992_v16, %v944_v31  ;;  %v1099_v54 = vsel %vm1067_vm2, %v1051_v33, %v1083_v41 }
  0xed   : > { %v1032_v37 = vmul.f32 %v1970_v58, %v993_v36 }
  0xee   : > { %v897_v40 = vpop.f32.mrf.mxu2 }
  0xef   : > { %v1052_v45 = vadd.f32 %v1976_v62, %v1032_v37  ;;  %v898_v48 = vadd.f32 %v897_v40, %v849_v39 }
  0xf0   : > { %v946_v49 = vpop.f32.mrf.mxu3  ;;  %v850_v50 = vpop.f32.mrf.mxu1 }
  0xf1   : > { %vm1068_vm3 = vcmp.gt.f32.partialorder %v1052_v45, 0.0  ;;  %v1084_v51 = vmul.f32 0.2, %v1052_v45  ;;  %v947_v52 = vadd.f32 %v946_v49, %v898_v48  ;;  %v851_v59 = vadd.f32 %v850_v50, %v1941_v24 }
  0xf2   : > { %v997_v53 = vpop.f32.mrf.mxu0 }
  0xf3   : > { %v1100_v55 = vsel %vm1068_vm3, %v1052_v45, %v1084_v51  ;;  %v996_v56 = vadd.f32 %v995_v32, %v947_v52 }
  0xf4   : > { %v1620_v57 = vpack.c.bf16 %v1100_v55, %v1099_v54 }
  0xf5   : > { %v1033_v60 = vmul.f32 %v1970_v58, %v996_v56 }
  0xf6   : > { %1652 = vst [vmem:[%s1985_s13 + $0x8] sm:$0xff] %v1620_v57   ;;  %v899_v18 = vpop.f32.mrf.mxu2 }
  0xf7   : > { %v900_v61 = vadd.f32 %v899_v18, %v851_v59  ;;  %v1053_v3 = vadd.f32 %v1976_v62, %v1033_v60 }
  0xf8   : > { %v948_v63 = vpop.f32.mrf.mxu3  ;;  %v853_v0 = vpop.f32.mrf.mxu1 }
  0xf9   : > { %v949_v1 = vadd.f32 %v948_v63, %v900_v61  ;;  %v854_v6 = vadd.f32 %v853_v0, %v1955_v38  ;;  %v1085_v8 = vmul.f32 0.2, %v1053_v3  ;;  %vm1069_vm4 = vcmp.gt.f32.partialorder %v1053_v3, 0.0 }
  0xfa   : > { %v1000_v2 = vpop.f32.mrf.mxu0 }
  0xfb   : > { %v998_v4 = vadd.f32 %v997_v53, %v949_v1  ;;  %v1101_v15 = vsel %vm1069_vm4, %v1053_v3, %v1085_v8 }
  0xfd   : > { %v1034_v5 = vmul.f32 %v1970_v58, %v998_v4 }
  0xfe   : > { %v902_v7 = vpop.f32.mrf.mxu2 }
  0xff   : > { %v1054_v24 = vadd.f32 %v1976_v62, %v1034_v5  ;;  %v903_v9 = vadd.f32 %v902_v7, %v854_v6 }
 0x100   : > { %v951_v10 = vpop.f32.mrf.mxu3  ;;  %v855_v11 = vpop.f32.mrf.mxu1 }
 0x101   : > { %vm1070_vm5 = vcmp.gt.f32.partialorder %v1054_v24, 0.0  ;;  %v1086_v12 = vmul.f32 0.2, %v1054_v24  ;;  %v952_v13 = vadd.f32 %v951_v10, %v903_v9  ;;  %v856_v20 = vadd.f32 %v855_v11, %v1961_v44 }
 0x102   : > { %v1002_v14 = vpop.f32.mrf.mxu0 }
 0x103   : > { %v1102_v16 = vsel %vm1070_vm5, %v1054_v24, %v1086_v12  ;;  %v1001_v17 = vadd.f32 %v1000_v2, %v952_v13 }
 0x104   : > { %v1625_v19 = vpack.c.bf16 %v1102_v16, %v1101_v15 }
 0x105   : > { %v1035_v21 = vmul.f32 %v1970_v58, %v1001_v17 }
 0x106   : > { %1653 = vst [vmem:[%s1985_s13 + $0x10] sm:$0xff] %v1625_v19   ;;  %v904_v38 = vpop.f32.mrf.mxu2 }
 0x107   : > { %v905_v25 = vadd.f32 %v904_v38, %v856_v20  ;;  %v1055_v30 = vadd.f32 %v1976_v62, %v1035_v21 }
 0x108   : > { %v953_v26 = vpop.f32.mrf.mxu3  ;;  %v858_v27 = vpop.f32.mrf.mxu1 }
 0x109   : > { %v954_v28 = vadd.f32 %v953_v26, %v905_v25  ;;  %v859_v33 = vadd.f32 %v858_v27, %v1937_v22  ;;  %v1087_v37 = vmul.f32 0.2, %v1055_v30  ;;  %vm1071_vm6 = vcmp.gt.f32.partialorder %v1055_v30, 0.0 }
 0x10a   : > { %v1005_v29 = vpop.f32.mrf.mxu0 }
 0x10b   : > { %v1003_v31 = vadd.f32 %v1002_v14, %v954_v28  ;;  %v1103_v50 = vsel %vm1071_vm6, %v1055_v30, %v1087_v37 }
 0x10d   : > { %v1036_v32 = vmul.f32 %v1970_v58, %v1003_v31 }
 0x10e   : > { %v907_v36 = vpop.f32.mrf.mxu2 }
 0x10f   : > { %v1056_v44 = vadd.f32 %v1976_v62, %v1036_v32  ;;  %v908_v39 = vadd.f32 %v907_v36, %v859_v33 }
 0x110   : > { %v956_v40 = vpop.f32.mrf.mxu3  ;;  %v860_v41 = vpop.f32.mrf.mxu1 }
 0x111   : > { %vm1072_vm7 = vcmp.gt.f32.partialorder %v1056_v44, 0.0  ;;  %v1088_v45 = vmul.f32 0.2, %v1056_v44  ;;  %v957_v48 = vadd.f32 %v956_v40, %v908_v39  ;;  %v861_v54 = vadd.f32 %v860_v41, %v1951_v34 }
 0x112   : > { %v1007_v49 = vpop.f32.mrf.mxu0 }
 0x113   : > { %v1104_v51 = vsel %vm1072_vm7, %v1056_v44, %v1088_v45  ;;  %v1006_v52 = vadd.f32 %v1005_v29, %v957_v48 }
 0x114   : > { %v1630_v53 = vpack.c.bf16 %v1104_v51, %v1103_v50 }
 0x115   : > { %v1037_v55 = vmul.f32 %v1970_v58, %v1006_v52 }
 0x116   : > { %1654 = vst [vmem:[%s1985_s13 + $0x18] sm:$0xff] %v1630_v53   ;;  %v909_v22 = vpop.f32.mrf.mxu2 }
 0x117   : > { %v910_v56 = vadd.f32 %v909_v22, %v861_v54  ;;  %v1057_v61 = vadd.f32 %v1976_v62, %v1037_v55 }
 0x118   : > { %v958_v57 = vpop.f32.mrf.mxu3  ;;  %v863_v59 = vpop.f32.mrf.mxu1 }
 0x119   : > { %v959_v18 = vadd.f32 %v958_v57, %v910_v56  ;;  %v864_v1 = vadd.f32 %v863_v59, %v1957_v42  ;;  %v1089_v3 = vmul.f32 0.2, %v1057_v61  ;;  %vm1073_vm8 = vcmp.gt.f32.partialorder %v1057_v61, 0.0 }
 0x11a   : > { %v1010_v60 = vpop.f32.mrf.mxu0 }
 0x11b   : > { %v1008_v63 = vadd.f32 %v1007_v49, %v959_v18  ;;  %v1105_v9 = vsel %vm1073_vm8, %v1057_v61, %v1089_v3 }
 0x11d   : > { %v1038_v0 = vmul.f32 %v1970_v58, %v1008_v63 }
 0x11e   : > { %v912_v2 = vpop.f32.mrf.mxu2 }
 0x11f   : > { %v1058_v34 = vadd.f32 %v1976_v62, %v1038_v0  ;;  %v913_v4 = vadd.f32 %v912_v2, %v864_v1 }
 0x120   : > { %v961_v5 = vpop.f32.mrf.mxu3  ;;  %v865_v6 = vpop.f32.mrf.mxu1 }
 0x121   : > { %vm1074_vm9 = vcmp.gt.f32.partialorder %v1058_v34, 0.0  ;;  %v1090_v7 = vmul.f32 0.2, %v1058_v34  ;;  %v962_v8 = vadd.f32 %v961_v5, %v913_v4  ;;  %v866_v13 = vadd.f32 %v865_v6, %v1963_v46 }
 0x122   : > { %v1012_v24 = vpop.f32.mrf.mxu0 }
 0x123   : > { %v1106_v10 = vsel %vm1074_vm9, %v1058_v34, %v1090_v7  ;;  %v1011_v11 = vadd.f32 %v1010_v60, %v962_v8 }
 0x124   : > { %v1635_v12 = vpack.c.bf16 %v1106_v10, %v1105_v9 }
 0x125   : > { %v1039_v14 = vmul.f32 %v1970_v58, %v1011_v11 }
 0x126   : > { %1655 = vst [vmem:[%s1985_s13 + $0x20] sm:$0xff] %v1635_v12   ;;  %v914_v42 = vpop.f32.mrf.mxu2 }
 0x127   : > { %v915_v15 = vadd.f32 %v914_v42, %v866_v13  ;;  %v1059_v20 = vadd.f32 %v1976_v62, %v1039_v14 }
 0x128   : > { %v963_v16 = vpop.f32.mrf.mxu3  ;;  %v868_v17 = vpop.f32.mrf.mxu1 }
 0x129   : > { %v964_v19 = vadd.f32 %v963_v16, %v915_v15  ;;  %v869_v26 = vadd.f32 %v868_v17, %v1939_v23  ;;  %v1091_v28 = vmul.f32 0.2, %v1059_v20  ;;  %vm1075_vm10 = vcmp.gt.f32.partialorder %v1059_v20, 0.0 }
 0x12a   : > { %v1015_v21 = vpop.f32.mrf.mxu0 }
 0x12b   : > { %v1013_v38 = vadd.f32 %v1012_v24, %v964_v19  ;;  %v1107_v36 = vsel %vm1075_vm10, %v1059_v20, %v1091_v28 }
 0x12d   : > { %v1040_v25 = vmul.f32 %v1970_v58, %v1013_v38 }
 0x12e   : > { %v917_v27 = vpop.f32.mrf.mxu2 }
 0x12f   : > { %v1060_v46 = vadd.f32 %v1976_v62, %v1040_v25  ;;  %v918_v29 = vadd.f32 %v917_v27, %v869_v26 }
 0x130   : > { %v966_v30 = vpop.f32.mrf.mxu3  ;;  %v870_v31 = vpop.f32.mrf.mxu1 }
 0x131   : > { %vm1076_vm11 = vcmp.gt.f32.partialorder %v1060_v46, 0.0  ;;  %v1092_v32 = vmul.f32 0.2, %v1060_v46  ;;  %v967_v33 = vadd.f32 %v966_v30, %v918_v29  ;;  %v871_v40 = vadd.f32 %v870_v31, %v1953_v35 }
 0x132   : > { %v1017_v23 = vpop.f32.mrf.mxu0 }
 0x133   : > { %v1108_v37 = vsel %vm1076_vm11, %v1060_v46, %v1092_v32  ;;  %v1016_v44 = vadd.f32 %v1015_v21, %v967_v33 }
 0x134   : > { %v1640_v39 = vpack.c.bf16 %v1108_v37, %v1107_v36 }
 0x135   : > { %v1041_v45 = vmul.f32 %v1970_v58, %v1016_v44 }
 0x136   : > { %1656 = vst [vmem:[%s1985_s13 + $0x28] sm:$0xff] %v1640_v39   ;;  %v919_v41 = vpop.f32.mrf.mxu2 }
 0x137   : > { %v920_v48 = vadd.f32 %v919_v41, %v871_v40  ;;  %v1061_v52 = vadd.f32 %v1976_v62, %v1041_v45 }
 0x138   : > { %v968_v49 = vpop.f32.mrf.mxu3  ;;  %v873_v50 = vpop.f32.mrf.mxu1 }
 0x139   : > { %v969_v51 = vadd.f32 %v968_v49, %v920_v48  ;;  %v874_v22 = vadd.f32 %v873_v50, %v1959_v43  ;;  %v1093_v56 = vmul.f32 0.2, %v1061_v52  ;;  %vm1077_vm12 = vcmp.gt.f32.partialorder %v1061_v52, 0.0 }
 0x13a   : > { %v1020_v18 = vpop.f32.mrf.mxu0 }
 0x13b   : > { %v1018_v53 = vadd.f32 %v1017_v23, %v969_v51  ;;  %v1109_v0 = vsel %vm1077_vm12, %v1061_v52, %v1093_v56 }
 0x13d   : > { %v1042_v54 = vmul.f32 %v1970_v58, %v1018_v53 }
 0x13e   : > { %v922_v55 = vpop.f32.mrf.mxu2 }
 0x13f   : > { %v1062_v35 = vadd.f32 %v1976_v62, %v1042_v54  ;;  %v923_v57 = vadd.f32 %v922_v55, %v874_v22 }
 0x140   : > { %v971_v59 = vpop.f32.mrf.mxu3  ;;  %v875_v63 = vpop.f32.mrf.mxu1 }
 0x141   : > { %vm1078_vm13 = vcmp.gt.f32.partialorder %v1062_v35, 0.0  ;;  %v1094_v60 = vmul.f32 0.2, %v1062_v35  ;;  %v972_v61 = vadd.f32 %v971_v59, %v923_v57  ;;  %v876_v34 = vadd.f32 %v875_v63, %v1965_v47 }
 0x142   : > { %v1022_v8 = vpop.f32.mrf.mxu0 }
 0x143   : > { %v1110_v1 = vsel %vm1078_vm13, %v1062_v35, %v1094_v60  ;;  %v1021_v2 = vadd.f32 %v1020_v18, %v972_v61 }
 0x144   : > { %v1645_v3 = vpack.c.bf16 %v1110_v1, %v1109_v0 }
 0x145   : > { %v1043_v4 = vmul.f32 %v1970_v58, %v1021_v2 }
 0x146   : > { %1657 = vst [vmem:[%s1985_s13 + $0x30] sm:$0xff] %v1645_v3   ;;  %v924_v43 = vpop.f32.mrf.mxu2 }
 0x147   : > { %v925_v5 = vadd.f32 %v924_v43, %v876_v34  ;;  %v1063_v24 = vadd.f32 %v1976_v62, %v1043_v4 }
 0x148   : > { %v973_v6 = vpop.f32.mrf.mxu3 }
 0x149   : > { %v974_v7 = vadd.f32 %v973_v6, %v925_v5  ;;  %v1095_v11 = vmul.f32 0.2, %v1063_v24  ;;  %vm1079_vm14 = vcmp.gt.f32.partialorder %v1063_v24, 0.0 }
 0x14b   : > { %v1023_v9 = vadd.f32 %v1022_v8, %v974_v7  ;;  %v1111_v13 = vsel %vm1079_vm14, %v1063_v24, %v1095_v11 }
 0x14d   : > { %v1044_v10 = vmul.f32 %v1970_v58, %v1023_v9 }
 0x14f   : > { %v1064_v12 = vadd.f32 %v1976_v62, %v1044_v10 }
 0x151   : > { %vm1080_vm15 = vcmp.gt.f32.partialorder %v1064_v12, 0.0  ;;  %v1096_v47 = vmul.f32 0.2, %v1064_v12 }
 0x153   : > { %v1112_v42 = vsel %vm1080_vm15, %v1064_v12, %v1096_v47 }
 0x154   : > { %v1650_v14 = vpack.c.bf16 %v1112_v42, %v1111_v13 }
 0x156   : > { %1658 = vst [vmem:[%s1985_s13 + $0x38] sm:$0xff] %v1650_v14  }
 0x157 PF: > { %s14_s15 = sadd.s32 1, %s1700_s15  }
 0x158   : > { %p11_p4 = scmp.ge.s32.totalorder %s14_s15, 4  }
 0x15a   :  { %13 = sbr.rel (!%p11_p4) target bundleno = 1 (0x1), region = 66 }

// kernel: discriminator_dc_forward.7
= control target key start
LH: loop header
LB: loop body
LE: loop exit
PB: predicated region body
PF: predicated region fallthrough
CT: control target
= control target key end

     0   :  { %s1311_s15 = smov 0   ;;  %s1538_s0 = inlined_call_operand.vmem [shape: bf16[128,640], index: 0, kind: input, shape index: {}]   ;;  %s1539_s1 = inlined_call_operand.vmem [shape: bf16[640,128], index: 1, kind: input, shape index: {}]   ;;  %s1540_s2 = inlined_call_operand.vmem [shape: f32[1,128], index: 2, kind: input, shape index: {}]   ;;  %s1541_s3 = inlined_call_operand.vmem [shape: f32[1,128], index: 3, kind: input, shape index: {}]   ;;  %s1542_s4 = inlined_call_operand.vmem [shape: bf16[128,128], index: 4, kind: output, shape index: {}]  }
   0x1 LB: > { %s917_s16 = sadd.s32 4294967295, %s1284_s15   ;;  %p921_p0 = scmp.ge.s32.totalorder %s1284_s15, 1  ;;  %s1284_s15 = sphi %s1311_s15, %s14_s15  }
   0x2   : > { %p164_p1 = scmp.lt.s32.totalorder %s1284_s15, 3 }
   0x4   : > { %p165_p2 = pnand %p921_p0, %p164_p1 }
   0x5   : > { %s922_s7 = sshll.u32 (!%p165_p2), %s917_s16, 3 }
   0x6   : > { %168 = sbr.rel (%p165_p2) target bundleno = 275 (0x113), region = 36  ;;  %p192_p3 = scmp.lt.s32.totalorder (!%p165_p2), %s922_s7, 15 }
   0xb   : > { %v1195_v0 = vld [vmem:[%s1539_s1 + $0x38] sm:$0xff]  ;;  %v1194_v2 = vld [vmem:[%s1539_s1 + $0x30] sm:$0xff]  ;;  %v1193_v6 = vld [vmem:[%s1539_s1 + $0x28] sm:$0xff]  ;;  %s1544_s7 = smov (!%p192_p3, %s922_s7), 15 }
   0xc   : > { %v1211_v1 = vld [vmem:[%s1539_s1 + $0xb8] sm:$0xff]  ;;  %1251 = vmatpush.bf16.msra.mxu1 %v1195_v0  ;;  %652 = vmatpush.bf16.msra.mxu0 %v1195_v0  ;;  %v1210_v3 = vld [vmem:[%s1539_s1 + $0xb0] sm:$0xff]  ;;  %v1209_v7 = vld [vmem:[%s1539_s1 + $0xa8] sm:$0xff]  ;;  %s1267_s25 = smul.u32 20, %s1544_s7  ;;  %s925_s8 = sshll.u32 %s1544_s7, 2 }
   0xd   : > { %710 = vmatpush.bf16.msra.mxu2 %v1211_v1  ;;  %v1219_v4 = vld [vmem:[%s1539_s1 + $0xf8] sm:$0xff]  ;;  %v1218_v5 = vld [vmem:[%s1539_s1 + $0xf0] sm:$0xff]  ;;  %v1217_v8 = vld [vmem:[%s1539_s1 + $0xe8] sm:$0xff]  ;;  %s1513_s12 = scalar_lea.vmem %s1542_s4, %s925_s8 }
   0xe   : > { %739 = vmatpush.bf16.msra.mxu3 %v1219_v4  ;;  %v1192_v9 = vld [vmem:[%s1539_s1 + $0x20] sm:$0xff]  ;;  %v1191_v12 = vld [vmem:[%s1539_s1 + $0x18] sm:$0xff]  ;;  %v1190_v15 = vld [vmem:[%s1539_s1 + $0x10] sm:$0xff]  ;;  %s1382_s9 = scalar_lea.vmem %s1538_s0, %s1267_s25 }
   0xf   : > { %v1208_v10 = vld [vmem:[%s1539_s1 + $0xa0] sm:$0xff]  ;;  %v1207_v13 = vld [vmem:[%s1539_s1 + $0x98] sm:$0xff]  ;;  %v1206_v16 = vld [vmem:[%s1539_s1 + $0x90] sm:$0xff] }
  0x10   : > { %1252 = vmatpush.bf16.msra.mxu1 %v1194_v2  ;;  %653 = vmatpush.bf16.msra.mxu0 %v1194_v2  ;;  %v1216_v11 = vld [vmem:[%s1539_s1 + $0xe0] sm:$0xff]  ;;  %v1215_v14 = vld [vmem:[%s1539_s1 + $0xd8] sm:$0xff]  ;;  %v1214_v17 = vld [vmem:[%s1539_s1 + $0xd0] sm:$0xff] }
  0x11   : > { %711 = vmatpush.bf16.msra.mxu2 %v1210_v3  ;;  %v1189_v18 = vld [vmem:[%s1539_s1 + $0x8] sm:$0xff]  ;;  %v1188_v20 = vld [vmem:[%s1539_s1] sm:$0xff]  ;;  %v968_v21 = vld [vmem:[%s1382_s9 + $0x50] sm:$0xf] }
  0x12   : > { %740 = vmatpush.bf16.msra.mxu3 %v1218_v5  ;;  %v1205_v19 = vld [vmem:[%s1539_s1 + $0x88] sm:$0xff]  ;;  %v1203_v22 = vld [vmem:[%s1539_s1 + $0x78] sm:$0xff]  ;;  %v1180_v24 = vld [vmem:[%s1382_s9 + $0x60] sm:$0xf0] }
  0x13   : > { %v1213_v23 = vld [vmem:[%s1539_s1 + $0xc8] sm:$0xff]  ;;  %v928_v25 = vld [vmem:[%s1382_s9] sm:$0xf]  ;;  %v1170_v26 = vld [vmem:[%s1382_s9 + $0x10] sm:$0xf0]  ;;  %v969_v31 = vor.u32 %v1180_v24, %v968_v21 }
  0x14   : > { %1253 = vmatpush.bf16.msra.mxu1 %v1193_v6  ;;  %654 = vmatpush.bf16.msra.mxu0 %v1193_v6  ;;  %v1204_v27 = vld [vmem:[%s1539_s1 + $0x80] sm:$0xff]  ;;  %v936_v28 = vld [vmem:[%s1382_s9 + $0x8] sm:$0xf]  ;;  %v1171_v29 = vld [vmem:[%s1382_s9 + $0x18] sm:$0xf0]  ;;  %v929_v32 = vor.u32 %v1170_v26, %v928_v25 }
  0x15   : > { %712 = vmatpush.bf16.msra.mxu2 %v1209_v7  ;;  %v1227_v30 = vld [vmem:[%s1539_s1 + $0x138] sm:$0xff]  ;;  %v937_v33 = vor.u32 %v1171_v29, %v936_v28  ;;  %v1212_v34 = vld [vmem:[%s1539_s1 + $0xc0] sm:$0xff]  ;;  %v1169_v35 = vld [vmem:[%s1382_s9 + $0xc] sm:$0xf] }
  0x16   : > { %741 = vmatpush.bf16.msra.mxu3 %v1217_v8  ;;  %v938_v36 = vld [vmem:[%s1382_s9 + $0x1c] sm:$0xf0]  ;;  %v1202_v37 = vld [vmem:[%s1539_s1 + $0x70] sm:$0xff]  ;;  %v1201_v40 = vld [vmem:[%s1539_s1 + $0x68] sm:$0xff] }
  0x17   : > { %v1226_v38 = vld [vmem:[%s1539_s1 + $0x130] sm:$0xff]  ;;  %v941_v39 = vor.u32 %v1169_v35, %v938_v36  ;;  %v1225_v41 = vld [vmem:[%s1539_s1 + $0x128] sm:$0xff]  ;;  %v1200_v42 = vld [vmem:[%s1539_s1 + $0x60] sm:$0xff] }
  0x18   : > { %1254 = vmatpush.bf16.msra.mxu1 %v1192_v9  ;;  %655 = vmatpush.bf16.msra.mxu0 %v1192_v9  ;;  %v1224_v43 = vld [vmem:[%s1539_s1 + $0x120] sm:$0xff]  ;;  %v988_v44 = vld [vmem:[%s1382_s9 + $0x78] sm:$0xf]  ;;  %v1185_v45 = vld [vmem:[%s1382_s9 + $0x88] sm:$0xf0] }
  0x19   : > { %713 = vmatpush.bf16.msra.mxu2 %v1208_v10  ;;  %v948_v46 = vld [vmem:[%s1382_s9 + $0x28] sm:$0xf]  ;;  %v1175_v47 = vld [vmem:[%s1382_s9 + $0x38] sm:$0xf0]  ;;  %v956_v49 = vld [vmem:[%s1382_s9 + $0x30] sm:$0xf]  ;;  %v989_v52 = vor.u32 %v1185_v45, %v988_v44 }
  0x1a   : > { %742 = vmatpush.bf16.msra.mxu3 %v1216_v11  ;;  %v1199_v48 = vld [vmem:[%s1539_s1 + $0x58] sm:$0xff]  ;;  %v1176_v50 = vld [vmem:[%s1382_s9 + $0x40] sm:$0xf0]  ;;  %v949_v53 = vor.u32 %v1175_v47, %v948_v46  ;;  %v1174_v55 = vld [vmem:[%s1382_s9 + $0x34] sm:$0xf] }
  0x1b   : > { %v1223_v51 = vld [vmem:[%s1539_s1 + $0x118] sm:$0xff]  ;;  %v957_v54 = vor.u32 %v1176_v50, %v956_v49  ;;  %v958_v56 = vld [vmem:[%s1382_s9 + $0x44] sm:$0xf0]  ;;  %v1198_v57 = vld [vmem:[%s1539_s1 + $0x50] sm:$0xff] }
  0x1c   : > { %1255 = vmatpush.bf16.msra.mxu1 %v1191_v12  ;;  %656 = vmatpush.bf16.msra.mxu0 %v1191_v12  ;;  %v1222_v58 = vld [vmem:[%s1539_s1 + $0x110] sm:$0xff]  ;;  %v961_v59 = vor.u32 %v1174_v55, %v958_v56  ;;  %v1197_v60 = vld [vmem:[%s1539_s1 + $0x48] sm:$0xff]  ;;  %v1196_v62 = vld [vmem:[%s1539_s1 + $0x40] sm:$0xff] }
  0x1d   : > { %714 = vmatpush.bf16.msra.mxu2 %v1207_v13  ;;  %v1221_v61 = vld [vmem:[%s1539_s1 + $0x108] sm:$0xff]  ;;  %v1220_v63 = vld [vmem:[%s1539_s1 + $0x100] sm:$0xff]  ;;  %v930_v1 = vld [vmem:[%s1382_s9 + $0x14] sm:$0xf0] }
  0x1e   : > { %743 = vmatpush.bf16.msra.mxu3 %v1215_v14  ;;  %v1168_v0 = vld [vmem:[%s1382_s9 + $0x4] sm:$0xf]  ;;  %v944_v2 = vld [vmem:[%s1382_s9 + $0x10] sm:$0xf]  ;;  %v976_v4 = vld [vmem:[%s1382_s9 + $0x58] sm:$0xf] }
  0x1f   : > { %v1172_v3 = vld [vmem:[%s1382_s9 + $0x20] sm:$0xf0]  ;;  %v1181_v5 = vld [vmem:[%s1382_s9 + $0x68] sm:$0xf0]  ;;  %v933_v6 = vor.u32 %v1168_v0, %v930_v1  ;;  %v1179_v9 = vld [vmem:[%s1382_s9 + $0x5c] sm:$0xf] }
  0x20   : > { %1256 = vmatpush.bf16.msra.mxu1 %v1190_v15  ;;  %657 = vmatpush.bf16.msra.mxu0 %v1190_v15  ;;  %v945_v7 = vor.u32 %v1172_v3, %v944_v2  ;;  %v977_v8 = vor.u32 %v1181_v5, %v976_v4  ;;  %v978_v10 = vld [vmem:[%s1382_s9 + $0x6c] sm:$0xf0]  ;;  %v1173_v12 = vld [vmem:[%s1382_s9 + $0x2c] sm:$0xf]  ;;  %v950_v13 = vld [vmem:[%s1382_s9 + $0x3c] sm:$0xf0] }
  0x21   : > { %715 = vmatpush.bf16.msra.mxu2 %v1206_v16  ;;  %v981_v11 = vor.u32 %v1179_v9, %v978_v10  ;;  %v964_v14 = vld [vmem:[%s1382_s9 + $0x38] sm:$0xf]  ;;  %v1177_v15 = vld [vmem:[%s1382_s9 + $0x48] sm:$0xf0]  ;;  %v996_v16 = vld [vmem:[%s1382_s9 + $0x80] sm:$0xf] }
  0x22   : > { %744 = vmatpush.bf16.msra.mxu3 %v1214_v17  ;;  %v1186_v17 = vld [vmem:[%s1382_s9 + $0x90] sm:$0xf0]  ;;  %v1184_v21 = vld [vmem:[%s1382_s9 + $0x84] sm:$0xf]  ;;  %v970_v25 = vld [vmem:[%s1382_s9 + $0x64] sm:$0xf0] }
  0x23   : > { %v1178_v24 = vld [vmem:[%s1382_s9 + $0x54] sm:$0xf]  ;;  %v984_v26 = vld [vmem:[%s1382_s9 + $0x60] sm:$0xf]  ;;  %v1004_v28 = vld [vmem:[%s1382_s9 + $0x88] sm:$0xf] }
  0x24   : > { %1257 = vmatpush.bf16.msra.mxu1 %v1189_v18  ;;  %658 = vmatpush.bf16.msra.mxu0 %v1189_v18  ;;  %v953_v18 = vor.u32 %v1173_v12, %v950_v13  ;;  %v1187_v29 = vld [vmem:[%s1382_s9 + $0x98] sm:$0xf0]  ;;  %v1498_v56 = vld [vmem:[%s1540_s2] ss:$0 sm:$0xff] }
  0x25   : > { %716 = vmatpush.bf16.msra.mxu2 %v1205_v19  ;;  %v965_v19 = vor.u32 %v1177_v15, %v964_v14 }
  0x26   : > { %745 = vmatpush.bf16.msra.mxu3 %v1213_v23 }
  0x28   : > { %1258 = vmatpush.bf16.msra.mxu1 %v1188_v20  ;;  %659 = vmatpush.bf16.msra.mxu0 %v1188_v20  ;;  %v997_v20 = vor.u32 %v1186_v17, %v996_v16 }
  0x29   : > { %717 = vmatpush.bf16.msra.mxu2 %v1204_v27  ;;  %v1182_v27 = vld [vmem:[%s1382_s9 + $0x70] sm:$0xf0] }
  0x2a   : > { %746 = vmatpush.bf16.msra.mxu3 %v1212_v34  ;;  %v990_v34 = vld [vmem:[%s1382_s9 + $0x8c] sm:$0xf0] }
  0x2b   : > { %670 = vmatmul.bf16.vlgmr.msra.gmra.mxu1 %v969_v31  ;;  %660 = vmatmul.bf16.vlgmr.msra.gmra.mxu0 %v929_v32  ;;  %v985_v31 = vor.u32 %v1182_v27, %v984_v26  ;;  %v1005_v32 = vor.u32 %v1187_v29, %v1004_v28 }
  0x2c   : > { %681 = vmatpush.bf16.msrb.mxu1 %v1203_v22  ;;  %768 = vmatpush.bf16.msrb.mxu0 %v1227_v30  ;;  %v998_v22 = vld [vmem:[%s1382_s9 + $0x94] sm:$0xf0] }
  0x2d   : > { %1259 = vmatpush.bf16.msrb.mxu2 %v1227_v30  ;;  %747 = vmatmul.bf16.vlgmr.msra.gmra.mxu3 %v941_v39  ;;  %v1001_v23 = vor.u32 %v1184_v21, %v998_v22  ;;  %v973_v30 = vor.u32 %v1178_v24, %v970_v25 }
  0x2e   : > { %718 = vmatmul.bf16.vlgmr.msra.gmra.mxu2 %v937_v33  ;;  %v1183_v33 = vld [vmem:[%s1382_s9 + $0x7c] sm:$0xf] }
  0x2f   : > { %v993_v35 = vor.u32 %v1183_v33, %v990_v34 }
  0x30   : > { %682 = vmatpush.bf16.msrb.mxu1 %v1202_v37  ;;  %769 = vmatpush.bf16.msrb.mxu0 %v1226_v38 }
  0x31   : > { %1260 = vmatpush.bf16.msrb.mxu2 %v1226_v38 }
  0x34   : > { %683 = vmatpush.bf16.msrb.mxu1 %v1201_v40  ;;  %770 = vmatpush.bf16.msrb.mxu0 %v1225_v41 }
  0x35   : > { %1261 = vmatpush.bf16.msrb.mxu2 %v1225_v41 }
  0x38   : > { %684 = vmatpush.bf16.msrb.mxu1 %v1200_v42  ;;  %771 = vmatpush.bf16.msrb.mxu0 %v1224_v43 }
  0x39   : > { %1262 = vmatpush.bf16.msrb.mxu2 %v1224_v43 }
  0x3b   : > { %675 = vmatmul.bf16.gmra.mxu1 %v989_v52  ;;  %665 = vmatmul.bf16.gmra.mxu0 %v949_v53 }
  0x3c   : > { %685 = vmatpush.bf16.msrb.mxu1 %v1199_v48  ;;  %772 = vmatpush.bf16.msrb.mxu0 %v1223_v51 }
  0x3d   : > { %1263 = vmatpush.bf16.msrb.mxu2 %v1223_v51  ;;  %752 = vmatmul.bf16.gmra.mxu3 %v961_v59 }
  0x3e   : > { %723 = vmatmul.bf16.gmra.mxu2 %v957_v54 }
  0x40   : > { %686 = vmatpush.bf16.msrb.mxu1 %v1198_v57  ;;  %773 = vmatpush.bf16.msrb.mxu0 %v1222_v58 }
  0x41   : > { %1264 = vmatpush.bf16.msrb.mxu2 %v1222_v58 }
  0x44   : > { %687 = vmatpush.bf16.msrb.mxu1 %v1197_v60  ;;  %774 = vmatpush.bf16.msrb.mxu0 %v1221_v61 }
  0x45   : > { %1265 = vmatpush.bf16.msrb.mxu2 %v1221_v61 }
  0x48   : > { %688 = vmatpush.bf16.msrb.mxu1 %v1196_v62  ;;  %775 = vmatpush.bf16.msrb.mxu0 %v1220_v63  ;;  %v1504_v62 = vld [vmem:[%s1541_s3] ss:$0 sm:$0xff] }
  0x49   : > { %1266 = vmatpush.bf16.msrb.mxu2 %v1220_v63 }
  0x4b   : > { %689 = vmatmul.bf16.vlgmr.msrb.gmra.mxu1 %v933_v6  ;;  %776 = vmatmul.bf16.vlgmr.msrb.gmra.mxu0 %v945_v7 }
  0x4d   : > { %757 = vmatmul.bf16.gmra.mxu3 %v981_v11 }
  0x4e   : > { %728 = vmatmul.bf16.gmra.mxu2 %v977_v8 }
  0x5b   : > { %694 = vmatmul.bf16.gmra.mxu1 %v953_v18  ;;  %781 = vmatmul.bf16.gmra.mxu0 %v965_v19 }
  0x5d   : > { %762 = vmatmul.bf16.gmra.mxu3 %v1001_v23 }
  0x5e   : > { %733 = vmatmul.bf16.gmra.mxu2 %v997_v20 }
  0x6b   : > { %699 = vmatmul.bf16.gmra.mxu1 %v973_v30  ;;  %786 = vmatmul.bf16.gmra.mxu0 %v985_v31 }
  0x6e   : > { %791 = vmatmul.bf16.vlgmr.msrb.gmra.mxu2 %v1005_v32 }
  0x7b   : > { %704 = vmatmul.bf16.gmra.mxu1 %v993_v35 }
  0xa8   : > { %v1487_v36 = vpop.f32.mrf.mxu1  ;;  %v661_v37 = vpop.f32.mrf.mxu0 }
  0xb0   : > { %v1489_v39 = vpop.f32.mrf.mxu1  ;;  %v663_v40 = vpop.f32.mrf.mxu0 }
  0xb1   : > { %v719_v38 = vpop.f32.mrf.mxu2  ;;  %v748_v44 = vpop.f32.mrf.mxu3 }
  0xb8   : > { %v1491_v42 = vpop.f32.mrf.mxu1  ;;  %v666_v43 = vpop.f32.mrf.mxu0 }
  0xb9   : > { %v721_v41 = vpop.f32.mrf.mxu2  ;;  %v750_v48 = vpop.f32.mrf.mxu3 }
  0xc0   : > { %v1493_v46 = vpop.f32.mrf.mxu1  ;;  %v668_v47 = vpop.f32.mrf.mxu0 }
  0xc1   : > { %v724_v45 = vpop.f32.mrf.mxu2  ;;  %v753_v60 = vpop.f32.mrf.mxu3 }
  0xc8   : > { %v690_v49 = vpop.f32.mrf.mxu1  ;;  %v777_v50 = vpop.f32.mrf.mxu0 }
  0xc9   : > { %v691_v51 = vadd.f32 %v690_v49, %v661_v37  ;;  %v726_v52 = vpop.f32.mrf.mxu2  ;;  %v755_v11 = vpop.f32.mrf.mxu3 }
  0xcb   : > { %v720_v53 = vadd.f32 %v719_v38, %v691_v51 }
  0xcd   : > { %v749_v54 = vadd.f32 %v748_v44, %v720_v53 }
  0xcf   : > { %v778_v55 = vadd.f32 %v777_v50, %v749_v54 }
  0xd0   : > { %v692_v57 = vpop.f32.mrf.mxu1  ;;  %v779_v58 = vpop.f32.mrf.mxu0 }
  0xd1   : > { %v693_v59 = vadd.f32 %v692_v57, %v663_v40  ;;  %v801_v61 = vmul.f32 %v1498_v56, %v778_v55  ;;  %v729_v0 = vpop.f32.mrf.mxu2  ;;  %v758_v25 = vpop.f32.mrf.mxu3 }
  0xd3   : > { %v722_v63 = vadd.f32 %v721_v41, %v693_v59  ;;  %v813_v2 = vadd.f32 %v1504_v62, %v801_v61 }
  0xd5   : > { %v751_v1 = vadd.f32 %v750_v48, %v722_v63  ;;  %v829_v8 = vmul.f32 0.2, %v813_v2  ;;  %vm821_vm0 = vcmp.gt.f32.partialorder %v813_v2, 0.0 }
  0xd7   : > { %v780_v3 = vadd.f32 %v779_v58, %v751_v1  ;;  %v837_v15 = vsel %vm821_vm0, %v813_v2, %v829_v8 }
  0xd8   : > { %v695_v4 = vpop.f32.mrf.mxu1  ;;  %v782_v5 = vpop.f32.mrf.mxu0 }
  0xd9   : > { %v802_v6 = vmul.f32 %v1498_v56, %v780_v3  ;;  %v696_v7 = vadd.f32 %v695_v4, %v666_v43  ;;  %v731_v14 = vpop.f32.mrf.mxu2 }
  0xdb   : > { %v814_v9 = vadd.f32 %v1504_v62, %v802_v6  ;;  %v725_v10 = vadd.f32 %v724_v45, %v696_v7  ;;  %v760_v45 = vpop.f32.mrf.mxu3 }
  0xdd   : > { %vm822_vm1 = vcmp.gt.f32.partialorder %v814_v9, 0.0  ;;  %v830_v12 = vmul.f32 0.2, %v814_v9  ;;  %v754_v13 = vadd.f32 %v753_v60, %v725_v10 }
  0xdf   : > { %v838_v16 = vsel %vm822_vm1, %v814_v9, %v830_v12  ;;  %v783_v17 = vadd.f32 %v782_v5, %v754_v13 }
  0xe0   : > { %v1231_v18 = vpack.c.bf16 %v838_v16, %v837_v15  ;;  %v697_v19 = vpop.f32.mrf.mxu1  ;;  %v784_v20 = vpop.f32.mrf.mxu0 }
  0xe1   : > { %v698_v21 = vadd.f32 %v697_v19, %v668_v47  ;;  %v803_v22 = vmul.f32 %v1498_v56, %v783_v17  ;;  %v734_v28 = vpop.f32.mrf.mxu2 }
  0xe2   : > { %1232 = vst [vmem:[%s1513_s12] sm:$0xff] %v1231_v18  }
  0xe3   : > { %v727_v23 = vadd.f32 %v726_v52, %v698_v21  ;;  %v815_v26 = vadd.f32 %v1504_v62, %v803_v22  ;;  %v763_v59 = vpop.f32.mrf.mxu3 }
  0xe5   : > { %v756_v24 = vadd.f32 %v755_v11, %v727_v23  ;;  %v831_v33 = vmul.f32 0.2, %v815_v26  ;;  %vm823_vm2 = vcmp.gt.f32.partialorder %v815_v26, 0.0 }
  0xe7   : > { %v785_v27 = vadd.f32 %v784_v20, %v756_v24  ;;  %v839_v40 = vsel %vm823_vm2, %v815_v26, %v831_v33 }
  0xe8   : > { %v700_v29 = vpop.f32.mrf.mxu1  ;;  %v787_v32 = vpop.f32.mrf.mxu0 }
  0xe9   : > { %v804_v30 = vmul.f32 %v1498_v56, %v785_v27  ;;  %v701_v31 = vadd.f32 %v700_v29, %v1487_v36  ;;  %v736_v36 = vpop.f32.mrf.mxu2 }
  0xeb   : > { %v816_v34 = vadd.f32 %v1504_v62, %v804_v30  ;;  %v730_v35 = vadd.f32 %v729_v0, %v701_v31  ;;  %v765_v9 = vpop.f32.mrf.mxu3 }
  0xed   : > { %vm824_vm3 = vcmp.gt.f32.partialorder %v816_v34, 0.0  ;;  %v832_v37 = vmul.f32 0.2, %v816_v34  ;;  %v759_v38 = vadd.f32 %v758_v25, %v730_v35 }
  0xef   : > { %v840_v41 = vsel %vm824_vm3, %v816_v34, %v832_v37  ;;  %v788_v43 = vadd.f32 %v787_v32, %v759_v38 }
  0xf0   : > { %v1236_v44 = vpack.c.bf16 %v840_v41, %v839_v40  ;;  %v702_v47 = vpop.f32.mrf.mxu1  ;;  %v789_v51 = vpop.f32.mrf.mxu0 }
  0xf1   : > { %v703_v48 = vadd.f32 %v702_v47, %v1489_v39  ;;  %v805_v49 = vmul.f32 %v1498_v56, %v788_v43  ;;  %v792_v63 = vpop.f32.mrf.mxu2 }
  0xf2   : > { %1248 = vst [vmem:[%s1513_s12 + $0x8] sm:$0xff] %v1236_v44  }
  0xf3   : > { %v732_v50 = vadd.f32 %v731_v14, %v703_v48  ;;  %v817_v53 = vadd.f32 %v1504_v62, %v805_v49 }
  0xf5   : > { %v761_v52 = vadd.f32 %v760_v45, %v732_v50  ;;  %v833_v60 = vmul.f32 0.2, %v817_v53  ;;  %vm825_vm4 = vcmp.gt.f32.partialorder %v817_v53, 0.0 }
  0xf7   : > { %v790_v54 = vadd.f32 %v789_v51, %v761_v52  ;;  %v841_v2 = vsel %vm825_vm4, %v817_v53, %v833_v60 }
  0xf8   : > { %v705_v55 = vpop.f32.mrf.mxu1 }
  0xf9   : > { %v806_v57 = vmul.f32 %v1498_v56, %v790_v54  ;;  %v706_v58 = vadd.f32 %v705_v55, %v1491_v42  ;;  %v794_v11 = vpop.f32.mrf.mxu2 }
  0xfb   : > { %v818_v39 = vadd.f32 %v1504_v62, %v806_v57  ;;  %v735_v61 = vadd.f32 %v734_v28, %v706_v58 }
  0xfd   : > { %vm826_vm5 = vcmp.gt.f32.partialorder %v818_v39, 0.0  ;;  %v834_v0 = vmul.f32 0.2, %v818_v39  ;;  %v764_v1 = vadd.f32 %v763_v59, %v735_v61 }
  0xff   : > { %v842_v3 = vsel %vm826_vm5, %v818_v39, %v834_v0  ;;  %v793_v4 = vadd.f32 %v792_v63, %v764_v1 }
 0x100   : > { %v1241_v5 = vpack.c.bf16 %v842_v3, %v841_v2  ;;  %v707_v6 = vpop.f32.mrf.mxu1 }
 0x101   : > { %v708_v7 = vadd.f32 %v707_v6, %v1493_v46  ;;  %v807_v42 = vmul.f32 %v1498_v56, %v793_v4 }
 0x102   : > { %1249 = vst [vmem:[%s1513_s12 + $0x10] sm:$0xff] %v1241_v5  }
 0x103   : > { %v737_v8 = vadd.f32 %v736_v36, %v708_v7  ;;  %v819_v12 = vadd.f32 %v1504_v62, %v807_v42 }
 0x105   : > { %v766_v10 = vadd.f32 %v765_v9, %v737_v8  ;;  %v835_v15 = vmul.f32 0.2, %v819_v12  ;;  %vm827_vm6 = vcmp.gt.f32.partialorder %v819_v12, 0.0 }
 0x107   : > { %v795_v13 = vadd.f32 %v794_v11, %v766_v10  ;;  %v843_v46 = vsel %vm827_vm6, %v819_v12, %v835_v15 }
 0x109   : > { %v808_v14 = vmul.f32 %v1498_v56, %v795_v13 }
 0x10b   : > { %v820_v16 = vadd.f32 %v1504_v62, %v808_v14 }
 0x10d   : > { %vm828_vm7 = vcmp.gt.f32.partialorder %v820_v16, 0.0  ;;  %v836_v17 = vmul.f32 0.2, %v820_v16 }
 0x10f   : > { %v844_v18 = vsel %vm828_vm7, %v820_v16, %v836_v17 }
 0x110   : > { %v1246_v19 = vpack.c.bf16 %v844_v18, %v843_v46 }
 0x112   : > { %1250 = vst [vmem:[%s1513_s12 + $0x18] sm:$0xff] %v1246_v19  }
 0x113 PF: > { %s14_s15 = sadd.s32 1, %s1284_s15  }
 0x114   : > { %p11_p4 = scmp.ge.s32.totalorder %s14_s15, 4  }
 0x116   :  { %13 = sbr.rel (!%p11_p4) target bundleno = 1 (0x1), region = 66 }

// kernel: discriminator_dc_forward.8
= control target key start
LH: loop header
LB: loop body
LE: loop exit
PB: predicated region body
PF: predicated region fallthrough
CT: control target
= control target key end

     0   :  { %s1248_s15 = smov 0   ;;  %s1445_s0 = inlined_call_operand.vmem [shape: bf16[64,768], index: 0, kind: input, shape index: {}]   ;;  %s1446_s1 = inlined_call_operand.vmem [shape: bf16[768,128], index: 1, kind: input, shape index: {}]   ;;  %s1447_s2 = inlined_call_operand.vmem [shape: f32[1,128], index: 2, kind: input, shape index: {}]   ;;  %s1448_s3 = inlined_call_operand.vmem [shape: f32[1,128], index: 3, kind: input, shape index: {}]   ;;  %s1449_s4 = inlined_call_operand.vmem [shape: bf16[64,128], index: 4, kind: output, shape index: {}]  }
   0x1 LB: > { %s866_s16 = sadd.s32 4294967295, %s1221_s15   ;;  %p870_p0 = scmp.ge.s32.totalorder %s1221_s15, 1  ;;  %s1221_s15 = sphi %s1248_s15, %s14_s15  }
   0x2   : > { %p164_p1 = scmp.lt.s32.totalorder %s1221_s15, 3 }
   0x4   : > { %p165_p2 = pnand %p870_p0, %p164_p1 }
   0x5   : > { %s871_s17 = sshll.u32 (!%p165_p2), %s866_s16, 2 }
   0x6   : > { %168 = sbr.rel (%p165_p2) target bundleno = 231 (0xe7), region = 36  ;;  %p192_p3 = scmp.lt.s32.totalorder (!%p165_p2), %s871_s17, 7 }
   0xb   : > { %v1136_v0 = vld [vmem:[%s1446_s1 + $0x38] sm:$0xff]  ;;  %v1135_v4 = vld [vmem:[%s1446_s1 + $0x30] sm:$0xff]  ;;  %v1134_v8 = vld [vmem:[%s1446_s1 + $0x28] sm:$0xff]  ;;  %s1451_s17 = smov (!%p192_p3, %s871_s17), 7 }
   0xc   : > { %v1144_v1 = vld [vmem:[%s1446_s1 + $0x78] sm:$0xff]  ;;  %660 = vmatpush.bf16.msra.mxu0 %v1136_v0  ;;  %v1143_v5 = vld [vmem:[%s1446_s1 + $0x70] sm:$0xff]  ;;  %v1142_v9 = vld [vmem:[%s1446_s1 + $0x68] sm:$0xff]  ;;  %s1204_s11 = smul.u32 24, %s1451_s17  ;;  %s874_s26 = sshll.u32 %s1451_s17, 2 }
   0xd   : > { %v1152_v2 = vld [vmem:[%s1446_s1 + $0xb8] sm:$0xff]  ;;  %679 = vmatpush.bf16.msra.mxu1 %v1144_v1  ;;  %v1151_v6 = vld [vmem:[%s1446_s1 + $0xb0] sm:$0xff]  ;;  %v1150_v10 = vld [vmem:[%s1446_s1 + $0xa8] sm:$0xff]  ;;  %s202_s29 = scalar_lea.vmem %s1449_s4, %s874_s26 }
   0xe   : > { %v1160_v3 = vld [vmem:[%s1446_s1 + $0xf8] sm:$0xff]  ;;  %698 = vmatpush.bf16.msra.mxu2 %v1152_v2  ;;  %v1159_v7 = vld [vmem:[%s1446_s1 + $0xf0] sm:$0xff]  ;;  %v1158_v11 = vld [vmem:[%s1446_s1 + $0xe8] sm:$0xff]  ;;  %s1340_s25 = scalar_lea.vmem %s1445_s0, %s1204_s11 }
   0xf   : > { %717 = vmatpush.bf16.msra.mxu3 %v1160_v3  ;;  %v1133_v12 = vld [vmem:[%s1446_s1 + $0x20] sm:$0xff]  ;;  %v1132_v16 = vld [vmem:[%s1446_s1 + $0x18] sm:$0xff]  ;;  %v1131_v20 = vld [vmem:[%s1446_s1 + $0x10] sm:$0xff] }
  0x10   : > { %661 = vmatpush.bf16.msra.mxu0 %v1135_v4  ;;  %v1141_v13 = vld [vmem:[%s1446_s1 + $0x60] sm:$0xff]  ;;  %v1140_v17 = vld [vmem:[%s1446_s1 + $0x58] sm:$0xff]  ;;  %v1139_v21 = vld [vmem:[%s1446_s1 + $0x50] sm:$0xff] }
  0x11   : > { %680 = vmatpush.bf16.msra.mxu1 %v1143_v5  ;;  %v1149_v14 = vld [vmem:[%s1446_s1 + $0xa0] sm:$0xff]  ;;  %v1148_v18 = vld [vmem:[%s1446_s1 + $0x98] sm:$0xff]  ;;  %v1147_v22 = vld [vmem:[%s1446_s1 + $0x90] sm:$0xff] }
  0x12   : > { %699 = vmatpush.bf16.msra.mxu2 %v1151_v6  ;;  %v1157_v15 = vld [vmem:[%s1446_s1 + $0xe0] sm:$0xff]  ;;  %v1156_v19 = vld [vmem:[%s1446_s1 + $0xd8] sm:$0xff]  ;;  %v1155_v23 = vld [vmem:[%s1446_s1 + $0xd0] sm:$0xff] }
  0x13   : > { %718 = vmatpush.bf16.msra.mxu3 %v1159_v7  ;;  %v1130_v24 = vld [vmem:[%s1446_s1 + $0x8] sm:$0xff]  ;;  %v1129_v28 = vld [vmem:[%s1446_s1] sm:$0xff]  ;;  %v1120_v33 = vld [vmem:[%s1340_s25 + $0x14] sm:$0xf0] }
  0x14   : > { %662 = vmatpush.bf16.msra.mxu0 %v1134_v8  ;;  %v1138_v25 = vld [vmem:[%s1446_s1 + $0x48] sm:$0xff]  ;;  %v1137_v29 = vld [vmem:[%s1446_s1 + $0x40] sm:$0xff]  ;;  %v879_v35 = vld [vmem:[%s1340_s25 + $0x18] sm:$0xf0] }
  0x15   : > { %681 = vmatpush.bf16.msra.mxu1 %v1142_v9  ;;  %v1146_v26 = vld [vmem:[%s1446_s1 + $0x88] sm:$0xff]  ;;  %v1145_v30 = vld [vmem:[%s1446_s1 + $0x80] sm:$0xff]  ;;  %v1168_v40 = vld [vmem:[%s1446_s1 + $0x138] sm:$0xff] }
  0x16   : > { %700 = vmatpush.bf16.msra.mxu2 %v1150_v10  ;;  %v1154_v27 = vld [vmem:[%s1446_s1 + $0xc8] sm:$0xff]  ;;  %v1153_v31 = vld [vmem:[%s1446_s1 + $0xc0] sm:$0xff]  ;;  %v1176_v45 = vld [vmem:[%s1446_s1 + $0x178] sm:$0xff] }
  0x17   : > { %719 = vmatpush.bf16.msra.mxu3 %v1158_v11  ;;  %v877_v32 = vld [vmem:[%s1340_s25] sm:$0xf]  ;;  %v1117_v34 = vld [vmem:[%s1340_s25 + $0x4] sm:$0xf]  ;;  %v885_v36 = vld [vmem:[%s1340_s25 + $0x8] sm:$0xf] }
  0x18   : > { %663 = vmatpush.bf16.msra.mxu0 %v1133_v12  ;;  %v1121_v37 = vld [vmem:[%s1340_s25 + $0x1c] sm:$0xf0]  ;;  %v1118_v38 = vld [vmem:[%s1340_s25 + $0xc] sm:$0xf]  ;;  %v887_v39 = vld [vmem:[%s1340_s25 + $0x20] sm:$0xf0]  ;;  %v878_v41 = vor.u32 %v1120_v33, %v877_v32  ;;  %v882_v42 = vor.u32 %v1117_v34, %v879_v35 }
  0x19   : > { %682 = vmatpush.bf16.msra.mxu1 %v1141_v13  ;;  %v886_v43 = vor.u32 %v1121_v37, %v885_v36  ;;  %v890_v44 = vor.u32 %v1118_v38, %v887_v39  ;;  %v1167_v46 = vld [vmem:[%s1446_s1 + $0x130] sm:$0xff]  ;;  %v1166_v48 = vld [vmem:[%s1446_s1 + $0x128] sm:$0xff]  ;;  %v1165_v50 = vld [vmem:[%s1446_s1 + $0x120] sm:$0xff] }
  0x1a   : > { %701 = vmatpush.bf16.msra.mxu2 %v1149_v14  ;;  %v1175_v47 = vld [vmem:[%s1446_s1 + $0x170] sm:$0xff]  ;;  %v1174_v49 = vld [vmem:[%s1446_s1 + $0x168] sm:$0xff]  ;;  %v1173_v51 = vld [vmem:[%s1446_s1 + $0x160] sm:$0xff] }
  0x1b   : > { %720 = vmatpush.bf16.msra.mxu3 %v1157_v15  ;;  %v901_v52 = vld [vmem:[%s1340_s25 + $0x30] sm:$0xf]  ;;  %v1126_v53 = vld [vmem:[%s1340_s25 + $0x44] sm:$0xf0]  ;;  %v1123_v54 = vld [vmem:[%s1340_s25 + $0x34] sm:$0xf] }
  0x1c   : > { %664 = vmatpush.bf16.msra.mxu0 %v1132_v16  ;;  %v903_v55 = vld [vmem:[%s1340_s25 + $0x48] sm:$0xf0]  ;;  %v909_v56 = vld [vmem:[%s1340_s25 + $0x38] sm:$0xf]  ;;  %v1127_v57 = vld [vmem:[%s1340_s25 + $0x4c] sm:$0xf0]  ;;  %v902_v61 = vor.u32 %v1126_v53, %v901_v52 }
  0x1d   : > { %683 = vmatpush.bf16.msra.mxu1 %v1140_v17  ;;  %v1124_v58 = vld [vmem:[%s1340_s25 + $0x3c] sm:$0xf]  ;;  %v911_v59 = vld [vmem:[%s1340_s25 + $0x50] sm:$0xf0]  ;;  %v906_v62 = vor.u32 %v1123_v54, %v903_v55  ;;  %v910_v63 = vor.u32 %v1127_v57, %v909_v56  ;;  %v1162_v4 = vld [vmem:[%s1446_s1 + $0x108] sm:$0xff] }
  0x1e   : > { %702 = vmatpush.bf16.msra.mxu2 %v1148_v18  ;;  %v1164_v60 = vld [vmem:[%s1446_s1 + $0x118] sm:$0xff]  ;;  %v914_v0 = vor.u32 %v1124_v58, %v911_v59  ;;  %v1163_v2 = vld [vmem:[%s1446_s1 + $0x110] sm:$0xff]  ;;  %v1170_v5 = vld [vmem:[%s1446_s1 + $0x148] sm:$0xff] }
  0x1f   : > { %721 = vmatpush.bf16.msra.mxu3 %v1156_v19  ;;  %v1172_v1 = vld [vmem:[%s1446_s1 + $0x158] sm:$0xff]  ;;  %v1171_v3 = vld [vmem:[%s1446_s1 + $0x150] sm:$0xff]  ;;  %v1161_v6 = vld [vmem:[%s1446_s1 + $0x100] sm:$0xff] }
  0x20   : > { %665 = vmatpush.bf16.msra.mxu0 %v1131_v20  ;;  %v1169_v7 = vld [vmem:[%s1446_s1 + $0x140] sm:$0xff]  ;;  %v893_v8 = vld [vmem:[%s1340_s25 + $0x10] sm:$0xf]  ;;  %v1122_v9 = vld [vmem:[%s1340_s25 + $0x24] sm:$0xf0] }
  0x21   : > { %684 = vmatpush.bf16.msra.mxu1 %v1139_v21  ;;  %v917_v10 = vld [vmem:[%s1340_s25 + $0x40] sm:$0xf]  ;;  %v1128_v11 = vld [vmem:[%s1340_s25 + $0x54] sm:$0xf0]  ;;  %v1119_v12 = vld [vmem:[%s1340_s25 + $0x14] sm:$0xf]  ;;  %v894_v16 = vor.u32 %v1122_v9, %v893_v8 }
  0x22   : > { %703 = vmatpush.bf16.msra.mxu2 %v1147_v22  ;;  %v895_v13 = vld [vmem:[%s1340_s25 + $0x28] sm:$0xf0]  ;;  %v1125_v14 = vld [vmem:[%s1340_s25 + $0x44] sm:$0xf]  ;;  %v919_v15 = vld [vmem:[%s1340_s25 + $0x58] sm:$0xf0]  ;;  %v918_v17 = vor.u32 %v1128_v11, %v917_v10 }
  0x23   : > { %722 = vmatpush.bf16.msra.mxu3 %v1155_v23  ;;  %v898_v18 = vor.u32 %v1119_v12, %v895_v13  ;;  %v922_v19 = vor.u32 %v1125_v14, %v919_v15 }
  0x24   : > { %666 = vmatpush.bf16.msra.mxu0 %v1130_v24 }
  0x25   : > { %685 = vmatpush.bf16.msra.mxu1 %v1138_v25 }
  0x26   : > { %704 = vmatpush.bf16.msra.mxu2 %v1146_v26 }
  0x27   : > { %723 = vmatpush.bf16.msra.mxu3 %v1154_v27 }
  0x28   : > { %667 = vmatpush.bf16.msra.mxu0 %v1129_v28 }
  0x29   : > { %686 = vmatpush.bf16.msra.mxu1 %v1137_v29 }
  0x2a   : > { %705 = vmatpush.bf16.msra.mxu2 %v1145_v30 }
  0x2b   : > { %724 = vmatpush.bf16.msra.mxu3 %v1153_v31  ;;  %668 = vmatmul.bf16.vlgmr.msra.gmra.mxu0 %v878_v41 }
  0x2c   : > { %736 = vmatpush.bf16.msrb.mxu0 %v1168_v40  ;;  %687 = vmatmul.bf16.vlgmr.msra.gmra.mxu1 %v882_v42 }
  0x2d   : > { %706 = vmatmul.bf16.vlgmr.msra.gmra.mxu2 %v886_v43  ;;  %755 = vmatpush.bf16.msrb.mxu1 %v1176_v45 }
  0x2e   : > { %1188 = vmatpush.bf16.msrb.mxu2 %v1168_v40  ;;  %725 = vmatmul.bf16.vlgmr.msra.gmra.mxu3 %v890_v44 }
  0x2f   : > { %1196 = vmatpush.bf16.msrb.mxu3 %v1176_v45 }
  0x30   : > { %737 = vmatpush.bf16.msrb.mxu0 %v1167_v46 }
  0x31   : > { %756 = vmatpush.bf16.msrb.mxu1 %v1175_v47 }
  0x32   : > { %1189 = vmatpush.bf16.msrb.mxu2 %v1167_v46 }
  0x33   : > { %1197 = vmatpush.bf16.msrb.mxu3 %v1175_v47  ;;  %v1213_v47 = vld [vmem:[%s1447_s2] ss:$0 sm:$0xff] }
  0x34   : > { %738 = vmatpush.bf16.msrb.mxu0 %v1166_v48 }
  0x35   : > { %757 = vmatpush.bf16.msrb.mxu1 %v1174_v49 }
  0x36   : > { %1190 = vmatpush.bf16.msrb.mxu2 %v1166_v48 }
  0x37   : > { %1198 = vmatpush.bf16.msrb.mxu3 %v1174_v49 }
  0x38   : > { %739 = vmatpush.bf16.msrb.mxu0 %v1165_v50 }
  0x39   : > { %758 = vmatpush.bf16.msrb.mxu1 %v1173_v51 }
  0x3a   : > { %1191 = vmatpush.bf16.msrb.mxu2 %v1165_v50 }
  0x3b   : > { %1199 = vmatpush.bf16.msrb.mxu3 %v1173_v51  ;;  %673 = vmatmul.bf16.gmra.mxu0 %v902_v61  ;;  %v1214_v51 = vld [vmem:[%s1448_s3] ss:$0 sm:$0xff] }
  0x3c   : > { %740 = vmatpush.bf16.msrb.mxu0 %v1164_v60  ;;  %692 = vmatmul.bf16.gmra.mxu1 %v906_v62 }
  0x3d   : > { %711 = vmatmul.bf16.gmra.mxu2 %v910_v63  ;;  %759 = vmatpush.bf16.msrb.mxu1 %v1172_v1 }
  0x3e   : > { %1192 = vmatpush.bf16.msrb.mxu2 %v1164_v60  ;;  %730 = vmatmul.bf16.gmra.mxu3 %v914_v0 }
  0x3f   : > { %1200 = vmatpush.bf16.msrb.mxu3 %v1172_v1 }
  0x40   : > { %741 = vmatpush.bf16.msrb.mxu0 %v1163_v2 }
  0x41   : > { %760 = vmatpush.bf16.msrb.mxu1 %v1171_v3 }
  0x42   : > { %1193 = vmatpush.bf16.msrb.mxu2 %v1163_v2 }
  0x43   : > { %1201 = vmatpush.bf16.msrb.mxu3 %v1171_v3 }
  0x44   : > { %742 = vmatpush.bf16.msrb.mxu0 %v1162_v4 }
  0x45   : > { %761 = vmatpush.bf16.msrb.mxu1 %v1170_v5 }
  0x46   : > { %1194 = vmatpush.bf16.msrb.mxu2 %v1162_v4 }
  0x47   : > { %1202 = vmatpush.bf16.msrb.mxu3 %v1170_v5 }
  0x48   : > { %743 = vmatpush.bf16.msrb.mxu0 %v1161_v6 }
  0x49   : > { %762 = vmatpush.bf16.msrb.mxu1 %v1169_v7 }
  0x4a   : > { %1195 = vmatpush.bf16.msrb.mxu2 %v1161_v6 }
  0x4b   : > { %1203 = vmatpush.bf16.msrb.mxu3 %v1169_v7  ;;  %744 = vmatmul.bf16.vlgmr.msrb.gmra.mxu0 %v894_v16 }
  0x4c   : > { %763 = vmatmul.bf16.vlgmr.msrb.gmra.mxu1 %v898_v18 }
  0x4d   : > { %749 = vmatmul.bf16.vlgmr.msrb.gmra.mxu2 %v918_v17 }
  0x4e   : > { %768 = vmatmul.bf16.vlgmr.msrb.gmra.mxu3 %v922_v19 }
  0xa8   : > { %v669_v20 = vpop.f32.mrf.mxu0 }
  0xa9   : > { %v688_v21 = vpop.f32.mrf.mxu1 }
  0xaa   : > { %v689_v30 = vadd.f32 %v688_v21, %v669_v20 }
  0xb0   : > { %v707_v22 = vpop.f32.mrf.mxu2  ;;  %v671_v24 = vpop.f32.mrf.mxu0 }
  0xb1   : > { %v726_v23 = vpop.f32.mrf.mxu3  ;;  %v690_v25 = vpop.f32.mrf.mxu1  ;;  %v708_v35 = vadd.f32 %v707_v22, %v689_v30 }
  0xb2   : > { %v691_v41 = vadd.f32 %v690_v25, %v671_v24 }
  0xb3   : > { %v727_v37 = vadd.f32 %v726_v23, %v708_v35 }
  0xb8   : > { %v709_v26 = vpop.f32.mrf.mxu2  ;;  %v674_v28 = vpop.f32.mrf.mxu0 }
  0xb9   : > { %v728_v27 = vpop.f32.mrf.mxu3  ;;  %v693_v29 = vpop.f32.mrf.mxu1  ;;  %v710_v45 = vadd.f32 %v709_v26, %v691_v41 }
  0xba   : > { %v694_v36 = vadd.f32 %v693_v29, %v674_v28 }
  0xbb   : > { %v729_v49 = vadd.f32 %v728_v27, %v710_v45 }
  0xc0   : > { %v712_v31 = vpop.f32.mrf.mxu2  ;;  %v676_v33 = vpop.f32.mrf.mxu0 }
  0xc1   : > { %v731_v32 = vpop.f32.mrf.mxu3  ;;  %v695_v34 = vpop.f32.mrf.mxu1  ;;  %v713_v44 = vadd.f32 %v712_v31, %v694_v36 }
  0xc2   : > { %v696_v53 = vadd.f32 %v695_v34, %v676_v33 }
  0xc3   : > { %v732_v48 = vadd.f32 %v731_v32, %v713_v44 }
  0xc8   : > { %v714_v38 = vpop.f32.mrf.mxu2  ;;  %v745_v40 = vpop.f32.mrf.mxu0 }
  0xc9   : > { %v733_v39 = vpop.f32.mrf.mxu3  ;;  %v746_v42 = vadd.f32 %v745_v40, %v727_v37  ;;  %v764_v43 = vpop.f32.mrf.mxu1  ;;  %v715_v58 = vadd.f32 %v714_v38, %v696_v53 }
  0xcb   : > { %v765_v46 = vadd.f32 %v764_v43, %v746_v42  ;;  %v734_v0 = vadd.f32 %v733_v39, %v715_v58 }
  0xcd   : > { %v778_v50 = vmul.f32 %v1213_v47, %v765_v46 }
  0xcf   : > { %v786_v61 = vadd.f32 %v1214_v51, %v778_v50 }
  0xd0   : > { %v750_v52 = vpop.f32.mrf.mxu2  ;;  %v747_v56 = vpop.f32.mrf.mxu0 }
  0xd1   : > { %v751_v54 = vadd.f32 %v750_v52, %v732_v48  ;;  %v769_v55 = vpop.f32.mrf.mxu3  ;;  %v748_v57 = vadd.f32 %v747_v56, %v729_v49  ;;  %v766_v60 = vpop.f32.mrf.mxu1  ;;  %v794_v2 = vmul.f32 0.2, %v786_v61  ;;  %vm790_vm0 = vcmp.gt.f32.partialorder %v786_v61, 0.0 }
  0xd3   : > { %v770_v59 = vadd.f32 %v769_v55, %v751_v54  ;;  %v767_v62 = vadd.f32 %v766_v60, %v748_v57  ;;  %v798_v10 = vsel %vm790_vm0, %v786_v61, %v794_v2 }
  0xd5   : > { %v779_v63 = vmul.f32 %v1213_v47, %v767_v62  ;;  %v780_v1 = vmul.f32 %v1213_v47, %v770_v59 }
  0xd7   : > { %v787_v3 = vadd.f32 %v1214_v51, %v779_v63  ;;  %v788_v8 = vadd.f32 %v1214_v51, %v780_v1 }
  0xd8   : > { %v752_v4 = vpop.f32.mrf.mxu2 }
  0xd9   : > { %v753_v5 = vadd.f32 %v752_v4, %v734_v0  ;;  %vm791_vm1 = vcmp.gt.f32.partialorder %v787_v3, 0.0  ;;  %v795_v6 = vmul.f32 0.2, %v787_v3  ;;  %v771_v7 = vpop.f32.mrf.mxu3  ;;  %v796_v14 = vmul.f32 0.2, %v788_v8 }
  0xda   : > { %vm792_vm2 = vcmp.gt.f32.partialorder %v788_v8, 0.0 }
  0xdb   : > { %v772_v9 = vadd.f32 %v771_v7, %v753_v5  ;;  %v799_v11 = vsel %vm791_vm1, %v787_v3, %v795_v6  ;;  %v800_v17 = vsel %vm792_vm2, %v788_v8, %v796_v14 }
  0xdc   : > { %v1180_v12 = vpack.c.bf16 %v799_v11, %v798_v10 }
  0xdd   : > { %v781_v13 = vmul.f32 %v1213_v47, %v772_v9 }
  0xde   : > { %1181 = vst [vmem:[%s202_s29] sm:$0xff] %v1180_v12  }
  0xdf   : > { %v789_v15 = vadd.f32 %v1214_v51, %v781_v13 }
  0xe1   : > { %vm793_vm3 = vcmp.gt.f32.partialorder %v789_v15, 0.0  ;;  %v797_v16 = vmul.f32 0.2, %v789_v15 }
  0xe3   : > { %v801_v18 = vsel %vm793_vm3, %v789_v15, %v797_v16 }
  0xe4   : > { %v1185_v19 = vpack.c.bf16 %v801_v18, %v800_v17 }
  0xe6   : > { %1187 = vst [vmem:[%s202_s29 + $0x8] sm:$0xff] %v1185_v19  }
  0xe7 PF: > { %s14_s15 = sadd.s32 1, %s1221_s15  }
  0xe8   : > { %p11_p4 = scmp.ge.s32.totalorder %s14_s15, 4  }
  0xea   :  { %13 = sbr.rel (!%p11_p4) target bundleno = 1 (0x1), region = 66 }

// kernel: discriminator_dc_forward.9
= control target key start
LH: loop header
LB: loop body
LE: loop exit
PB: predicated region body
PF: predicated region fallthrough
CT: control target
= control target key end

     0   :  { %vm824_vm4 = vcmask 261120   ;;  %vm872_vm8 = vcmask 7168   ;;  %s1640_s1 = inlined_call_operand.vmem [shape: bf16[1024,128], index: 1, kind: input, shape index: {}]   ;;  %s1641_s0 = inlined_call_operand.vmem [shape: bf16[32,1024], index: 0, kind: input, shape index: {}]   ;;  %s1642_s2 = inlined_call_operand.vmem [shape: f32[1,128], index: 2, kind: input, shape index: {}]   ;;  %s1643_s3 = inlined_call_operand.vmem [shape: f32[1,128], index: 3, kind: input, shape index: {}]   ;;  %s1644_s4 = inlined_call_operand.vmem [shape: f32[32,128], index: 4, kind: input, shape index: {}]   ;;  %s1645_s5 = inlined_call_operand.vmem [shape: f32[8,32], index: 5, kind: input, shape index: {}]   ;;  %s1646_s6 = inlined_call_operand.<no memory space> [shape: f32[1], index: 6, kind: input, shape index: {}]   ;;  %s1647_s7 = inlined_call_operand.vmem [shape: f32[8,1], index: 7, kind: output, shape index: {}]  }
   0x1   :  { %v1222_v0 = vld [vmem:[%s1640_s1 + $0x38] sm:$0xff]  ;;  %v1221_v4 = vld [vmem:[%s1640_s1 + $0x30] sm:$0xff]  ;;  %v1220_v8 = vld [vmem:[%s1640_s1 + $0x28] sm:$0xff] }
   0x2   :  { %v1230_v1 = vld [vmem:[%s1640_s1 + $0x78] sm:$0xff]  ;;  %635 = vmatpush.bf16.msra.mxu0 %v1222_v0  ;;  %v1229_v5 = vld [vmem:[%s1640_s1 + $0x70] sm:$0xff]  ;;  %v1228_v9 = vld [vmem:[%s1640_s1 + $0x68] sm:$0xff] }
   0x3   :  { %v1238_v2 = vld [vmem:[%s1640_s1 + $0xb8] sm:$0xff]  ;;  %654 = vmatpush.bf16.msra.mxu1 %v1230_v1  ;;  %v1237_v6 = vld [vmem:[%s1640_s1 + $0xb0] sm:$0xff]  ;;  %v1236_v10 = vld [vmem:[%s1640_s1 + $0xa8] sm:$0xff] }
   0x4   :  { %v1246_v3 = vld [vmem:[%s1640_s1 + $0xf8] sm:$0xff]  ;;  %673 = vmatpush.bf16.msra.mxu2 %v1238_v2  ;;  %v1245_v7 = vld [vmem:[%s1640_s1 + $0xf0] sm:$0xff]  ;;  %v1244_v11 = vld [vmem:[%s1640_s1 + $0xe8] sm:$0xff] }
   0x5   :  { %692 = vmatpush.bf16.msra.mxu3 %v1246_v3  ;;  %v1219_v12 = vld [vmem:[%s1640_s1 + $0x20] sm:$0xff]  ;;  %v1218_v16 = vld [vmem:[%s1640_s1 + $0x18] sm:$0xff]  ;;  %v1217_v20 = vld [vmem:[%s1640_s1 + $0x10] sm:$0xff] }
   0x6   :  { %636 = vmatpush.bf16.msra.mxu0 %v1221_v4  ;;  %v1227_v13 = vld [vmem:[%s1640_s1 + $0x60] sm:$0xff]  ;;  %v1226_v17 = vld [vmem:[%s1640_s1 + $0x58] sm:$0xff]  ;;  %v1225_v21 = vld [vmem:[%s1640_s1 + $0x50] sm:$0xff] }
   0x7   :  { %655 = vmatpush.bf16.msra.mxu1 %v1229_v5  ;;  %v1235_v14 = vld [vmem:[%s1640_s1 + $0xa0] sm:$0xff]  ;;  %v1234_v18 = vld [vmem:[%s1640_s1 + $0x98] sm:$0xff]  ;;  %v1233_v22 = vld [vmem:[%s1640_s1 + $0x90] sm:$0xff] }
   0x8   :  { %674 = vmatpush.bf16.msra.mxu2 %v1237_v6  ;;  %v1243_v15 = vld [vmem:[%s1640_s1 + $0xe0] sm:$0xff]  ;;  %v1242_v19 = vld [vmem:[%s1640_s1 + $0xd8] sm:$0xff]  ;;  %v1241_v23 = vld [vmem:[%s1640_s1 + $0xd0] sm:$0xff] }
   0x9   :  { %693 = vmatpush.bf16.msra.mxu3 %v1245_v7  ;;  %v1216_v24 = vld [vmem:[%s1640_s1 + $0x8] sm:$0xff]  ;;  %v1215_v28 = vld [vmem:[%s1640_s1] sm:$0xff]  ;;  %v1254_v40 = vld [vmem:[%s1640_s1 + $0x138] sm:$0xff] }
   0xa   :  { %637 = vmatpush.bf16.msra.mxu0 %v1220_v8  ;;  %v1224_v25 = vld [vmem:[%s1640_s1 + $0x48] sm:$0xff]  ;;  %v1223_v29 = vld [vmem:[%s1640_s1 + $0x40] sm:$0xff]  ;;  %v1262_v41 = vld [vmem:[%s1640_s1 + $0x178] sm:$0xff] }
   0xb   :  { %656 = vmatpush.bf16.msra.mxu1 %v1228_v9  ;;  %v1232_v26 = vld [vmem:[%s1640_s1 + $0x88] sm:$0xff]  ;;  %v1231_v30 = vld [vmem:[%s1640_s1 + $0x80] sm:$0xff]  ;;  %v1270_v46 = vld [vmem:[%s1640_s1 + $0x1b8] sm:$0xff] }
   0xc   :  { %675 = vmatpush.bf16.msra.mxu2 %v1236_v10  ;;  %v1240_v27 = vld [vmem:[%s1640_s1 + $0xc8] sm:$0xff]  ;;  %v1239_v31 = vld [vmem:[%s1640_s1 + $0xc0] sm:$0xff]  ;;  %v1278_v47 = vld [vmem:[%s1640_s1 + $0x1f8] sm:$0xff] }
   0xd   :  { %694 = vmatpush.bf16.msra.mxu3 %v1244_v11  ;;  %v880_v32 = vld [vmem:[%s1641_s0] sm:$0xf]  ;;  %v1199_v34 = vld [vmem:[%s1641_s0 + $0x4] sm:$0xf]  ;;  %v888_v36 = vld [vmem:[%s1641_s0 + $0x8] sm:$0xf] }
   0xe   :  { %638 = vmatpush.bf16.msra.mxu0 %v1219_v12  ;;  %v1203_v33 = vld [vmem:[%s1641_s0 + $0x1c] sm:$0xf0]  ;;  %v882_v35 = vld [vmem:[%s1641_s0 + $0x20] sm:$0xf0]  ;;  %v1204_v37 = vld [vmem:[%s1641_s0 + $0x24] sm:$0xf0] }
   0xf   :  { %657 = vmatpush.bf16.msra.mxu1 %v1227_v13  ;;  %v1200_v38 = vld [vmem:[%s1641_s0 + $0xc] sm:$0xf]  ;;  %v881_v42 = vor.u32 %v1203_v33, %v880_v32  ;;  %v885_v43 = vor.u32 %v1199_v34, %v882_v35  ;;  %v889_v44 = vor.u32 %v1204_v37, %v888_v36  ;;  %v1253_v48 = vld [vmem:[%s1640_s1 + $0x130] sm:$0xff]  ;;  %v1251_v56 = vld [vmem:[%s1640_s1 + $0x120] sm:$0xff] }
  0x10   :  { %676 = vmatpush.bf16.msra.mxu2 %v1235_v14  ;;  %v890_v39 = vld [vmem:[%s1641_s0 + $0x28] sm:$0xf0]  ;;  %v1261_v49 = vld [vmem:[%s1640_s1 + $0x170] sm:$0xff]  ;;  %v1259_v57 = vld [vmem:[%s1640_s1 + $0x160] sm:$0xff] }
  0x11   :  { %695 = vmatpush.bf16.msra.mxu3 %v1243_v15  ;;  %v893_v45 = vor.u32 %v1200_v38, %v890_v39  ;;  %v1269_v50 = vld [vmem:[%s1640_s1 + $0x1b0] sm:$0xff]  ;;  %v1252_v52 = vld [vmem:[%s1640_s1 + $0x128] sm:$0xff]  ;;  %v1267_v58 = vld [vmem:[%s1640_s1 + $0x1a0] sm:$0xff] }
  0x12   :  { %639 = vmatpush.bf16.msra.mxu0 %v1218_v16  ;;  %v1277_v51 = vld [vmem:[%s1640_s1 + $0x1f0] sm:$0xff]  ;;  %v1260_v53 = vld [vmem:[%s1640_s1 + $0x168] sm:$0xff]  ;;  %v1275_v59 = vld [vmem:[%s1640_s1 + $0x1e0] sm:$0xff] }
  0x13   :  { %658 = vmatpush.bf16.msra.mxu1 %v1226_v17  ;;  %v1268_v54 = vld [vmem:[%s1640_s1 + $0x1a8] sm:$0xff]  ;;  %v912_v60 = vld [vmem:[%s1641_s0 + $0x40] sm:$0xf]  ;;  %v1207_v62 = vld [vmem:[%s1641_s0 + $0x44] sm:$0xf] }
  0x14   :  { %677 = vmatpush.bf16.msra.mxu2 %v1234_v18  ;;  %v1276_v55 = vld [vmem:[%s1640_s1 + $0x1e8] sm:$0xff]  ;;  %v1211_v61 = vld [vmem:[%s1641_s0 + $0x5c] sm:$0xf0]  ;;  %v914_v63 = vld [vmem:[%s1641_s0 + $0x60] sm:$0xf0] }
  0x15   :  { %696 = vmatpush.bf16.msra.mxu3 %v1242_v19  ;;  %v920_v0 = vld [vmem:[%s1641_s0 + $0x48] sm:$0xf]  ;;  %v1208_v2 = vld [vmem:[%s1641_s0 + $0x4c] sm:$0xf]  ;;  %v1250_v4 = vld [vmem:[%s1640_s1 + $0x118] sm:$0xff]  ;;  %v913_v6 = vor.u32 %v1211_v61, %v912_v60  ;;  %v917_v7 = vor.u32 %v1207_v62, %v914_v63 }
  0x16   :  { %640 = vmatpush.bf16.msra.mxu0 %v1217_v20  ;;  %v1212_v1 = vld [vmem:[%s1641_s0 + $0x64] sm:$0xf0]  ;;  %v922_v3 = vld [vmem:[%s1641_s0 + $0x68] sm:$0xf0]  ;;  %v1258_v5 = vld [vmem:[%s1640_s1 + $0x158] sm:$0xff] }
  0x17   :  { %659 = vmatpush.bf16.msra.mxu1 %v1225_v21  ;;  %v921_v8 = vor.u32 %v1212_v1, %v920_v0  ;;  %v925_v9 = vor.u32 %v1208_v2, %v922_v3  ;;  %v1266_v10 = vld [vmem:[%s1640_s1 + $0x198] sm:$0xff]  ;;  %v1249_v12 = vld [vmem:[%s1640_s1 + $0x110] sm:$0xff]  ;;  %v1248_v16 = vld [vmem:[%s1640_s1 + $0x108] sm:$0xff] }
  0x18   :  { %678 = vmatpush.bf16.msra.mxu2 %v1233_v22  ;;  %v1274_v11 = vld [vmem:[%s1640_s1 + $0x1d8] sm:$0xff]  ;;  %v1257_v13 = vld [vmem:[%s1640_s1 + $0x150] sm:$0xff]  ;;  %v1256_v17 = vld [vmem:[%s1640_s1 + $0x148] sm:$0xff] }
  0x19   :  { %697 = vmatpush.bf16.msra.mxu3 %v1241_v23  ;;  %v1265_v14 = vld [vmem:[%s1640_s1 + $0x190] sm:$0xff]  ;;  %v1264_v18 = vld [vmem:[%s1640_s1 + $0x188] sm:$0xff]  ;;  %v1247_v20 = vld [vmem:[%s1640_s1 + $0x100] sm:$0xff] }
  0x1a   :  { %641 = vmatpush.bf16.msra.mxu0 %v1216_v24  ;;  %v1273_v15 = vld [vmem:[%s1640_s1 + $0x1d0] sm:$0xff]  ;;  %v1272_v19 = vld [vmem:[%s1640_s1 + $0x1c8] sm:$0xff]  ;;  %v1255_v21 = vld [vmem:[%s1640_s1 + $0x140] sm:$0xff] }
  0x1b   :  { %660 = vmatpush.bf16.msra.mxu1 %v1224_v25  ;;  %v1263_v22 = vld [vmem:[%s1640_s1 + $0x180] sm:$0xff]  ;;  %v896_v24 = vld [vmem:[%s1641_s0 + $0x10] sm:$0xf]  ;;  %v1209_v38 = vld [vmem:[%s1641_s0 + $0x54] sm:$0xf] }
  0x1c   :  { %679 = vmatpush.bf16.msra.mxu2 %v1232_v26  ;;  %v1271_v23 = vld [vmem:[%s1640_s1 + $0x1c0] sm:$0xff]  ;;  %v1205_v25 = vld [vmem:[%s1641_s0 + $0x2c] sm:$0xf0]  ;;  %v1201_v26 = vld [vmem:[%s1641_s0 + $0x14] sm:$0xf] }
  0x1d   :  { %698 = vmatpush.bf16.msra.mxu3 %v1240_v27  ;;  %v898_v27 = vld [vmem:[%s1641_s0 + $0x30] sm:$0xf0]  ;;  %v897_v32 = vor.u32 %v1205_v25, %v896_v24  ;;  %v928_v36 = vld [vmem:[%s1641_s0 + $0x50] sm:$0xf] }
  0x1e   :  { %642 = vmatpush.bf16.msra.mxu0 %v1215_v28  ;;  %v904_v28 = vld [vmem:[%s1641_s0 + $0x18] sm:$0xf]  ;;  %v901_v33 = vor.u32 %v1201_v26, %v898_v27  ;;  %v1213_v37 = vld [vmem:[%s1641_s0 + $0x6c] sm:$0xf0]  ;;  %v930_v39 = vld [vmem:[%s1641_s0 + $0x70] sm:$0xf0] }
  0x1f   :  { %661 = vmatpush.bf16.msra.mxu1 %v1223_v29  ;;  %v1206_v29 = vld [vmem:[%s1641_s0 + $0x34] sm:$0xf0] }
  0x20   :  { %680 = vmatpush.bf16.msra.mxu2 %v1231_v30  ;;  %v1202_v30 = vld [vmem:[%s1641_s0 + $0x1c] sm:$0xf]  ;;  %v905_v34 = vor.u32 %v1206_v29, %v904_v28 }
  0x21   :  { %699 = vmatpush.bf16.msra.mxu3 %v1239_v31  ;;  %643 = vmatmul.bf16.vlgmr.msra.gmra.mxu0 %v881_v42  ;;  %v906_v31 = vld [vmem:[%s1641_s0 + $0x38] sm:$0xf0] }
  0x22   :  { %711 = vmatpush.bf16.msrb.mxu0 %v1254_v40  ;;  %662 = vmatmul.bf16.vlgmr.msra.gmra.mxu1 %v885_v43  ;;  %v909_v35 = vor.u32 %v1202_v30, %v906_v31  ;;  %v936_v40 = vld [vmem:[%s1641_s0 + $0x58] sm:$0xf]  ;;  %v1210_v42 = vld [vmem:[%s1641_s0 + $0x5c] sm:$0xf] }
  0x23   :  { %730 = vmatpush.bf16.msrb.mxu1 %v1262_v41  ;;  %681 = vmatmul.bf16.vlgmr.msra.gmra.mxu2 %v889_v44  ;;  %v1214_v41 = vld [vmem:[%s1641_s0 + $0x74] sm:$0xf0]  ;;  %v938_v43 = vld [vmem:[%s1641_s0 + $0x78] sm:$0xf0]  ;;  %v929_v44 = vor.u32 %v1213_v37, %v928_v36  ;;  %v1279_v36 = vld [vmem:[%s1642_s2] ss:$0 sm:$0xff] }
  0x24   :  { %700 = vmatmul.bf16.vlgmr.msra.gmra.mxu3 %v893_v45  ;;  %749 = vmatpush.bf16.msrb.mxu2 %v1270_v46  ;;  %v933_v45 = vor.u32 %v1209_v38, %v930_v39  ;;  %v937_v46 = vor.u32 %v1214_v41, %v936_v40 }
  0x25   :  { %768 = vmatpush.bf16.msrb.mxu3 %v1278_v47  ;;  %v941_v47 = vor.u32 %v1210_v42, %v938_v43  ;;  %v1280_v43 = vld [vmem:[%s1643_s3] ss:$0 sm:$0xff] }
  0x26   :  { %712 = vmatpush.bf16.msrb.mxu0 %v1253_v48 }
  0x27   :  { %731 = vmatpush.bf16.msrb.mxu1 %v1261_v49 }
  0x28   :  { %750 = vmatpush.bf16.msrb.mxu2 %v1269_v50 }
  0x29   :  { %769 = vmatpush.bf16.msrb.mxu3 %v1277_v51 }
  0x2a   :  { %713 = vmatpush.bf16.msrb.mxu0 %v1252_v52 }
  0x2b   :  { %732 = vmatpush.bf16.msrb.mxu1 %v1260_v53 }
  0x2c   :  { %751 = vmatpush.bf16.msrb.mxu2 %v1268_v54 }
  0x2d   :  { %770 = vmatpush.bf16.msrb.mxu3 %v1276_v55 }
  0x2e   :  { %714 = vmatpush.bf16.msrb.mxu0 %v1251_v56 }
  0x2f   :  { %733 = vmatpush.bf16.msrb.mxu1 %v1259_v57 }
  0x30   :  { %752 = vmatpush.bf16.msrb.mxu2 %v1267_v58 }
  0x31   :  { %771 = vmatpush.bf16.msrb.mxu3 %v1275_v59  ;;  %648 = vmatmul.bf16.gmra.mxu0 %v913_v6 }
  0x32   :  { %715 = vmatpush.bf16.msrb.mxu0 %v1250_v4  ;;  %667 = vmatmul.bf16.gmra.mxu1 %v917_v7 }
  0x33   :  { %734 = vmatpush.bf16.msrb.mxu1 %v1258_v5  ;;  %686 = vmatmul.bf16.gmra.mxu2 %v921_v8 }
  0x34   :  { %705 = vmatmul.bf16.gmra.mxu3 %v925_v9  ;;  %753 = vmatpush.bf16.msrb.mxu2 %v1266_v10 }
  0x35   :  { %772 = vmatpush.bf16.msrb.mxu3 %v1274_v11 }
  0x36   :  { %716 = vmatpush.bf16.msrb.mxu0 %v1249_v12 }
  0x37   :  { %735 = vmatpush.bf16.msrb.mxu1 %v1257_v13 }
  0x38   :  { %754 = vmatpush.bf16.msrb.mxu2 %v1265_v14 }
  0x39   :  { %773 = vmatpush.bf16.msrb.mxu3 %v1273_v15 }
  0x3a   :  { %717 = vmatpush.bf16.msrb.mxu0 %v1248_v16 }
  0x3b   :  { %736 = vmatpush.bf16.msrb.mxu1 %v1256_v17 }
  0x3c   :  { %755 = vmatpush.bf16.msrb.mxu2 %v1264_v18 }
  0x3d   :  { %774 = vmatpush.bf16.msrb.mxu3 %v1272_v19 }
  0x3e   :  { %718 = vmatpush.bf16.msrb.mxu0 %v1247_v20 }
  0x3f   :  { %737 = vmatpush.bf16.msrb.mxu1 %v1255_v21 }
  0x40   :  { %756 = vmatpush.bf16.msrb.mxu2 %v1263_v22 }
  0x41   :  { %775 = vmatpush.bf16.msrb.mxu3 %v1271_v23  ;;  %719 = vmatmul.bf16.vlgmr.msrb.gmra.mxu0 %v897_v32 }
  0x42   :  { %738 = vmatmul.bf16.vlgmr.msrb.gmra.mxu1 %v901_v33 }
  0x43   :  { %757 = vmatmul.bf16.vlgmr.msrb.gmra.mxu2 %v905_v34 }
  0x44   :  { %776 = vmatmul.bf16.vlgmr.msrb.gmra.mxu3 %v909_v35 }
  0x51   :  { %724 = vmatmul.bf16.gmra.mxu0 %v929_v44 }
  0x52   :  { %743 = vmatmul.bf16.gmra.mxu1 %v933_v45 }
  0x53   :  { %762 = vmatmul.bf16.gmra.mxu2 %v937_v46 }
  0x54   :  { %781 = vmatmul.bf16.gmra.mxu3 %v941_v47 }
  0x9e   :  { %v644_v48 = vpop.f32.mrf.mxu0 }
  0x9f   :  { %v663_v49 = vpop.f32.mrf.mxu1 }
  0xa0   :  { %v664_v8 = vadd.f32 %v663_v49, %v644_v48 }
  0xa6   :  { %v682_v50 = vpop.f32.mrf.mxu2  ;;  %v646_v52 = vpop.f32.mrf.mxu0 }
  0xa7   :  { %v701_v51 = vpop.f32.mrf.mxu3  ;;  %v665_v53 = vpop.f32.mrf.mxu1  ;;  %v683_v11 = vadd.f32 %v682_v50, %v664_v8  ;;  %v851_v8 = vstv %s1646_s6 }
  0xa8   :  { %v666_v6 = vadd.f32 %v665_v53, %v646_v52 }
  0xa9   :  { %v702_v17 = vadd.f32 %v701_v51, %v683_v11 }
  0xae   :  { %v684_v54 = vpop.f32.mrf.mxu2  ;;  %v649_v56 = vpop.f32.mrf.mxu0 }
  0xaf   :  { %v703_v55 = vpop.f32.mrf.mxu3  ;;  %v668_v57 = vpop.f32.mrf.mxu1  ;;  %v685_v9 = vadd.f32 %v684_v54, %v666_v6  ;;  %v823_v6 = vld [vmem:[%s1645_s5] sm:$0xff] }
  0xb0   :  { %v669_v7 = vadd.f32 %v668_v57, %v649_v56  ;;  %v818_v57 = vld [vmem:[%s1644_s4 + $0x18] sm:$0xff] }
  0xb1   :  { %v704_v14 = vadd.f32 %v703_v55, %v685_v9 }
  0xb6   :  { %v687_v58 = vpop.f32.mrf.mxu2  ;;  %v651_v60 = vpop.f32.mrf.mxu0 }
  0xb7   :  { %v706_v59 = vpop.f32.mrf.mxu3  ;;  %v670_v61 = vpop.f32.mrf.mxu1  ;;  %v688_v10 = vadd.f32 %v687_v58, %v669_v7 }
  0xb8   :  { %v671_v18 = vadd.f32 %v670_v61, %v651_v60  ;;  %v817_v61 = vld [vmem:[%s1644_s4 + $0x10] sm:$0xff] }
  0xb9   :  { %v707_v15 = vadd.f32 %v706_v59, %v688_v10 }
  0xbe   :  { %v689_v62 = vpop.f32.mrf.mxu2  ;;  %v720_v0 = vpop.f32.mrf.mxu0 }
  0xbf   :  { %v708_v63 = vpop.f32.mrf.mxu3  ;;  %v739_v1 = vpop.f32.mrf.mxu1  ;;  %v690_v22 = vadd.f32 %v689_v62, %v671_v18  ;;  %v721_v23 = vadd.f32 %v720_v0, %v702_v17  ;;  %v816_v0 = vld [vmem:[%s1644_s4 + $0x8] sm:$0xff] }
  0xc1   :  { %v709_v28 = vadd.f32 %v708_v63, %v690_v22  ;;  %v740_v29 = vadd.f32 %v739_v1, %v721_v23 }
  0xc6   :  { %v758_v2 = vpop.f32.mrf.mxu2  ;;  %v722_v4 = vpop.f32.mrf.mxu0 }
  0xc7   :  { %v777_v3 = vpop.f32.mrf.mxu3  ;;  %v741_v5 = vpop.f32.mrf.mxu1  ;;  %v723_v19 = vadd.f32 %v722_v4, %v704_v14  ;;  %v759_v33 = vadd.f32 %v758_v2, %v740_v29 }
  0xc9   :  { %v742_v24 = vadd.f32 %v741_v5, %v723_v19  ;;  %v778_v39 = vadd.f32 %v777_v3, %v759_v33  ;;  %v815_v3 = vld [vmem:[%s1644_s4] sm:$0xff] }
  0xcb   :  { %v791_v47 = vmul.f32 %v1279_v36, %v778_v39 }
  0xcd   :  { %v799_v52 = vadd.f32 %v1280_v43, %v791_v47 }
  0xce   :  { %v760_v12 = vpop.f32.mrf.mxu2  ;;  %v725_v16 = vpop.f32.mrf.mxu0 }
  0xcf   :  { %v779_v13 = vpop.f32.mrf.mxu3  ;;  %v726_v20 = vadd.f32 %v725_v16, %v707_v15  ;;  %v744_v21 = vpop.f32.mrf.mxu1  ;;  %v761_v30 = vadd.f32 %v760_v12, %v742_v24  ;;  %v807_v58 = vmul.f32 0.2, %v799_v52  ;;  %vm803_vm3 = vcmp.gt.f32.partialorder %v799_v52, 0.0 }
  0xd1   :  { %v745_v25 = vadd.f32 %v744_v21, %v726_v20  ;;  %v780_v37 = vadd.f32 %v779_v13, %v761_v30  ;;  %v811_v2 = vsel %vm803_vm3, %v799_v52, %v807_v58 }
  0xd2   :  { %v819_v5 = vmul.f32 %v815_v3, %v811_v2 }
  0xd3   :  { %v792_v44 = vmul.f32 %v1279_v36, %v780_v37 }
  0xd5   :  { %v800_v50 = vadd.f32 %v1280_v43, %v792_v44 }
  0xd6   :  { %v763_v26 = vpop.f32.mrf.mxu2  ;;  %v727_v32 = vpop.f32.mrf.mxu0 }
  0xd7   :  { %v782_v27 = vpop.f32.mrf.mxu3  ;;  %v764_v31 = vadd.f32 %v763_v26, %v745_v25  ;;  %v728_v35 = vadd.f32 %v727_v32, %v709_v28  ;;  %v746_v38 = vpop.f32.mrf.mxu1  ;;  %v808_v55 = vmul.f32 0.2, %v800_v50  ;;  %vm804_vm2 = vcmp.gt.f32.partialorder %v800_v50, 0.0 }
  0xd9   :  { %v783_v34 = vadd.f32 %v782_v27, %v764_v31  ;;  %v747_v41 = vadd.f32 %v746_v38, %v728_v35  ;;  %v812_v63 = vsel %vm804_vm2, %v800_v50, %v808_v55 }
  0xda   :  { %v820_v4 = vmul.f32 %v816_v0, %v812_v63 }
  0xdb   :  { %v793_v40 = vmul.f32 %v1279_v36, %v783_v34 }
  0xdd   :  { %v801_v48 = vadd.f32 %v1280_v43, %v793_v40 }
  0xde   :  { %v765_v42 = vpop.f32.mrf.mxu2 }
  0xdf   :  { %v766_v45 = vadd.f32 %v765_v42, %v747_v41  ;;  %v784_v46 = vpop.f32.mrf.mxu3  ;;  %v809_v53 = vmul.f32 0.2, %v801_v48  ;;  %vm805_vm0 = vcmp.gt.f32.partialorder %v801_v48, 0.0 }
  0xe1   :  { %v785_v49 = vadd.f32 %v784_v46, %v766_v45  ;;  %v813_v60 = vsel %vm805_vm0, %v801_v48, %v809_v53 }
  0xe2   :  { %v821_v1 = vmul.f32 %v817_v61, %v813_v60 }
  0xe3   :  { %v794_v51 = vmul.f32 %v1279_v36, %v785_v49 }
  0xe5   :  { %v802_v54 = vadd.f32 %v1280_v43, %v794_v51 }
  0xe7   :  { %vm806_vm1 = vcmp.gt.f32.partialorder %v802_v54, 0.0  ;;  %v810_v56 = vmul.f32 0.2, %v802_v54 }
  0xe9   :  { %v814_v59 = vsel %vm806_vm1, %v802_v54, %v810_v56 }
  0xea   :  { %v822_v62 = vmul.f32 %v818_v57, %v814_v59 }
  0xec   :  { %840 = vmatpush.msra.mxu0 %v822_v62 }
  0xee   :  { %841 = vmatpush.msra.mxu0 %v821_v1 }
  0xf0   :  { %842 = vmatpush.msra.mxu0 %v820_v4 }
  0xf2   :  { %843 = vmatpush.msra.mxu0 %v819_v5 }
  0xf3   :  { %1198 = vmatmul.msk.f32.vlgmr.msra.gmra.mxu0 %vm824_vm4, %v823_v6 }
 0x170   :  { %v845_v7 = vpop.f32.mrf.mxu0 }
 0x171   :  { %848 = vadd.xlane.f32.xlu0 %v845_v7 }
 0x1e4   :  { %v849_v9 = vpop.xlane.xlu0 %848 }
 0x1e5   :  { %v852_v10 = vadd.f32 %v851_v8, %v849_v9 }
 0x1e7   :  { %v853_v11 = vsub.f32 0.0, %v852_v10 }
 0x1e9   :  { %v854_v12 = vmul.f32 1.442695, %v853_v11 }
 0x1eb   :  { %1281 = vpow2.f32 %v854_v12 }
 0x1f1   :  { %v1282_v13 = vpop.eup %1281 }
 0x1f2   :  { %v856_v14 = vadd.f32 1.0, %v1282_v13 }
 0x1f4   :  { %1283 = vrcp.f32 %v856_v14  ;;  %v868_v18 = vand.u32 2147483648, %v856_v14  ;;  %v866_v20 = vand.u32 2147483647, %v856_v14  ;;  %vm862_vm6 = vweird.f32 %v856_v14 }
 0x1f6   :  { %v869_v22 = vor.u32 1.1754944e-38, %v868_v18  ;;  %vm867_vm9 = vcmp.eq.f32.partialorder %v866_v20, 8.507059e+37 }
 0x1fa   :  { %v1284_v15 = vpop.eup %1283 }
 0x1fb   :  { %v858_v16 = vmul.f32 %v1284_v15, %v856_v14  ;;  %vm863_vm5 = vweird.f32 %v1284_v15 }
 0x1fc   :  { %vm864_vm7 = vmor %vm862_vm6, %vm863_vm5 }
 0x1fd   :  { %v859_v17 = vsub.f32 1.0, %v858_v16 }
 0x1ff   :  { %v860_v19 = vmul.f32 %v1284_v15, %v859_v17 }
 0x201   :  { %v861_v21 = vadd.f32 %v1284_v15, %v860_v19 }
 0x203   :  { %v865_v23 = vsel %vm864_vm7, %v1284_v15, %v861_v21 }
 0x204   :  { %v870_v24 = vsel %vm867_vm9, %v869_v22, %v865_v23 }
 0x205   :  { %873 = vst.msk [vmem:[%s1647_s7] sm:$0xff] %vm872_vm8, %v870_v24 }

</bundles_post_ra>
